<compile_context>
chip_gen: v6e
topology: v6e:2x2x1
jax: 0.10.0
libtpu: 0.0.40
codegen_flags: <defaults>
</compile_context>

<pallas_src>
import math
from functools import partial

import jax
import jax.numpy as jnp
from jax.experimental import pallas as pl
from jax.experimental.pallas import tpu as pltpu


MATMUL_DTYPE = jnp.bfloat16          # MXU-native; set to jnp.float32 for exact f32
VMEM_LIMIT_BYTES = 32 * 1024 * 1024  # safe scoped-VMEM budget on v5e/v6e/v7x
_TM_MAX, _TN_MAX, _TK_MAX = 256, 256, 512
LN_EPS = 1e-5


def _round_up(x, m):
    return (x + m - 1) // m * m


# ----------------------------------------------------------------------------
# In-kernel helpers (operate on loaded VMEM values)
# ----------------------------------------------------------------------------

def _layernorm(z, g, b, eps):
    """LayerNorm over the last axis; z f32 (S, D), g/b (1, D)."""
    mean = jnp.mean(z, axis=-1, keepdims=True)
    var = jnp.mean((z - mean) ** 2, axis=-1, keepdims=True)
    return (z - mean) * jax.lax.rsqrt(var + eps) * g + b


def _mha_core(q, k, v, num_heads, d_k, scale):
    """Multi-head scaled dot-product attention for one batch element.

    q: (Sq, D), k/v: (Sk, D) in f32.  Heads are split with static lane
    slices; per-head outputs are concatenated once so the consumer (the
    out-projection matmul) sees a single D-wide tensor instead of per-head
    masked partial stores.
    """
    contract_last = (((1,), (1,)), ((), ()))  # contract last axis of both (no k.T)
    outs = []
    for h in range(num_heads):
        lo = h * d_k
        qh = q[:, lo:lo + d_k].astype(MATMUL_DTYPE)
        kh = k[:, lo:lo + d_k].astype(MATMUL_DTYPE)
        vh = v[:, lo:lo + d_k].astype(MATMUL_DTYPE)

        s = jax.lax.dot_general(
            qh, kh, contract_last, preferred_element_type=jnp.float32
        ) * scale                                       # (Sq, Sk) f32
        s = s - jnp.max(s, axis=-1, keepdims=True)      # stable softmax
        p = jnp.exp(s)
        denom = jnp.sum(p, axis=-1, keepdims=True)
        p = p * pl.reciprocal(denom, approx=True)       # EUP, frees VPU divide

        outs.append(
            jnp.dot(p.astype(MATMUL_DTYPE), vh, preferred_element_type=jnp.float32)
        )
    return jnp.concatenate(outs, axis=-1)               # (Sq, D) f32


# ----------------------------------------------------------------------------
# Fused encoder / decoder layer kernels (one pallas_call per layer)
# ----------------------------------------------------------------------------

def _encoder_layer_kernel(x_ref, wqkv_ref, bqkv_ref, wo_ref, bo_ref,
                          ln1g_ref, ln1b_ref,
                          w1_ref, b1_ref, w2_ref, b2_ref,
                          ln2g_ref, ln2b_ref,
                          o_ref, *, num_heads, d_k, eps):
    x = x_ref[0]                                    # (S, D) f32
    D = x.shape[-1]
    scale = 1.0 / math.sqrt(d_k)

    # Fused QKV projection (one matmul), heads split inside _mha_core.
    qkv = jnp.dot(x.astype(MATMUL_DTYPE), wqkv_ref[...],
                  preferred_element_type=jnp.float32) + bqkv_ref[...]
    q, k, v = qkv[:, :D], qkv[:, D:2 * D], qkv[:, 2 * D:]
    attn = _mha_core(q, k, v, num_heads, d_k, scale)
    attn = jnp.dot(attn.astype(MATMUL_DTYPE), wo_ref[...],
                   preferred_element_type=jnp.float32) + bo_ref[...]
    x = _layernorm(x + attn, ln1g_ref[...], ln1b_ref[...], eps)

    # Position-wise feed-forward.
    h = jnp.dot(x.astype(MATMUL_DTYPE), w1_ref[...],
                preferred_element_type=jnp.float32) + b1_ref[...]
    h = jnp.maximum(h, 0.0)
    ff = jnp.dot(h.astype(MATMUL_DTYPE), w2_ref[...],
                 preferred_element_type=jnp.float32) + b2_ref[...]
    x = _layernorm(x + ff, ln2g_ref[...], ln2b_ref[...], eps)

    o_ref[0] = x.astype(o_ref.dtype)


def _decoder_layer_kernel(x_ref, mem_ref,
                          s_wqkv_ref, s_bqkv_ref, s_wo_ref, s_bo_ref,
                          ln1g_ref, ln1b_ref,
                          c_wq_ref, c_bq_ref, c_wkv_ref, c_bkv_ref,
                          c_wo_ref, c_bo_ref,
                          ln2g_ref, ln2b_ref,
                          w1_ref, b1_ref, w2_ref, b2_ref,
                          ln3g_ref, ln3b_ref,
                          o_ref, *, num_heads, d_k, eps):
    x = x_ref[0]          # (S_tgt, D) f32
    mem = mem_ref[0]      # (S_src, D) f32
    D = x.shape[-1]
    scale = 1.0 / math.sqrt(d_k)

    # Self-attention  (TODO(synk): tgt_mask support; module default is None)
    qkv = jnp.dot(x.astype(MATMUL_DTYPE), s_wqkv_ref[...],
                  preferred_element_type=jnp.float32) + s_bqkv_ref[...]
    q, k, v = qkv[:, :D], qkv[:, D:2 * D], qkv[:, 2 * D:]
    attn = _mha_core(q, k, v, num_heads, d_k, scale)
    attn = jnp.dot(attn.astype(MATMUL_DTYPE), s_wo_ref[...],
                   preferred_element_type=jnp.float32) + s_bo_ref[...]
    x = _layernorm(x + attn, ln1g_ref[...], ln1b_ref[...], eps)

    # Cross-attention: Q from decoder state, fused K/V from encoder memory.
    q = jnp.dot(x.astype(MATMUL_DTYPE), c_wq_ref[...],
                preferred_element_type=jnp.float32) + c_bq_ref[...]
    kv = jnp.dot(mem.astype(MATMUL_DTYPE), c_wkv_ref[...],
                 preferred_element_type=jnp.float32) + c_bkv_ref[...]
    k, v = kv[:, :D], kv[:, D:]
    cross = _mha_core(q, k, v, num_heads, d_k, scale)
    cross = jnp.dot(cross.astype(MATMUL_DTYPE), c_wo_ref[...],
                    preferred_element_type=jnp.float32) + c_bo_ref[...]
    x = _layernorm(x + cross, ln2g_ref[...], ln2b_ref[...], eps)

    # Feed-forward.
    h = jnp.dot(x.astype(MATMUL_DTYPE), w1_ref[...],
                preferred_element_type=jnp.float32) + b1_ref[...]
    h = jnp.maximum(h, 0.0)
    ff = jnp.dot(h.astype(MATMUL_DTYPE), w2_ref[...],
                 preferred_element_type=jnp.float32) + b2_ref[...]
    x = _layernorm(x + ff, ln3g_ref[...], ln3b_ref[...], eps)

    o_ref[0] = x.astype(o_ref.dtype)


def _full2d(shape):
    """Whole-array 2-D block with a constant index map (stays VMEM-resident
    across grid steps -- no per-step weight re-DMA)."""
    return pl.BlockSpec(shape, lambda b: (0, 0))


def encoder_layer(p, x, num_heads):
    B, S, D = x.shape
    d_k = D // num_heads
    d_ff = p["w1"].shape[1]
    return pl.pallas_call(
        partial(_encoder_layer_kernel, num_heads=num_heads, d_k=d_k, eps=LN_EPS),
        out_shape=jax.ShapeDtypeStruct((B, S, D), jnp.float32),
        grid=(B,),
        in_specs=[
            pl.BlockSpec((1, S, D), lambda b: (b, 0, 0)),
            _full2d((D, 3 * D)), _full2d((1, 3 * D)),
            _full2d((D, D)), _full2d((1, D)),
            _full2d((1, D)), _full2d((1, D)),
            _full2d((D, d_ff)), _full2d((1, d_ff)),
            _full2d((d_ff, D)), _full2d((1, D)),
            _full2d((1, D)), _full2d((1, D)),
        ],
        out_specs=pl.BlockSpec((1, S, D), lambda b: (b, 0, 0)),
        compiler_params=pltpu.CompilerParams(
            dimension_semantics=("parallel",),
            vmem_limit_bytes=VMEM_LIMIT_BYTES,
        ),
    )(x,
      p["wqkv"], p["bqkv"], p["wo"], p["bo"],
      p["ln1_g"], p["ln1_b"],
      p["w1"], p["b1"], p["w2"], p["b2"],
      p["ln2_g"], p["ln2_b"])


def decoder_layer(p, x, memory, num_heads):
    B, S, D = x.shape
    S_src = memory.shape[1]
    d_k = D // num_heads
    d_ff = p["w1"].shape[1]
    return pl.pallas_call(
        partial(_decoder_layer_kernel, num_heads=num_heads, d_k=d_k, eps=LN_EPS),
        out_shape=jax.ShapeDtypeStruct((B, S, D), jnp.float32),
        grid=(B,),
        in_specs=[
            pl.BlockSpec((1, S, D), lambda b: (b, 0, 0)),
            pl.BlockSpec((1, S_src, D), lambda b: (b, 0, 0)),
            _full2d((D, 3 * D)), _full2d((1, 3 * D)),
            _full2d((D, D)), _full2d((1, D)),
            _full2d((1, D)), _full2d((1, D)),
            _full2d((D, D)), _full2d((1, D)),
            _full2d((D, 2 * D)), _full2d((1, 2 * D)),
            _full2d((D, D)), _full2d((1, D)),
            _full2d((1, D)), _full2d((1, D)),
            _full2d((D, d_ff)), _full2d((1, d_ff)),
            _full2d((d_ff, D)), _full2d((1, D)),
            _full2d((1, D)), _full2d((1, D)),
        ],
        out_specs=pl.BlockSpec((1, S, D), lambda b: (b, 0, 0)),
        compiler_params=pltpu.CompilerParams(
            dimension_semantics=("parallel",),
            vmem_limit_bytes=VMEM_LIMIT_BYTES,
        ),
    )(x, memory,
      p["s_wqkv"], p["s_bqkv"], p["s_wo"], p["s_bo"],
      p["ln1_g"], p["ln1_b"],
      p["c_wq"], p["c_bq"], p["c_wkv"], p["c_bkv"], p["c_wo"], p["c_bo"],
      p["ln2_g"], p["ln2_b"],
      p["w1"], p["b1"], p["w2"], p["b2"],
      p["ln3_g"], p["ln3_b"])


# ----------------------------------------------------------------------------
# Generic linear (used for the final vocab projection)
# ----------------------------------------------------------------------------

def _linear_kernel(x_ref, w_ref, b_ref, o_ref, *, activation):
    """Single-K-step fast path: no accumulator scratch, no init/finalize."""
    y = jnp.dot(x_ref[...], w_ref[...], preferred_element_type=jnp.float32) + b_ref[...]
    if activation == "relu":
        y = jnp.maximum(y, 0.0)
    o_ref[...] = y.astype(o_ref.dtype)


def _linear_acc_kernel(x_ref, w_ref, b_ref, o_ref, acc_ref, *, activation):
    """K-tiled path with a VMEM f32 accumulator (only used when K > _TK_MAX)."""
    @pl.when(pl.program_id(2) == 0)
    def _():
        acc_ref[...] = jnp.zeros_like(acc_ref)

    acc_ref[...] += jnp.dot(x_ref[...], w_ref[...], preferred_element_type=jnp.float32)

    @pl.when(pl.program_id(2) == pl.num_programs(2) - 1)
    def _():
        y = acc_ref[...] + b_ref[...]
        if activation == "relu":
            y = jnp.maximum(y, 0.0)
        o_ref[...] = y.astype(o_ref.dtype)


def pallas_linear(x, w, b, activation=None):
    """y = act(x @ w + b).

    `w` is expected to be pre-cast to MATMUL_DTYPE (and pre-padded on N to a
    128-lane multiple if desired) at init time; `b` is (1, N) f32.  Only the
    activation is cast/padded here.  K stays a full-extent block (no zero
    padding / no accumulator) when K <= _TK_MAX, which covers this model.
    """
    M, K = x.shape
    Kw, N = w.shape
    assert K == Kw and b.shape == (1, N)

    # Split M into >= 2 parallel tiles when possible so a v7x megacore
    # (2 TensorCores) gets work on both cores.
    tm = min(_TM_MAX, _round_up(M, 8))
    if M >= 16 and _round_up(M, tm) // tm < 2:
        tm = _round_up(-(-M // 2), 8)
    Mp = _round_up(M, tm)

    # N: either a 128-multiple (pre-padded weight -> lane-dense stores) or
    # small enough to use a full-extent lane block.
    tn = min(_TN_MAX, N) if (N >= 128 and N % 128 == 0) else N
    Np = _round_up(N, tn)

    xc = x.astype(MATMUL_DTYPE)
    if Mp != M:
        xc = jnp.pad(xc, ((0, Mp - M), (0, 0)))

    if K <= _TK_MAX:
        out = pl.pallas_call(
            partial(_linear_kernel, activation=activation),
            out_shape=jax.ShapeDtypeStruct((Mp, Np), jnp.float32),
            grid=(Mp // tm, Np // tn),
            in_specs=[
                pl.BlockSpec((tm, K), lambda i, j: (i, 0)),
                pl.BlockSpec((K, tn), lambda i, j: (0, j)),
                pl.BlockSpec((1, tn), lambda i, j: (0, j)),
            ],
            out_specs=pl.BlockSpec((tm, tn), lambda i, j: (i, j)),
            compiler_params=pltpu.CompilerParams(
                dimension_semantics=("parallel", "parallel"),
                vmem_limit_bytes=VMEM_LIMIT_BYTES,
            ),
        )(xc, w, b)
    else:
        tk = _TK_MAX
        Kp = _round_up(K, tk)
        wc = w
        if Kp != K:
            xc = jnp.pad(xc, ((0, 0), (0, Kp - K)))
            wc = jnp.pad(wc, ((0, Kp - K), (0, 0)))
        out = pl.pallas_call(
            partial(_linear_acc_kernel, activation=activation),
            out_shape=jax.ShapeDtypeStruct((Mp, Np), jnp.float32),
            grid=(Mp // tm, Np // tn, Kp // tk),
            in_specs=[
                pl.BlockSpec((tm, tk), lambda i, j, k: (i, k)),
                pl.BlockSpec((tk, tn), lambda i, j, k: (k, j)),
                pl.BlockSpec((1, tn), lambda i, j, k: (0, j)),
            ],
            out_specs=pl.BlockSpec((tm, tn), lambda i, j, k: (i, j)),
            scratch_shapes=[pltpu.VMEM((tm, tn), jnp.float32)],
            compiler_params=pltpu.CompilerParams(
                dimension_semantics=("parallel", "parallel", "arbitrary"),
                vmem_limit_bytes=VMEM_LIMIT_BYTES,
            ),
        )(xc, wc, b)

    if (Mp, Np) != (M, N):
        out = out[:M, :N]
    return out


# ----------------------------------------------------------------------------
# Model glue (plain JAX orchestration around the Pallas kernels)
# ----------------------------------------------------------------------------

def make_positional_encoding(max_seq_length, d_model):
    position = jnp.arange(max_seq_length, dtype=jnp.float32)[:, None]
    div_term = jnp.exp(
        jnp.arange(0, d_model, 2, dtype=jnp.float32) * (-math.log(10000.0) / d_model)
    )
    pe = jnp.zeros((max_seq_length, d_model), dtype=jnp.float32)
    pe = pe.at[:, 0::2].set(jnp.sin(position * div_term))
    pe = pe.at[:, 1::2].set(jnp.cos(position * div_term))
    return pe  # (max_seq_length, d_model)


def transformer_forward(params, src, tgt, num_heads, tgt_vocab):
    pe = params["pe"]

    # Encode  (embedding gather + positional encoding are plain-JAX glue)
    x = jnp.take(params["enc_emb"], src, axis=0)               # (B, S_src, D)
    x = x + pe[None, : src.shape[1], :]
    for lp in params["encoder_layers"]:
        x = encoder_layer(lp, x, num_heads)
    enc_output = x

    # Decode
    y = jnp.take(params["dec_emb"], tgt, axis=0)                # (B, S_tgt, D)
    y = y + pe[None, : tgt.shape[1], :]
    for lp in params["decoder_layers"]:
        y = decoder_layer(lp, y, enc_output, num_heads)

    # Final projection (final_w pre-padded to 128 lanes at init; slice back)
    B, S, D = y.shape
    logits = pallas_linear(y.reshape(-1, D), params["final_w"], params["final_b"])
    return logits[:, :tgt_vocab].reshape(B, S, tgt_vocab)


# ----------------------------------------------------------------------------
# Deterministic parameter initialization
# (weights pre-cast to MATMUL_DTYPE and pre-padded once, per the perf review)
# ----------------------------------------------------------------------------

def _init_linear(key, d_in, d_out, scale=0.02):
    w = scale * jax.random.normal(key, (d_in, d_out), dtype=jnp.float32)
    b = jnp.zeros((d_out,), dtype=jnp.float32)
    return w, b


def _init_mha_self(key, d_model):
    ks = jax.random.split(key, 4)
    wq, bq = _init_linear(ks[0], d_model, d_model)
    wk, bk = _init_linear(ks[1], d_model, d_model)
    wv, bv = _init_linear(ks[2], d_model, d_model)
    wo, bo = _init_linear(ks[3], d_model, d_model)
    return dict(
        wqkv=jnp.concatenate([wq, wk, wv], axis=1).astype(MATMUL_DTYPE),
        bqkv=jnp.concatenate([bq, bk, bv], axis=0).reshape(1, -1),
        wo=wo.astype(MATMUL_DTYPE),
        bo=bo.reshape(1, -1),
    )


def _init_mha_cross(key, d_model):
    ks = jax.random.split(key, 4)
    wq, bq = _init_linear(ks[0], d_model, d_model)
    wk, bk = _init_linear(ks[1], d_model, d_model)
    wv, bv = _init_linear(ks[2], d_model, d_model)
    wo, bo = _init_linear(ks[3], d_model, d_model)
    return dict(
        wq=wq.astype(MATMUL_DTYPE),
        bq=bq.reshape(1, -1),
        wkv=jnp.concatenate([wk, wv], axis=1).astype(MATMUL_DTYPE),
        bkv=jnp.concatenate([bk, bv], axis=0).reshape(1, -1),
        wo=wo.astype(MATMUL_DTYPE),
        bo=bo.reshape(1, -1),
    )


def _init_ff(key, d_model, d_ff):
    k1, k2 = jax.random.split(key)
    w1, b1 = _init_linear(k1, d_model, d_ff)
    w2, b2 = _init_linear(k2, d_ff, d_model)
    return dict(
        w1=w1.astype(MATMUL_DTYPE), b1=b1.reshape(1, -1),
        w2=w2.astype(MATMUL_DTYPE), b2=b2.reshape(1, -1),
    )


def _init_encoder_layer(key, d_model, d_ff):
    k1, k2 = jax.random.split(key)
    sa = _init_mha_self(k1, d_model)
    ff = _init_ff(k2, d_model, d_ff)
    ones = jnp.ones((1, d_model), jnp.float32)
    zeros = jnp.zeros((1, d_model), jnp.float32)
    return dict(
        wqkv=sa["wqkv"], bqkv=sa["bqkv"], wo=sa["wo"], bo=sa["bo"],
        w1=ff["w1"], b1=ff["b1"], w2=ff["w2"], b2=ff["b2"],
        ln1_g=ones, ln1_b=zeros, ln2_g=ones, ln2_b=zeros,
    )


def _init_decoder_layer(key, d_model, d_ff):
    k1, k2, k3 = jax.random.split(key, 3)
    sa = _init_mha_self(k1, d_model)
    ca = _init_mha_cross(k2, d_model)
    ff = _init_ff(k3, d_model, d_ff)
    ones = jnp.ones((1, d_model), jnp.float32)
    zeros = jnp.zeros((1, d_model), jnp.float32)
    return dict(
        s_wqkv=sa["wqkv"], s_bqkv=sa["bqkv"], s_wo=sa["wo"], s_bo=sa["bo"],
        c_wq=ca["wq"], c_bq=ca["bq"], c_wkv=ca["wkv"], c_bkv=ca["bkv"],
        c_wo=ca["wo"], c_bo=ca["bo"],
        w1=ff["w1"], b1=ff["b1"], w2=ff["w2"], b2=ff["b2"],
        ln1_g=ones, ln1_b=zeros, ln2_g=ones, ln2_b=zeros,
        ln3_g=ones, ln3_b=zeros,
    )


def init_transformer_params(
    key, src_vocab, tgt_vocab, d_model, num_heads, num_layers, d_ff, max_seq_length
):
    assert d_model % num_heads == 0
    keys = jax.random.split(key, 3 + 2 * num_layers)
    enc_emb = 0.02 * jax.random.normal(keys[0], (src_vocab, d_model), jnp.float32)
    dec_emb = 0.02 * jax.random.normal(keys[1], (tgt_vocab, d_model), jnp.float32)

    # Final projection weight: cast to bf16 and pad the vocab axis up to a
    # 128-lane multiple ONCE here (lane-dense stores, zero cost per forward).
    final_w, final_b = _init_linear(keys[2], d_model, tgt_vocab)
    vocab_p = _round_up(tgt_vocab, 128)
    final_w = jnp.pad(final_w, ((0, 0), (0, vocab_p - tgt_vocab))).astype(MATMUL_DTYPE)
    final_b = jnp.pad(final_b, (0, vocab_p - tgt_vocab)).reshape(1, -1)

    enc_layers = [
        _init_encoder_layer(keys[3 + i], d_model, d_ff) for i in range(num_layers)
    ]
    dec_layers = [
        _init_decoder_layer(keys[3 + num_layers + i], d_model, d_ff)
        for i in range(num_layers)
    ]
    return dict(
        enc_emb=enc_emb,
        dec_emb=dec_emb,
        pe=make_positional_encoding(max_seq_length, d_model),
        encoder_layers=enc_layers,
        decoder_layers=dec_layers,
        final_w=final_w,
        final_b=final_b,
    )


# ----------------------------------------------------------------------------
# Main
# ----------------------------------------------------------------------------

if __name__ == "__main__":
    # Small configuration
    src_vocab_size = 50
    tgt_vocab_size = 50
    d_model = 32
    num_heads = 4
    num_layers = 2
    d_ff = 64
    max_seq_length = 64
    batch = 2
    seq = 8

    key = jax.random.PRNGKey(0)
    pkey, skey, tkey = jax.random.split(key, 3)

    params = init_transformer_params(
        pkey, src_vocab_size, tgt_vocab_size, d_model, num_heads,
        num_layers, d_ff, max_seq_length
    )

    src = jax.random.randint(skey, (batch, seq), 0, src_vocab_size, dtype=jnp.int32)
    tgt = jax.random.randint(tkey, (batch, seq), 0, tgt_vocab_size, dtype=jnp.int32)

    forward = jax.jit(transformer_forward, static_argnums=(3, 4))
    logits = forward(params, src, tgt, num_heads, tgt_vocab_size)
    logits = jax.block_until_ready(logits)

    assert logits.shape == (batch, seq, tgt_vocab_size), logits.shape
    assert bool(jnp.all(jnp.isfinite(logits)))
    print("KERNEL_OK")
</pallas_src>

<mosaic_0001>
module attributes {stable_mosaic.version = 11 : i64} {
  func.func @_linear_kernel(%arg0: i32, %arg1: i32, %arg2: memref<8x32xbf16, #tpu.memory_space<vmem>>, %arg3: memref<32x128xbf16, #tpu.memory_space<vmem>>, %arg4: memref<1x128xf32, #tpu.memory_space<vmem>>, %arg5: memref<8x128xf32, #tpu.memory_space<vmem>>) attributes {dimension_semantics = [#tpu.dimension_semantics<parallel>, #tpu.dimension_semantics<parallel>], iteration_bounds = array<i64: 2, 1>, scalar_prefetch = 0 : i64, scratch_operands = 0 : i64, tpu.core_type = #tpu.core_type<tc>, window_params = [{transform_indices = @transform_0, window_bounds = array<i64: 8, 32>}, {transform_indices = @transform_1, window_bounds = array<i64: 32, 128>}, {transform_indices = @transform_2, window_bounds = array<i64: 1, 128>}, {transform_indices = @transform_3, window_bounds = array<i64: 8, 128>}]} {
    %c0 = arith.constant 0 : index
    %c0_0 = arith.constant 0 : index
    %0 = vector.load %arg2[%c0, %c0_0] : memref<8x32xbf16, #tpu.memory_space<vmem>>, vector<8x32xbf16>
    %c0_1 = arith.constant 0 : index
    %c0_2 = arith.constant 0 : index
    %1 = vector.load %arg3[%c0_1, %c0_2] : memref<32x128xbf16, #tpu.memory_space<vmem>>, vector<32x128xbf16>
    %cst = arith.constant dense<0.000000e+00> : vector<8x128xf32>
    %2 = tpu.matmul %0, %1, %cst {dimension_numbers = #tpu.dot_dimension_numbers<[1], [0], [0], [1], [0, 0, 1, 1], [], []>} : vector<8x32xbf16>, vector<32x128xbf16>, vector<8x128xf32> -> vector<8x128xf32>
    %c0_3 = arith.constant 0 : index
    %c0_4 = arith.constant 0 : index
    %3 = vector.load %arg4[%c0_3, %c0_4] : memref<1x128xf32, #tpu.memory_space<vmem>>, vector<1x128xf32>
    %4 = vector.broadcast %3 : vector<1x128xf32> to vector<8x128xf32>
    %5 = arith.addf %2, %4 : vector<8x128xf32>
    %c0_5 = arith.constant 0 : index
    %c0_6 = arith.constant 0 : index
    %6 = vector.load %arg5[%c0_5, %c0_6] : memref<8x128xf32, #tpu.memory_space<vmem>>, vector<8x128xf32>
    tpu.vector_store %arg5[%c0_5, %c0_6], %5 {strides = array<i32>} : memref<8x128xf32, #tpu.memory_space<vmem>>, vector<8x128xf32>,
    return
  }
  func.func @transform_0(%arg0: i32, %arg1: i32) -> (i32, i32) {
    %c0_i32 = arith.constant 0 : i32
    %c0_i32_0 = arith.constant 0 : i32
    return %arg0, %c0_i32 : i32, i32
  }
  func.func @transform_1(%arg0: i32, %arg1: i32) -> (i32, i32) {
    %c0_i32 = arith.constant 0 : i32
    %c0_i32_0 = arith.constant 0 : i32
    return %c0_i32, %arg1 : i32, i32
  }
  func.func @transform_2(%arg0: i32, %arg1: i32) -> (i32, i32) {
    %c0_i32 = arith.constant 0 : i32
    %c0_i32_0 = arith.constant 0 : i32
    return %c0_i32, %arg1 : i32, i32
  }
  func.func @transform_3(%arg0: i32, %arg1: i32) -> (i32, i32) {
    %c0_i32 = arith.constant 0 : i32
    return %arg0, %arg1 : i32, i32
  }
}

module attributes {stable_mosaic.version = 11 : i64} {
  func.func @_encoder_layer_kernel(%arg0: i32, %arg1: memref<1x8x32xf32, #tpu.memory_space<vmem>>, %arg2: memref<32x96xbf16, #tpu.memory_space<vmem>>, %arg3: memref<1x96xf32, #tpu.memory_space<vmem>>, %arg4: memref<32x32xbf16, #tpu.memory_space<vmem>>, %arg5: memref<1x32xf32, #tpu.memory_space<vmem>>, %arg6: memref<1x32xf32, #tpu.memory_space<vmem>>, %arg7: memref<1x32xf32, #tpu.memory_space<vmem>>, %arg8: memref<32x64xbf16, #tpu.memory_space<vmem>>, %arg9: memref<1x64xf32, #tpu.memory_space<vmem>>, %arg10: memref<64x32xbf16, #tpu.memory_space<vmem>>, %arg11: memref<1x32xf32, #tpu.memory_space<vmem>>, %arg12: memref<1x32xf32, #tpu.memory_space<vmem>>, %arg13: memref<1x32xf32, #tpu.memory_space<vmem>>, %arg14: memref<1x8x32xf32, #tpu.memory_space<vmem>>) attributes {dimension_semantics = [#tpu.dimension_semantics<parallel>], iteration_bounds = array<i64: 2>, scalar_prefetch = 0 : i64, scratch_operands = 0 : i64, tpu.core_type = #tpu.core_type<tc>, window_params = [{transform_indices = @transform_0, window_bounds = array<i64: 1, 8, 32>}, {pipeline_mode = #tpu.pipeline_mode<synchronous>, transform_indices = @transform_1, window_bounds = array<i64: 32, 96>}, {pipeline_mode = #tpu.pipeline_mode<synchronous>, transform_indices = @transform_2, window_bounds = array<i64: 1, 96>}, {pipeline_mode = #tpu.pipeline_mode<synchronous>, transform_indices = @transform_3, window_bounds = array<i64: 32, 32>}, {pipeline_mode = #tpu.pipeline_mode<synchronous>, transform_indices = @transform_4, window_bounds = array<i64: 1, 32>}, {pipeline_mode = #tpu.pipeline_mode<synchronous>, transform_indices = @transform_5, window_bounds = array<i64: 1, 32>}, {pipeline_mode = #tpu.pipeline_mode<synchronous>, transform_indices = @transform_6, window_bounds = array<i64: 1, 32>}, {pipeline_mode = #tpu.pipeline_mode<synchronous>, transform_indices = @transform_7, window_bounds = array<i64: 32, 64>}, {pipeline_mode = #tpu.pipeline_mode<synchronous>, transform_indices = @transform_8, window_bounds = array<i64: 1, 64>}, {pipeline_mode = #tpu.pipeline_mode<synchronous>, transform_indices = @transform_9, window_bounds = array<i64: 64, 32>}, {pipeline_mode = #tpu.pipeline_mode<synchronous>, transform_indices = @transform_10, window_bounds = array<i64: 1, 32>}, {pipeline_mode = #tpu.pipeline_mode<synchronous>, transform_indices = @transform_11, window_bounds = array<i64: 1, 32>}, {pipeline_mode = #tpu.pipeline_mode<synchronous>, transform_indices = @transform_12, window_bounds = array<i64: 1, 32>}, {transform_indices = @transform_13, window_bounds = array<i64: 1, 8, 32>}]} {
    %c0 = arith.constant 0 : index
    %c0_0 = arith.constant 0 : index
    %c0_1 = arith.constant 0 : index
    %0 = vector.load %arg1[%c0, %c0_0, %c0_1] : memref<1x8x32xf32, #tpu.memory_space<vmem>>, vector<1x8x32xf32>
    %1 = vector.shape_cast %0 : vector<1x8x32xf32> to vector<8x32xf32>
    %2 = arith.truncf %1 : vector<8x32xf32> to vector<8x32xbf16>
    %c0_2 = arith.constant 0 : index
    %c0_3 = arith.constant 0 : index
    %3 = vector.load %arg2[%c0_2, %c0_3] : memref<32x96xbf16, #tpu.memory_space<vmem>>, vector<32x96xbf16>
    %cst = arith.constant dense<0.000000e+00> : vector<8x96xf32>
    %4 = tpu.matmul %2, %3, %cst {dimension_numbers = #tpu.dot_dimension_numbers<[1], [0], [0], [1], [0, 0, 1, 1], [], []>} : vector<8x32xbf16>, vector<32x96xbf16>, vector<8x96xf32> -> vector<8x96xf32>
    %c0_4 = arith.constant 0 : index
    %c0_5 = arith.constant 0 : index
    %5 = vector.load %arg3[%c0_4, %c0_5] : memref<1x96xf32, #tpu.memory_space<vmem>>, vector<1x96xf32>
    %6 = vector.broadcast %5 : vector<1x96xf32> to vector<8x96xf32>
    %7 = arith.addf %4, %6 : vector<8x96xf32>
    %8 = vector.extract_strided_slice %7 {offsets = [0, 0], sizes = [8, 32], strides = [1, 1]} : vector<8x96xf32> to vector<8x32xf32>
    %9 = vector.extract_strided_slice %7 {offsets = [0, 32], sizes = [8, 32], strides = [1, 1]} : vector<8x96xf32> to vector<8x32xf32>
    %10 = vector.extract_strided_slice %7 {offsets = [0, 64], sizes = [8, 32], strides = [1, 1]} : vector<8x96xf32> to vector<8x32xf32>
    %11 = vector.extract_strided_slice %8 {offsets = [0, 0], sizes = [8, 8], strides = [1, 1]} : vector<8x32xf32> to vector<8x8xf32>
    %12 = arith.truncf %11 : vector<8x8xf32> to vector<8x8xbf16>
    %13 = vector.extract_strided_slice %9 {offsets = [0, 0], sizes = [8, 8], strides = [1, 1]} : vector<8x32xf32> to vector<8x8xf32>
    %14 = arith.truncf %13 : vector<8x8xf32> to vector<8x8xbf16>
    %15 = vector.extract_strided_slice %10 {offsets = [0, 0], sizes = [8, 8], strides = [1, 1]} : vector<8x32xf32> to vector<8x8xf32>
    %16 = arith.truncf %15 : vector<8x8xf32> to vector<8x8xbf16>
    %cst_6 = arith.constant dense<0.000000e+00> : vector<8x8xf32>
    %17 = tpu.matmul %12, %14, %cst_6 {dimension_numbers = #tpu.dot_dimension_numbers<[1], [1], [0], [0], [0, 0, 1, 0], [], []>} : vector<8x8xbf16>, vector<8x8xbf16>, vector<8x8xf32> -> vector<8x8xf32>
    %cst_7 = arith.constant 0.353553385 : f32
    %18 = vector.broadcast %cst_7 : f32 to vector<8x8xf32>
    %19 = arith.mulf %17, %18 : vector<8x8xf32>
    %cst_8 = arith.constant dense<0xFF800000> : vector<8xf32>
    %20 = vector.multi_reduction <maximumf>, %19, %cst_8 [1] : vector<8x8xf32> to vector<8xf32>
    %21 = vector.shape_cast %20 : vector<8xf32> to vector<8x1xf32>
    %22 = vector.broadcast %21 : vector<8x1xf32> to vector<8x8xf32>
    %23 = arith.subf %19, %22 : vector<8x8xf32>
    %24 = math.exp %23 : vector<8x8xf32>
    %cst_9 = arith.constant dense<0.000000e+00> : vector<8xf32>
    %25 = vector.multi_reduction <add>, %24, %cst_9 [1] : vector<8x8xf32> to vector<8xf32>
    %26 = vector.shape_cast %25 : vector<8xf32> to vector<8x1xf32>
    %27 = tpu.reciprocal %26 {approx = true} : vector<8x1xf32> -> vector<8x1xf32>
    %28 = vector.broadcast %27 : vector<8x1xf32> to vector<8x8xf32>
    %29 = arith.mulf %24, %28 : vector<8x8xf32>
    %30 = arith.truncf %29 : vector<8x8xf32> to vector<8x8xbf16>
    %cst_10 = arith.constant dense<0.000000e+00> : vector<8x8xf32>
    %31 = tpu.matmul %30, %16, %cst_10 {dimension_numbers = #tpu.dot_dimension_numbers<[1], [0], [0], [1], [0, 0, 1, 1], [], []>} : vector<8x8xbf16>, vector<8x8xbf16>, vector<8x8xf32> -> vector<8x8xf32>
    %32 = vector.extract_strided_slice %8 {offsets = [0, 8], sizes = [8, 8], strides = [1, 1]} : vector<8x32xf32> to vector<8x8xf32>
    %33 = arith.truncf %32 : vector<8x8xf32> to vector<8x8xbf16>
    %34 = vector.extract_strided_slice %9 {offsets = [0, 8], sizes = [8, 8], strides = [1, 1]} : vector<8x32xf32> to vector<8x8xf32>
    %35 = arith.truncf %34 : vector<8x8xf32> to vector<8x8xbf16>
    %36 = vector.extract_strided_slice %10 {offsets = [0, 8], sizes = [8, 8], strides = [1, 1]} : vector<8x32xf32> to vector<8x8xf32>
    %37 = arith.truncf %36 : vector<8x8xf32> to vector<8x8xbf16>
    %cst_11 = arith.constant dense<0.000000e+00> : vector<8x8xf32>
    %38 = tpu.matmul %33, %35, %cst_11 {dimension_numbers = #tpu.dot_dimension_numbers<[1], [1], [0], [0], [0, 0, 1, 0], [], []>} : vector<8x8xbf16>, vector<8x8xbf16>, vector<8x8xf32> -> vector<8x8xf32>
    %cst_12 = arith.constant 0.353553385 : f32
    %39 = vector.broadcast %cst_12 : f32 to vector<8x8xf32>
    %40 = arith.mulf %38, %39 : vector<8x8xf32>
    %cst_13 = arith.constant dense<0xFF800000> : vector<8xf32>
    %41 = vector.multi_reduction <maximumf>, %40, %cst_13 [1] : vector<8x8xf32> to vector<8xf32>
    %42 = vector.shape_cast %41 : vector<8xf32> to vector<8x1xf32>
    %43 = vector.broadcast %42 : vector<8x1xf32> to vector<8x8xf32>
    %44 = arith.subf %40, %43 : vector<8x8xf32>
    %45 = math.exp %44 : vector<8x8xf32>
    %cst_14 = arith.constant dense<0.000000e+00> : vector<8xf32>
    %46 = vector.multi_reduction <add>, %45, %cst_14 [1] : vector<8x8xf32> to vector<8xf32>
    %47 = vector.shape_cast %46 : vector<8xf32> to vector<8x1xf32>
    %48 = tpu.reciprocal %47 {approx = true} : vector<8x1xf32> -> vector<8x1xf32>
    %49 = vector.broadcast %48 : vector<8x1xf32> to vector<8x8xf32>
    %50 = arith.mulf %45, %49 : vector<8x8xf32>
    %51 = arith.truncf %50 : vector<8x8xf32> to vector<8x8xbf16>
    %cst_15 = arith.constant dense<0.000000e+00> : vector<8x8xf32>
    %52 = tpu.matmul %51, %37, %cst_15 {dimension_numbers = #tpu.dot_dimension_numbers<[1], [0], [0], [1], [0, 0, 1, 1], [], []>} : vector<8x8xbf16>, vector<8x8xbf16>, vector<8x8xf32> -> vector<8x8xf32>
    %53 = vector.extract_strided_slice %8 {offsets = [0, 16], sizes = [8, 8], strides = [1, 1]} : vector<8x32xf32> to vector<8x8xf32>
    %54 = arith.truncf %53 : vector<8x8xf32> to vector<8x8xbf16>
    %55 = vector.extract_strided_slice %9 {offsets = [0, 16], sizes = [8, 8], strides = [1, 1]} : vector<8x32xf32> to vector<8x8xf32>
    %56 = arith.truncf %55 : vector<8x8xf32> to vector<8x8xbf16>
    %57 = vector.extract_strided_slice %10 {offsets = [0, 16], sizes = [8, 8], strides = [1, 1]} : vector<8x32xf32> to vector<8x8xf32>
    %58 = arith.truncf %57 : vector<8x8xf32> to vector<8x8xbf16>
    %cst_16 = arith.constant dense<0.000000e+00> : vector<8x8xf32>
    %59 = tpu.matmul %54, %56, %cst_16 {dimension_numbers = #tpu.dot_dimension_numbers<[1], [1], [0], [0], [0, 0, 1, 0], [], []>} : vector<8x8xbf16>, vector<8x8xbf16>, vector<8x8xf32> -> vector<8x8xf32>
    %cst_17 = arith.constant 0.353553385 : f32
    %60 = vector.broadcast %cst_17 : f32 to vector<8x8xf32>
    %61 = arith.mulf %59, %60 : vector<8x8xf32>
    %cst_18 = arith.constant dense<0xFF800000> : vector<8xf32>
    %62 = vector.multi_reduction <maximumf>, %61, %cst_18 [1] : vector<8x8xf32> to vector<8xf32>
    %63 = vector.shape_cast %62 : vector<8xf32> to vector<8x1xf32>
    %64 = vector.broadcast %63 : vector<8x1xf32> to vector<8x8xf32>
    %65 = arith.subf %61, %64 : vector<8x8xf32>
    %66 = math.exp %65 : vector<8x8xf32>
    %cst_19 = arith.constant dense<0.000000e+00> : vector<8xf32>
    %67 = vector.multi_reduction <add>, %66, %cst_19 [1] : vector<8x8xf32> to vector<8xf32>
    %68 = vector.shape_cast %67 : vector<8xf32> to vector<8x1xf32>
    %69 = tpu.reciprocal %68 {approx = true} : vector<8x1xf32> -> vector<8x1xf32>
    %70 = vector.broadcast %69 : vector<8x1xf32> to vector<8x8xf32>
    %71 = arith.mulf %66, %70 : vector<8x8xf32>
    %72 = arith.truncf %71 : vector<8x8xf32> to vector<8x8xbf16>
    %cst_20 = arith.constant dense<0.000000e+00> : vector<8x8xf32>
    %73 = tpu.matmul %72, %58, %cst_20 {dimension_numbers = #tpu.dot_dimension_numbers<[1], [0], [0], [1], [0, 0, 1, 1], [], []>} : vector<8x8xbf16>, vector<8x8xbf16>, vector<8x8xf32> -> vector<8x8xf32>
    %74 = vector.extract_strided_slice %8 {offsets = [0, 24], sizes = [8, 8], strides = [1, 1]} : vector<8x32xf32> to vector<8x8xf32>
    %75 = arith.truncf %74 : vector<8x8xf32> to vector<8x8xbf16>
    %76 = vector.extract_strided_slice %9 {offsets = [0, 24], sizes = [8, 8], strides = [1, 1]} : vector<8x32xf32> to vector<8x8xf32>
    %77 = arith.truncf %76 : vector<8x8xf32> to vector<8x8xbf16>
    %78 = vector.extract_strided_slice %10 {offsets = [0, 24], sizes = [8, 8], strides = [1, 1]} : vector<8x32xf32> to vector<8x8xf32>
    %79 = arith.truncf %78 : vector<8x8xf32> to vector<8x8xbf16>
    %cst_21 = arith.constant dense<0.000000e+00> : vector<8x8xf32>
    %80 = tpu.matmul %75, %77, %cst_21 {dimension_numbers = #tpu.dot_dimension_numbers<[1], [1], [0], [0], [0, 0, 1, 0], [], []>} : vector<8x8xbf16>, vector<8x8xbf16>, vector<8x8xf32> -> vector<8x8xf32>
    %cst_22 = arith.constant 0.353553385 : f32
    %81 = vector.broadcast %cst_22 : f32 to vector<8x8xf32>
    %82 = arith.mulf %80, %81 : vector<8x8xf32>
    %cst_23 = arith.constant dense<0xFF800000> : vector<8xf32>
    %83 = vector.multi_reduction <maximumf>, %82, %cst_23 [1] : vector<8x8xf32> to vector<8xf32>
    %84 = vector.shape_cast %83 : vector<8xf32> to vector<8x1xf32>
    %85 = vector.broadcast %84 : vector<8x1xf32> to vector<8x8xf32>
    %86 = arith.subf %82, %85 : vector<8x8xf32>
    %87 = math.exp %86 : vector<8x8xf32>
    %cst_24 = arith.constant dense<0.000000e+00> : vector<8xf32>
    %88 = vector.multi_reduction <add>, %87, %cst_24 [1] : vector<8x8xf32> to vector<8xf32>
    %89 = vector.shape_cast %88 : vector<8xf32> to vector<8x1xf32>
    %90 = tpu.reciprocal %89 {approx = true} : vector<8x1xf32> -> vector<8x1xf32>
    %91 = vector.broadcast %90 : vector<8x1xf32> to vector<8x8xf32>
    %92 = arith.mulf %87, %91 : vector<8x8xf32>
    %93 = arith.truncf %92 : vector<8x8xf32> to vector<8x8xbf16>
    %cst_25 = arith.constant dense<0.000000e+00> : vector<8x8xf32>
    %94 = tpu.matmul %93, %79, %cst_25 {dimension_numbers = #tpu.dot_dimension_numbers<[1], [0], [0], [1], [0, 0, 1, 1], [], []>} : vector<8x8xbf16>, vector<8x8xbf16>, vector<8x8xf32> -> vector<8x8xf32>
    %95 = tpu.concatenate %31, %52, %73, %94 in 1 : vector<8x8xf32>, vector<8x8xf32>, vector<8x8xf32>, vector<8x8xf32> -> vector<8x32xf32>
    %96 = arith.truncf %95 : vector<8x32xf32> to vector<8x32xbf16>
    %c0_26 = arith.constant 0 : index
    %c0_27 = arith.constant 0 : index
    %97 = vector.load %arg4[%c0_26, %c0_27] : memref<32x32xbf16, #tpu.memory_space<vmem>>, vector<32x32xbf16>
    %cst_28 = arith.constant dense<0.000000e+00> : vector<8x32xf32>
    %98 = tpu.matmul %96, %97, %cst_28 {dimension_numbers = #tpu.dot_dimension_numbers<[1], [0], [0], [1], [0, 0, 1, 1], [], []>} : vector<8x32xbf16>, vector<32x32xbf16>, vector<8x32xf32> -> vector<8x32xf32>
    %c0_29 = arith.constant 0 : index
    %c0_30 = arith.constant 0 : index
    %99 = vector.load %arg5[%c0_29, %c0_30] : memref<1x32xf32, #tpu.memory_space<vmem>>, vector<1x32xf32>
    %100 = vector.broadcast %99 : vector<1x32xf32> to vector<8x32xf32>
    %101 = arith.addf %98, %100 : vector<8x32xf32>
    %102 = arith.addf %1, %101 : vector<8x32xf32>
    %c0_31 = arith.constant 0 : index
    %c0_32 = arith.constant 0 : index
    %103 = vector.load %arg6[%c0_31, %c0_32] : memref<1x32xf32, #tpu.memory_space<vmem>>, vector<1x32xf32>
    %c0_33 = arith.constant 0 : index
    %c0_34 = arith.constant 0 : index
    %104 = vector.load %arg7[%c0_33, %c0_34] : memref<1x32xf32, #tpu.memory_space<vmem>>, vector<1x32xf32>
    %cst_35 = arith.constant dense<0.000000e+00> : vector<8xf32>
    %105 = vector.multi_reduction <add>, %102, %cst_35 [1] : vector<8x32xf32> to vector<8xf32>
    %106 = vector.shape_cast %105 : vector<8xf32> to vector<8x1xf32>
    %cst_36 = arith.constant 3.200000e+01 : f32
    %107 = vector.broadcast %cst_36 : f32 to vector<8x1xf32>
    %108 = arith.divf %106, %107 : vector<8x1xf32>
    %109 = vector.broadcast %108 : vector<8x1xf32> to vector<8x32xf32>
    %110 = arith.subf %102, %109 : vector<8x32xf32>
    %111 = arith.mulf %110, %110 : vector<8x32xf32>
    %cst_37 = arith.constant dense<0.000000e+00> : vector<8xf32>
    %112 = vector.multi_reduction <add>, %111, %cst_37 [1] : vector<8x32xf32> to vector<8xf32>
    %113 = vector.shape_cast %112 : vector<8xf32> to vector<8x1xf32>
    %cst_38 = arith.constant 3.200000e+01 : f32
    %114 = vector.broadcast %cst_38 : f32 to vector<8x1xf32>
    %115 = arith.divf %113, %114 : vector<8x1xf32>
    %116 = vector.broadcast %108 : vector<8x1xf32> to vector<8x32xf32>
    %117 = arith.subf %102, %116 : vector<8x32xf32>
    %cst_39 = arith.constant 9.99999974E-6 : f32
    %118 = vector.broadcast %cst_39 : f32 to vector<8x1xf32>
    %119 = arith.addf %115, %118 : vector<8x1xf32>
    %120 = math.rsqrt %119 : vector<8x1xf32>
    %121 = vector.broadcast %120 : vector<8x1xf32> to vector<8x32xf32>
    %122 = arith.mulf %117, %121 : vector<8x32xf32>
    %123 = vector.broadcast %103 : vector<1x32xf32> to vector<8x32xf32>
    %124 = arith.mulf %122, %123 : vector<8x32xf32>
    %125 = vector.broadcast %104 : vector<1x32xf32> to vector<8x32xf32>
    %126 = arith.addf %124, %125 : vector<8x32xf32>
    %127 = arith.truncf %126 : vector<8x32xf32> to vector<8x32xbf16>
    %c0_40 = arith.constant 0 : index
    %c0_41 = arith.constant 0 : index
    %128 = vector.load %arg8[%c0_40, %c0_41] : memref<32x64xbf16, #tpu.memory_space<vmem>>, vector<32x64xbf16>
    %cst_42 = arith.constant dense<0.000000e+00> : vector<8x64xf32>
    %129 = tpu.matmul %127, %128, %cst_42 {dimension_numbers = #tpu.dot_dimension_numbers<[1], [0], [0], [1], [0, 0, 1, 1], [], []>} : vector<8x32xbf16>, vector<32x64xbf16>, vector<8x64xf32> -> vector<8x64xf32>
    %c0_43 = arith.constant 0 : index
    %c0_44 = arith.constant 0 : index
    %130 = vector.load %arg9[%c0_43, %c0_44] : memref<1x64xf32, #tpu.memory_space<vmem>>, vector<1x64xf32>
    %131 = vector.broadcast %130 : vector<1x64xf32> to vector<8x64xf32>
    %132 = arith.addf %129, %131 : vector<8x64xf32>
    %cst_45 = arith.constant 0.000000e+00 : f32
    %133 = vector.broadcast %cst_45 : f32 to vector<8x64xf32>
    %134 = arith.maximumf %132, %133 : vector<8x64xf32>
    %135 = arith.truncf %134 : vector<8x64xf32> to vector<8x64xbf16>
    %c0_46 = arith.constant 0 : index
    %c0_47 = arith.constant 0 : index
    %136 = vector.load %arg10[%c0_46, %c0_47] : memref<64x32xbf16, #tpu.memory_space<vmem>>, vector<64x32xbf16>
    %cst_48 = arith.constant dense<0.000000e+00> : vector<8x32xf32>
    %137 = tpu.matmul %135, %136, %cst_48 {dimension_numbers = #tpu.dot_dimension_numbers<[1], [0], [0], [1], [0, 0, 1, 1], [], []>} : vector<8x64xbf16>, vector<64x32xbf16>, vector<8x32xf32> -> vector<8x32xf32>
    %c0_49 = arith.constant 0 : index
    %c0_50 = arith.constant 0 : index
    %138 = vector.load %arg11[%c0_49, %c0_50] : memref<1x32xf32, #tpu.memory_space<vmem>>, vector<1x32xf32>
    %139 = vector.broadcast %138 : vector<1x32xf32> to vector<8x32xf32>
    %140 = arith.addf %137, %139 : vector<8x32xf32>
    %141 = arith.addf %126, %140 : vector<8x32xf32>
    %c0_51 = arith.constant 0 : index
    %c0_52 = arith.constant 0 : index
    %142 = vector.load %arg12[%c0_51, %c0_52] : memref<1x32xf32, #tpu.memory_space<vmem>>, vector<1x32xf32>
    %c0_53 = arith.constant 0 : index
    %c0_54 = arith.constant 0 : index
    %143 = vector.load %arg13[%c0_53, %c0_54] : memref<1x32xf32, #tpu.memory_space<vmem>>, vector<1x32xf32>
    %cst_55 = arith.constant dense<0.000000e+00> : vector<8xf32>
    %144 = vector.multi_reduction <add>, %141, %cst_55 [1] : vector<8x32xf32> to vector<8xf32>
    %145 = vector.shape_cast %144 : vector<8xf32> to vector<8x1xf32>
    %cst_56 = arith.constant 3.200000e+01 : f32
    %146 = vector.broadcast %cst_56 : f32 to vector<8x1xf32>
    %147 = arith.divf %145, %146 : vector<8x1xf32>
    %148 = vector.broadcast %147 : vector<8x1xf32> to vector<8x32xf32>
    %149 = arith.subf %141, %148 : vector<8x32xf32>
    %150 = arith.mulf %149, %149 : vector<8x32xf32>
    %cst_57 = arith.constant dense<0.000000e+00> : vector<8xf32>
    %151 = vector.multi_reduction <add>, %150, %cst_57 [1] : vector<8x32xf32> to vector<8xf32>
    %152 = vector.shape_cast %151 : vector<8xf32> to vector<8x1xf32>
    %cst_58 = arith.constant 3.200000e+01 : f32
    %153 = vector.broadcast %cst_58 : f32 to vector<8x1xf32>
    %154 = arith.divf %152, %153 : vector<8x1xf32>
    %155 = vector.broadcast %147 : vector<8x1xf32> to vector<8x32xf32>
    %156 = arith.subf %141, %155 : vector<8x32xf32>
    %cst_59 = arith.constant 9.99999974E-6 : f32
    %157 = vector.broadcast %cst_59 : f32 to vector<8x1xf32>
    %158 = arith.addf %154, %157 : vector<8x1xf32>
    %159 = math.rsqrt %158 : vector<8x1xf32>
    %160 = vector.broadcast %159 : vector<8x1xf32> to vector<8x32xf32>
    %161 = arith.mulf %156, %160 : vector<8x32xf32>
    %162 = vector.broadcast %142 : vector<1x32xf32> to vector<8x32xf32>
    %163 = arith.mulf %161, %162 : vector<8x32xf32>
    %164 = vector.broadcast %143 : vector<1x32xf32> to vector<8x32xf32>
    %165 = arith.addf %163, %164 : vector<8x32xf32>
    %c0_60 = arith.constant 0 : index
    %c0_61 = arith.constant 0 : index
    %c0_62 = arith.constant 0 : index
    %166 = vector.load %arg14[%c0_60, %c0_61, %c0_62] : memref<1x8x32xf32, #tpu.memory_space<vmem>>, vector<1x8x32xf32>
    %167 = vector.shape_cast %166 : vector<1x8x32xf32> to vector<8x32xf32>
    %168 = vector.shape_cast %165 : vector<8x32xf32> to vector<1x8x32xf32>
    tpu.vector_store %arg14[%c0_60, %c0_61, %c0_62], %168 {strides = array<i32>} : memref<1x8x32xf32, #tpu.memory_space<vmem>>, vector<1x8x32xf32>,
    return
  }
  func.func @transform_0(%arg0: i32) -> (i32, i32, i32) {
    %c0_i32 = arith.constant 0 : i32
    %c0_i32_0 = arith.constant 0 : i32
    %c0_i32_1 = arith.constant 0 : i32
    return %arg0, %c0_i32, %c0_i32_0 : i32, i32, i32
  }
  func.func @transform_1(%arg0: i32) -> (i32, i32) {
    %c0_i32 = arith.constant 0 : i32
    %c0_i32_0 = arith.constant 0 : i32
    %c0_i32_1 = arith.constant 0 : i32
    return %c0_i32, %c0_i32_0 : i32, i32
  }
  func.func @transform_2(%arg0: i32) -> (i32, i32) {
    %c0_i32 = arith.constant 0 : i32
    %c0_i32_0 = arith.constant 0 : i32
    %c0_i32_1 = arith.constant 0 : i32
    return %c0_i32, %c0_i32_0 : i32, i32
  }
  func.func @transform_3(%arg0: i32) -> (i32, i32) {
    %c0_i32 = arith.constant 0 : i32
    %c0_i32_0 = arith.constant 0 : i32
    %c0_i32_1 = arith.constant 0 : i32
    return %c0_i32, %c0_i32_0 : i32, i32
  }
  func.func @transform_4(%arg0: i32) -> (i32, i32) {
    %c0_i32 = arith.constant 0 : i32
    %c0_i32_0 = arith.constant 0 : i32
    %c0_i32_1 = arith.constant 0 : i32
    return %c0_i32, %c0_i32_0 : i32, i32
  }
  func.func @transform_5(%arg0: i32) -> (i32, i32) {
    %c0_i32 = arith.constant 0 : i32
    %c0_i32_0 = arith.constant 0 : i32
    %c0_i32_1 = arith.constant 0 : i32
    return %c0_i32, %c0_i32_0 : i32, i32
  }
  func.func @transform_6(%arg0: i32) -> (i32, i32) {
    %c0_i32 = arith.constant 0 : i32
    %c0_i32_0 = arith.constant 0 : i32
    %c0_i32_1 = arith.constant 0 : i32
    return %c0_i32, %c0_i32_0 : i32, i32
  }
  func.func @transform_7(%arg0: i32) -> (i32, i32) {
    %c0_i32 = arith.constant 0 : i32
    %c0_i32_0 = arith.constant 0 : i32
    %c0_i32_1 = arith.constant 0 : i32
    return %c0_i32, %c0_i32_0 : i32, i32
  }
  func.func @transform_8(%arg0: i32) -> (i32, i32) {
    %c0_i32 = arith.constant 0 : i32
    %c0_i32_0 = arith.constant 0 : i32
    %c0_i32_1 = arith.constant 0 : i32
    return %c0_i32, %c0_i32_0 : i32, i32
  }
  func.func @transform_9(%arg0: i32) -> (i32, i32) {
    %c0_i32 = arith.constant 0 : i32
    %c0_i32_0 = arith.constant 0 : i32
    %c0_i32_1 = arith.constant 0 : i32
    return %c0_i32, %c0_i32_0 : i32, i32
  }
  func.func @transform_10(%arg0: i32) -> (i32, i32) {
    %c0_i32 = arith.constant 0 : i32
    %c0_i32_0 = arith.constant 0 : i32
    %c0_i32_1 = arith.constant 0 : i32
    return %c0_i32, %c0_i32_0 : i32, i32
  }
  func.func @transform_11(%arg0: i32) -> (i32, i32) {
    %c0_i32 = arith.constant 0 : i32
    %c0_i32_0 = arith.constant 0 : i32
    %c0_i32_1 = arith.constant 0 : i32
    return %c0_i32, %c0_i32_0 : i32, i32
  }
  func.func @transform_12(%arg0: i32) -> (i32, i32) {
    %c0_i32 = arith.constant 0 : i32
    %c0_i32_0 = arith.constant 0 : i32
    %c0_i32_1 = arith.constant 0 : i32
    return %c0_i32, %c0_i32_0 : i32, i32
  }
  func.func @transform_13(%arg0: i32) -> (i32, i32, i32) {
    %c0_i32 = arith.constant 0 : i32
    %c0_i32_0 = arith.constant 0 : i32
    %c0_i32_1 = arith.constant 0 : i32
    return %arg0, %c0_i32, %c0_i32_0 : i32, i32, i32
  }
}

module attributes {stable_mosaic.version = 11 : i64} {
  func.func @_decoder_layer_kernel(%arg0: i32, %arg1: memref<1x8x32xf32, #tpu.memory_space<vmem>>, %arg2: memref<1x8x32xf32, #tpu.memory_space<vmem>>, %arg3: memref<32x96xbf16, #tpu.memory_space<vmem>>, %arg4: memref<1x96xf32, #tpu.memory_space<vmem>>, %arg5: memref<32x32xbf16, #tpu.memory_space<vmem>>, %arg6: memref<1x32xf32, #tpu.memory_space<vmem>>, %arg7: memref<1x32xf32, #tpu.memory_space<vmem>>, %arg8: memref<1x32xf32, #tpu.memory_space<vmem>>, %arg9: memref<32x32xbf16, #tpu.memory_space<vmem>>, %arg10: memref<1x32xf32, #tpu.memory_space<vmem>>, %arg11: memref<32x64xbf16, #tpu.memory_space<vmem>>, %arg12: memref<1x64xf32, #tpu.memory_space<vmem>>, %arg13: memref<32x32xbf16, #tpu.memory_space<vmem>>, %arg14: memref<1x32xf32, #tpu.memory_space<vmem>>, %arg15: memref<1x32xf32, #tpu.memory_space<vmem>>, %arg16: memref<1x32xf32, #tpu.memory_space<vmem>>, %arg17: memref<32x64xbf16, #tpu.memory_space<vmem>>, %arg18: memref<1x64xf32, #tpu.memory_space<vmem>>, %arg19: memref<64x32xbf16, #tpu.memory_space<vmem>>, %arg20: memref<1x32xf32, #tpu.memory_space<vmem>>, %arg21: memref<1x32xf32, #tpu.memory_space<vmem>>, %arg22: memref<1x32xf32, #tpu.memory_space<vmem>>, %arg23: memref<1x8x32xf32, #tpu.memory_space<vmem>>) attributes {dimension_semantics = [#tpu.dimension_semantics<parallel>], iteration_bounds = array<i64: 2>, scalar_prefetch = 0 : i64, scratch_operands = 0 : i64, tpu.core_type = #tpu.core_type<tc>, window_params = [{transform_indices = @transform_0, window_bounds = array<i64: 1, 8, 32>}, {transform_indices = @transform_1, window_bounds = array<i64: 1, 8, 32>}, {pipeline_mode = #tpu.pipeline_mode<synchronous>, transform_indices = @transform_2, window_bounds = array<i64: 32, 96>}, {pipeline_mode = #tpu.pipeline_mode<synchronous>, transform_indices = @transform_3, window_bounds = array<i64: 1, 96>}, {pipeline_mode = #tpu.pipeline_mode<synchronous>, transform_indices = @transform_4, window_bounds = array<i64: 32, 32>}, {pipeline_mode = #tpu.pipeline_mode<synchronous>, transform_indices = @transform_5, window_bounds = array<i64: 1, 32>}, {pipeline_mode = #tpu.pipeline_mode<synchronous>, transform_indices = @transform_6, window_bounds = array<i64: 1, 32>}, {pipeline_mode = #tpu.pipeline_mode<synchronous>, transform_indices = @transform_7, window_bounds = array<i64: 1, 32>}, {pipeline_mode = #tpu.pipeline_mode<synchronous>, transform_indices = @transform_8, window_bounds = array<i64: 32, 32>}, {pipeline_mode = #tpu.pipeline_mode<synchronous>, transform_indices = @transform_9, window_bounds = array<i64: 1, 32>}, {pipeline_mode = #tpu.pipeline_mode<synchronous>, transform_indices = @transform_10, window_bounds = array<i64: 32, 64>}, {pipeline_mode = #tpu.pipeline_mode<synchronous>, transform_indices = @transform_11, window_bounds = array<i64: 1, 64>}, {pipeline_mode = #tpu.pipeline_mode<synchronous>, transform_indices = @transform_12, window_bounds = array<i64: 32, 32>}, {pipeline_mode = #tpu.pipeline_mode<synchronous>, transform_indices = @transform_13, window_bounds = array<i64: 1, 32>}, {pipeline_mode = #tpu.pipeline_mode<synchronous>, transform_indices = @transform_14, window_bounds = array<i64: 1, 32>}, {pipeline_mode = #tpu.pipeline_mode<synchronous>, transform_indices = @transform_15, window_bounds = array<i64: 1, 32>}, {pipeline_mode = #tpu.pipeline_mode<synchronous>, transform_indices = @transform_16, window_bounds = array<i64: 32, 64>}, {pipeline_mode = #tpu.pipeline_mode<synchronous>, transform_indices = @transform_17, window_bounds = array<i64: 1, 64>}, {pipeline_mode = #tpu.pipeline_mode<synchronous>, transform_indices = @transform_18, window_bounds = array<i64: 64, 32>}, {pipeline_mode = #tpu.pipeline_mode<synchronous>, transform_indices = @transform_19, window_bounds = array<i64: 1, 32>}, {pipeline_mode = #tpu.pipeline_mode<synchronous>, transform_indices = @transform_20, window_bounds = array<i64: 1, 32>}, {pipeline_mode = #tpu.pipeline_mode<synchronous>, transform_indices = @transform_21, window_bounds = array<i64: 1, 32>}, {transform_indices = @transform_22, window_bounds = array<i64: 1, 8, 32>}]} {
    %c0 = arith.constant 0 : index
    %c0_0 = arith.constant 0 : index
    %c0_1 = arith.constant 0 : index
    %0 = vector.load %arg1[%c0, %c0_0, %c0_1] : memref<1x8x32xf32, #tpu.memory_space<vmem>>, vector<1x8x32xf32>
    %1 = vector.shape_cast %0 : vector<1x8x32xf32> to vector<8x32xf32>
    %c0_2 = arith.constant 0 : index
    %c0_3 = arith.constant 0 : index
    %c0_4 = arith.constant 0 : index
    %2 = vector.load %arg2[%c0_2, %c0_3, %c0_4] : memref<1x8x32xf32, #tpu.memory_space<vmem>>, vector<1x8x32xf32>
    %3 = vector.shape_cast %2 : vector<1x8x32xf32> to vector<8x32xf32>
    %4 = arith.truncf %1 : vector<8x32xf32> to vector<8x32xbf16>
    %c0_5 = arith.constant 0 : index
    %c0_6 = arith.constant 0 : index
    %5 = vector.load %arg3[%c0_5, %c0_6] : memref<32x96xbf16, #tpu.memory_space<vmem>>, vector<32x96xbf16>
    %cst = arith.constant dense<0.000000e+00> : vector<8x96xf32>
    %6 = tpu.matmul %4, %5, %cst {dimension_numbers = #tpu.dot_dimension_numbers<[1], [0], [0], [1], [0, 0, 1, 1], [], []>} : vector<8x32xbf16>, vector<32x96xbf16>, vector<8x96xf32> -> vector<8x96xf32>
    %c0_7 = arith.constant 0 : index
    %c0_8 = arith.constant 0 : index
    %7 = vector.load %arg4[%c0_7, %c0_8] : memref<1x96xf32, #tpu.memory_space<vmem>>, vector<1x96xf32>
    %8 = vector.broadcast %7 : vector<1x96xf32> to vector<8x96xf32>
    %9 = arith.addf %6, %8 : vector<8x96xf32>
    %10 = vector.extract_strided_slice %9 {offsets = [0, 0], sizes = [8, 32], strides = [1, 1]} : vector<8x96xf32> to vector<8x32xf32>
    %11 = vector.extract_strided_slice %9 {offsets = [0, 32], sizes = [8, 32], strides = [1, 1]} : vector<8x96xf32> to vector<8x32xf32>
    %12 = vector.extract_strided_slice %9 {offsets = [0, 64], sizes = [8, 32], strides = [1, 1]} : vector<8x96xf32> to vector<8x32xf32>
    %13 = vector.extract_strided_slice %10 {offsets = [0, 0], sizes = [8, 8], strides = [1, 1]} : vector<8x32xf32> to vector<8x8xf32>
    %14 = arith.truncf %13 : vector<8x8xf32> to vector<8x8xbf16>
    %15 = vector.extract_strided_slice %11 {offsets = [0, 0], sizes = [8, 8], strides = [1, 1]} : vector<8x32xf32> to vector<8x8xf32>
    %16 = arith.truncf %15 : vector<8x8xf32> to vector<8x8xbf16>
    %17 = vector.extract_strided_slice %12 {offsets = [0, 0], sizes = [8, 8], strides = [1, 1]} : vector<8x32xf32> to vector<8x8xf32>
    %18 = arith.truncf %17 : vector<8x8xf32> to vector<8x8xbf16>
    %cst_9 = arith.constant dense<0.000000e+00> : vector<8x8xf32>
    %19 = tpu.matmul %14, %16, %cst_9 {dimension_numbers = #tpu.dot_dimension_numbers<[1], [1], [0], [0], [0, 0, 1, 0], [], []>} : vector<8x8xbf16>, vector<8x8xbf16>, vector<8x8xf32> -> vector<8x8xf32>
    %cst_10 = arith.constant 0.353553385 : f32
    %20 = vector.broadcast %cst_10 : f32 to vector<8x8xf32>
    %21 = arith.mulf %19, %20 : vector<8x8xf32>
    %cst_11 = arith.constant dense<0xFF800000> : vector<8xf32>
    %22 = vector.multi_reduction <maximumf>, %21, %cst_11 [1] : vector<8x8xf32> to vector<8xf32>
    %23 = vector.shape_cast %22 : vector<8xf32> to vector<8x1xf32>
    %24 = vector.broadcast %23 : vector<8x1xf32> to vector<8x8xf32>
    %25 = arith.subf %21, %24 : vector<8x8xf32>
    %26 = math.exp %25 : vector<8x8xf32>
    %cst_12 = arith.constant dense<0.000000e+00> : vector<8xf32>
    %27 = vector.multi_reduction <add>, %26, %cst_12 [1] : vector<8x8xf32> to vector<8xf32>
    %28 = vector.shape_cast %27 : vector<8xf32> to vector<8x1xf32>
    %29 = tpu.reciprocal %28 {approx = true} : vector<8x1xf32> -> vector<8x1xf32>
    %30 = vector.broadcast %29 : vector<8x1xf32> to vector<8x8xf32>
    %31 = arith.mulf %26, %30 : vector<8x8xf32>
    %32 = arith.truncf %31 : vector<8x8xf32> to vector<8x8xbf16>
    %cst_13 = arith.constant dense<0.000000e+00> : vector<8x8xf32>
    %33 = tpu.matmul %32, %18, %cst_13 {dimension_numbers = #tpu.dot_dimension_numbers<[1], [0], [0], [1], [0, 0, 1, 1], [], []>} : vector<8x8xbf16>, vector<8x8xbf16>, vector<8x8xf32> -> vector<8x8xf32>
    %34 = vector.extract_strided_slice %10 {offsets = [0, 8], sizes = [8, 8], strides = [1, 1]} : vector<8x32xf32> to vector<8x8xf32>
    %35 = arith.truncf %34 : vector<8x8xf32> to vector<8x8xbf16>
    %36 = vector.extract_strided_slice %11 {offsets = [0, 8], sizes = [8, 8], strides = [1, 1]} : vector<8x32xf32> to vector<8x8xf32>
    %37 = arith.truncf %36 : vector<8x8xf32> to vector<8x8xbf16>
    %38 = vector.extract_strided_slice %12 {offsets = [0, 8], sizes = [8, 8], strides = [1, 1]} : vector<8x32xf32> to vector<8x8xf32>
    %39 = arith.truncf %38 : vector<8x8xf32> to vector<8x8xbf16>
    %cst_14 = arith.constant dense<0.000000e+00> : vector<8x8xf32>
    %40 = tpu.matmul %35, %37, %cst_14 {dimension_numbers = #tpu.dot_dimension_numbers<[1], [1], [0], [0], [0, 0, 1, 0], [], []>} : vector<8x8xbf16>, vector<8x8xbf16>, vector<8x8xf32> -> vector<8x8xf32>
    %cst_15 = arith.constant 0.353553385 : f32
    %41 = vector.broadcast %cst_15 : f32 to vector<8x8xf32>
    %42 = arith.mulf %40, %41 : vector<8x8xf32>
    %cst_16 = arith.constant dense<0xFF800000> : vector<8xf32>
    %43 = vector.multi_reduction <maximumf>, %42, %cst_16 [1] : vector<8x8xf32> to vector<8xf32>
    %44 = vector.shape_cast %43 : vector<8xf32> to vector<8x1xf32>
    %45 = vector.broadcast %44 : vector<8x1xf32> to vector<8x8xf32>
    %46 = arith.subf %42, %45 : vector<8x8xf32>
    %47 = math.exp %46 : vector<8x8xf32>
    %cst_17 = arith.constant dense<0.000000e+00> : vector<8xf32>
    %48 = vector.multi_reduction <add>, %47, %cst_17 [1] : vector<8x8xf32> to vector<8xf32>
    %49 = vector.shape_cast %48 : vector<8xf32> to vector<8x1xf32>
    %50 = tpu.reciprocal %49 {approx = true} : vector<8x1xf32> -> vector<8x1xf32>
    %51 = vector.broadcast %50 : vector<8x1xf32> to vector<8x8xf32>
    %52 = arith.mulf %47, %51 : vector<8x8xf32>
    %53 = arith.truncf %52 : vector<8x8xf32> to vector<8x8xbf16>
    %cst_18 = arith.constant dense<0.000000e+00> : vector<8x8xf32>
    %54 = tpu.matmul %53, %39, %cst_18 {dimension_numbers = #tpu.dot_dimension_numbers<[1], [0], [0], [1], [0, 0, 1, 1], [], []>} : vector<8x8xbf16>, vector<8x8xbf16>, vector<8x8xf32> -> vector<8x8xf32>
    %55 = vector.extract_strided_slice %10 {offsets = [0, 16], sizes = [8, 8], strides = [1, 1]} : vector<8x32xf32> to vector<8x8xf32>
    %56 = arith.truncf %55 : vector<8x8xf32> to vector<8x8xbf16>
    %57 = vector.extract_strided_slice %11 {offsets = [0, 16], sizes = [8, 8], strides = [1, 1]} : vector<8x32xf32> to vector<8x8xf32>
    %58 = arith.truncf %57 : vector<8x8xf32> to vector<8x8xbf16>
    %59 = vector.extract_strided_slice %12 {offsets = [0, 16], sizes = [8, 8], strides = [1, 1]} : vector<8x32xf32> to vector<8x8xf32>
    %60 = arith.truncf %59 : vector<8x8xf32> to vector<8x8xbf16>
    %cst_19 = arith.constant dense<0.000000e+00> : vector<8x8xf32>
    %61 = tpu.matmul %56, %58, %cst_19 {dimension_numbers = #tpu.dot_dimension_numbers<[1], [1], [0], [0], [0, 0, 1, 0], [], []>} : vector<8x8xbf16>, vector<8x8xbf16>, vector<8x8xf32> -> vector<8x8xf32>
    %cst_20 = arith.constant 0.353553385 : f32
    %62 = vector.broadcast %cst_20 : f32 to vector<8x8xf32>
    %63 = arith.mulf %61, %62 : vector<8x8xf32>
    %cst_21 = arith.constant dense<0xFF800000> : vector<8xf32>
    %64 = vector.multi_reduction <maximumf>, %63, %cst_21 [1] : vector<8x8xf32> to vector<8xf32>
    %65 = vector.shape_cast %64 : vector<8xf32> to vector<8x1xf32>
    %66 = vector.broadcast %65 : vector<8x1xf32> to vector<8x8xf32>
    %67 = arith.subf %63, %66 : vector<8x8xf32>
    %68 = math.exp %67 : vector<8x8xf32>
    %cst_22 = arith.constant dense<0.000000e+00> : vector<8xf32>
    %69 = vector.multi_reduction <add>, %68, %cst_22 [1] : vector<8x8xf32> to vector<8xf32>
    %70 = vector.shape_cast %69 : vector<8xf32> to vector<8x1xf32>
    %71 = tpu.reciprocal %70 {approx = true} : vector<8x1xf32> -> vector<8x1xf32>
    %72 = vector.broadcast %71 : vector<8x1xf32> to vector<8x8xf32>
    %73 = arith.mulf %68, %72 : vector<8x8xf32>
    %74 = arith.truncf %73 : vector<8x8xf32> to vector<8x8xbf16>
    %cst_23 = arith.constant dense<0.000000e+00> : vector<8x8xf32>
    %75 = tpu.matmul %74, %60, %cst_23 {dimension_numbers = #tpu.dot_dimension_numbers<[1], [0], [0], [1], [0, 0, 1, 1], [], []>} : vector<8x8xbf16>, vector<8x8xbf16>, vector<8x8xf32> -> vector<8x8xf32>
    %76 = vector.extract_strided_slice %10 {offsets = [0, 24], sizes = [8, 8], strides = [1, 1]} : vector<8x32xf32> to vector<8x8xf32>
    %77 = arith.truncf %76 : vector<8x8xf32> to vector<8x8xbf16>
    %78 = vector.extract_strided_slice %11 {offsets = [0, 24], sizes = [8, 8], strides = [1, 1]} : vector<8x32xf32> to vector<8x8xf32>
    %79 = arith.truncf %78 : vector<8x8xf32> to vector<8x8xbf16>
    %80 = vector.extract_strided_slice %12 {offsets = [0, 24], sizes = [8, 8], strides = [1, 1]} : vector<8x32xf32> to vector<8x8xf32>
    %81 = arith.truncf %80 : vector<8x8xf32> to vector<8x8xbf16>
    %cst_24 = arith.constant dense<0.000000e+00> : vector<8x8xf32>
    %82 = tpu.matmul %77, %79, %cst_24 {dimension_numbers = #tpu.dot_dimension_numbers<[1], [1], [0], [0], [0, 0, 1, 0], [], []>} : vector<8x8xbf16>, vector<8x8xbf16>, vector<8x8xf32> -> vector<8x8xf32>
    %cst_25 = arith.constant 0.353553385 : f32
    %83 = vector.broadcast %cst_25 : f32 to vector<8x8xf32>
    %84 = arith.mulf %82, %83 : vector<8x8xf32>
    %cst_26 = arith.constant dense<0xFF800000> : vector<8xf32>
    %85 = vector.multi_reduction <maximumf>, %84, %cst_26 [1] : vector<8x8xf32> to vector<8xf32>
    %86 = vector.shape_cast %85 : vector<8xf32> to vector<8x1xf32>
    %87 = vector.broadcast %86 : vector<8x1xf32> to vector<8x8xf32>
    %88 = arith.subf %84, %87 : vector<8x8xf32>
    %89 = math.exp %88 : vector<8x8xf32>
    %cst_27 = arith.constant dense<0.000000e+00> : vector<8xf32>
    %90 = vector.multi_reduction <add>, %89, %cst_27 [1] : vector<8x8xf32> to vector<8xf32>
    %91 = vector.shape_cast %90 : vector<8xf32> to vector<8x1xf32>
    %92 = tpu.reciprocal %91 {approx = true} : vector<8x1xf32> -> vector<8x1xf32>
    %93 = vector.broadcast %92 : vector<8x1xf32> to vector<8x8xf32>
    %94 = arith.mulf %89, %93 : vector<8x8xf32>
    %95 = arith.truncf %94 : vector<8x8xf32> to vector<8x8xbf16>
    %cst_28 = arith.constant dense<0.000000e+00> : vector<8x8xf32>
    %96 = tpu.matmul %95, %81, %cst_28 {dimension_numbers = #tpu.dot_dimension_numbers<[1], [0], [0], [1], [0, 0, 1, 1], [], []>} : vector<8x8xbf16>, vector<8x8xbf16>, vector<8x8xf32> -> vector<8x8xf32>
    %97 = tpu.concatenate %33, %54, %75, %96 in 1 : vector<8x8xf32>, vector<8x8xf32>, vector<8x8xf32>, vector<8x8xf32> -> vector<8x32xf32>
    %98 = arith.truncf %97 : vector<8x32xf32> to vector<8x32xbf16>
    %c0_29 = arith.constant 0 : index
    %c0_30 = arith.constant 0 : index
    %99 = vector.load %arg5[%c0_29, %c0_30] : memref<32x32xbf16, #tpu.memory_space<vmem>>, vector<32x32xbf16>
    %cst_31 = arith.constant dense<0.000000e+00> : vector<8x32xf32>
    %100 = tpu.matmul %98, %99, %cst_31 {dimension_numbers = #tpu.dot_dimension_numbers<[1], [0], [0], [1], [0, 0, 1, 1], [], []>} : vector<8x32xbf16>, vector<32x32xbf16>, vector<8x32xf32> -> vector<8x32xf32>
    %c0_32 = arith.constant 0 : index
    %c0_33 = arith.constant 0 : index
    %101 = vector.load %arg6[%c0_32, %c0_33] : memref<1x32xf32, #tpu.memory_space<vmem>>, vector<1x32xf32>
    %102 = vector.broadcast %101 : vector<1x32xf32> to vector<8x32xf32>
    %103 = arith.addf %100, %102 : vector<8x32xf32>
    %104 = arith.addf %1, %103 : vector<8x32xf32>
    %c0_34 = arith.constant 0 : index
    %c0_35 = arith.constant 0 : index
    %105 = vector.load %arg7[%c0_34, %c0_35] : memref<1x32xf32, #tpu.memory_space<vmem>>, vector<1x32xf32>
    %c0_36 = arith.constant 0 : index
    %c0_37 = arith.constant 0 : index
    %106 = vector.load %arg8[%c0_36, %c0_37] : memref<1x32xf32, #tpu.memory_space<vmem>>, vector<1x32xf32>
    %cst_38 = arith.constant dense<0.000000e+00> : vector<8xf32>
    %107 = vector.multi_reduction <add>, %104, %cst_38 [1] : vector<8x32xf32> to vector<8xf32>
    %108 = vector.shape_cast %107 : vector<8xf32> to vector<8x1xf32>
    %cst_39 = arith.constant 3.200000e+01 : f32
    %109 = vector.broadcast %cst_39 : f32 to vector<8x1xf32>
    %110 = arith.divf %108, %109 : vector<8x1xf32>
    %111 = vector.broadcast %110 : vector<8x1xf32> to vector<8x32xf32>
    %112 = arith.subf %104, %111 : vector<8x32xf32>
    %113 = arith.mulf %112, %112 : vector<8x32xf32>
    %cst_40 = arith.constant dense<0.000000e+00> : vector<8xf32>
    %114 = vector.multi_reduction <add>, %113, %cst_40 [1] : vector<8x32xf32> to vector<8xf32>
    %115 = vector.shape_cast %114 : vector<8xf32> to vector<8x1xf32>
    %cst_41 = arith.constant 3.200000e+01 : f32
    %116 = vector.broadcast %cst_41 : f32 to vector<8x1xf32>
    %117 = arith.divf %115, %116 : vector<8x1xf32>
    %118 = vector.broadcast %110 : vector<8x1xf32> to vector<8x32xf32>
    %119 = arith.subf %104, %118 : vector<8x32xf32>
    %cst_42 = arith.constant 9.99999974E-6 : f32
    %120 = vector.broadcast %cst_42 : f32 to vector<8x1xf32>
    %121 = arith.addf %117, %120 : vector<8x1xf32>
    %122 = math.rsqrt %121 : vector<8x1xf32>
    %123 = vector.broadcast %122 : vector<8x1xf32> to vector<8x32xf32>
    %124 = arith.mulf %119, %123 : vector<8x32xf32>
    %125 = vector.broadcast %105 : vector<1x32xf32> to vector<8x32xf32>
    %126 = arith.mulf %124, %125 : vector<8x32xf32>
    %127 = vector.broadcast %106 : vector<1x32xf32> to vector<8x32xf32>
    %128 = arith.addf %126, %127 : vector<8x32xf32>
    %129 = arith.truncf %128 : vector<8x32xf32> to vector<8x32xbf16>
    %c0_43 = arith.constant 0 : index
    %c0_44 = arith.constant 0 : index
    %130 = vector.load %arg9[%c0_43, %c0_44] : memref<32x32xbf16, #tpu.memory_space<vmem>>, vector<32x32xbf16>
    %cst_45 = arith.constant dense<0.000000e+00> : vector<8x32xf32>
    %131 = tpu.matmul %129, %130, %cst_45 {dimension_numbers = #tpu.dot_dimension_numbers<[1], [0], [0], [1], [0, 0, 1, 1], [], []>} : vector<8x32xbf16>, vector<32x32xbf16>, vector<8x32xf32> -> vector<8x32xf32>
    %c0_46 = arith.constant 0 : index
    %c0_47 = arith.constant 0 : index
    %132 = vector.load %arg10[%c0_46, %c0_47] : memref<1x32xf32, #tpu.memory_space<vmem>>, vector<1x32xf32>
    %133 = vector.broadcast %132 : vector<1x32xf32> to vector<8x32xf32>
    %134 = arith.addf %131, %133 : vector<8x32xf32>
    %135 = arith.truncf %3 : vector<8x32xf32> to vector<8x32xbf16>
    %c0_48 = arith.constant 0 : index
    %c0_49 = arith.constant 0 : index
    %136 = vector.load %arg11[%c0_48, %c0_49] : memref<32x64xbf16, #tpu.memory_space<vmem>>, vector<32x64xbf16>
    %cst_50 = arith.constant dense<0.000000e+00> : vector<8x64xf32>
    %137 = tpu.matmul %135, %136, %cst_50 {dimension_numbers = #tpu.dot_dimension_numbers<[1], [0], [0], [1], [0, 0, 1, 1], [], []>} : vector<8x32xbf16>, vector<32x64xbf16>, vector<8x64xf32> -> vector<8x64xf32>
    %c0_51 = arith.constant 0 : index
    %c0_52 = arith.constant 0 : index
    %138 = vector.load %arg12[%c0_51, %c0_52] : memref<1x64xf32, #tpu.memory_space<vmem>>, vector<1x64xf32>
    %139 = vector.broadcast %138 : vector<1x64xf32> to vector<8x64xf32>
    %140 = arith.addf %137, %139 : vector<8x64xf32>
    %141 = vector.extract_strided_slice %140 {offsets = [0, 0], sizes = [8, 32], strides = [1, 1]} : vector<8x64xf32> to vector<8x32xf32>
    %142 = vector.extract_strided_slice %140 {offsets = [0, 32], sizes = [8, 32], strides = [1, 1]} : vector<8x64xf32> to vector<8x32xf32>
    %143 = vector.extract_strided_slice %134 {offsets = [0, 0], sizes = [8, 8], strides = [1, 1]} : vector<8x32xf32> to vector<8x8xf32>
    %144 = arith.truncf %143 : vector<8x8xf32> to vector<8x8xbf16>
    %145 = vector.extract_strided_slice %141 {offsets = [0, 0], sizes = [8, 8], strides = [1, 1]} : vector<8x32xf32> to vector<8x8xf32>
    %146 = arith.truncf %145 : vector<8x8xf32> to vector<8x8xbf16>
    %147 = vector.extract_strided_slice %142 {offsets = [0, 0], sizes = [8, 8], strides = [1, 1]} : vector<8x32xf32> to vector<8x8xf32>
    %148 = arith.truncf %147 : vector<8x8xf32> to vector<8x8xbf16>
    %cst_53 = arith.constant dense<0.000000e+00> : vector<8x8xf32>
    %149 = tpu.matmul %144, %146, %cst_53 {dimension_numbers = #tpu.dot_dimension_numbers<[1], [1], [0], [0], [0, 0, 1, 0], [], []>} : vector<8x8xbf16>, vector<8x8xbf16>, vector<8x8xf32> -> vector<8x8xf32>
    %cst_54 = arith.constant 0.353553385 : f32
    %150 = vector.broadcast %cst_54 : f32 to vector<8x8xf32>
    %151 = arith.mulf %149, %150 : vector<8x8xf32>
    %cst_55 = arith.constant dense<0xFF800000> : vector<8xf32>
    %152 = vector.multi_reduction <maximumf>, %151, %cst_55 [1] : vector<8x8xf32> to vector<8xf32>
    %153 = vector.shape_cast %152 : vector<8xf32> to vector<8x1xf32>
    %154 = vector.broadcast %153 : vector<8x1xf32> to vector<8x8xf32>
    %155 = arith.subf %151, %154 : vector<8x8xf32>
    %156 = math.exp %155 : vector<8x8xf32>
    %cst_56 = arith.constant dense<0.000000e+00> : vector<8xf32>
    %157 = vector.multi_reduction <add>, %156, %cst_56 [1] : vector<8x8xf32> to vector<8xf32>
    %158 = vector.shape_cast %157 : vector<8xf32> to vector<8x1xf32>
    %159 = tpu.reciprocal %158 {approx = true} : vector<8x1xf32> -> vector<8x1xf32>
    %160 = vector.broadcast %159 : vector<8x1xf32> to vector<8x8xf32>
    %161 = arith.mulf %156, %160 : vector<8x8xf32>
    %162 = arith.truncf %161 : vector<8x8xf32> to vector<8x8xbf16>
    %cst_57 = arith.constant dense<0.000000e+00> : vector<8x8xf32>
    %163 = tpu.matmul %162, %148, %cst_57 {dimension_numbers = #tpu.dot_dimension_numbers<[1], [0], [0], [1], [0, 0, 1, 1], [], []>} : vector<8x8xbf16>, vector<8x8xbf16>, vector<8x8xf32> -> vector<8x8xf32>
    %164 = vector.extract_strided_slice %134 {offsets = [0, 8], sizes = [8, 8], strides = [1, 1]} : vector<8x32xf32> to vector<8x8xf32>
    %165 = arith.truncf %164 : vector<8x8xf32> to vector<8x8xbf16>
    %166 = vector.extract_strided_slice %141 {offsets = [0, 8], sizes = [8, 8], strides = [1, 1]} : vector<8x32xf32> to vector<8x8xf32>
    %167 = arith.truncf %166 : vector<8x8xf32> to vector<8x8xbf16>
    %168 = vector.extract_strided_slice %142 {offsets = [0, 8], sizes = [8, 8], strides = [1, 1]} : vector<8x32xf32> to vector<8x8xf32>
    %169 = arith.truncf %168 : vector<8x8xf32> to vector<8x8xbf16>
    %cst_58 = arith.constant dense<0.000000e+00> : vector<8x8xf32>
    %170 = tpu.matmul %165, %167, %cst_58 {dimension_numbers = #tpu.dot_dimension_numbers<[1], [1], [0], [0], [0, 0, 1, 0], [], []>} : vector<8x8xbf16>, vector<8x8xbf16>, vector<8x8xf32> -> vector<8x8xf32>
    %cst_59 = arith.constant 0.353553385 : f32
    %171 = vector.broadcast %cst_59 : f32 to vector<8x8xf32>
    %172 = arith.mulf %170, %171 : vector<8x8xf32>
    %cst_60 = arith.constant dense<0xFF800000> : vector<8xf32>
    %173 = vector.multi_reduction <maximumf>, %172, %cst_60 [1] : vector<8x8xf32> to vector<8xf32>
    %174 = vector.shape_cast %173 : vector<8xf32> to vector<8x1xf32>
    %175 = vector.broadcast %174 : vector<8x1xf32> to vector<8x8xf32>
    %176 = arith.subf %172, %175 : vector<8x8xf32>
    %177 = math.exp %176 : vector<8x8xf32>
    %cst_61 = arith.constant dense<0.000000e+00> : vector<8xf32>
    %178 = vector.multi_reduction <add>, %177, %cst_61 [1] : vector<8x8xf32> to vector<8xf32>
    %179 = vector.shape_cast %178 : vector<8xf32> to vector<8x1xf32>
    %180 = tpu.reciprocal %179 {approx = true} : vector<8x1xf32> -> vector<8x1xf32>
    %181 = vector.broadcast %180 : vector<8x1xf32> to vector<8x8xf32>
    %182 = arith.mulf %177, %181 : vector<8x8xf32>
    %183 = arith.truncf %182 : vector<8x8xf32> to vector<8x8xbf16>
    %cst_62 = arith.constant dense<0.000000e+00> : vector<8x8xf32>
    %184 = tpu.matmul %183, %169, %cst_62 {dimension_numbers = #tpu.dot_dimension_numbers<[1], [0], [0], [1], [0, 0, 1, 1], [], []>} : vector<8x8xbf16>, vector<8x8xbf16>, vector<8x8xf32> -> vector<8x8xf32>
    %185 = vector.extract_strided_slice %134 {offsets = [0, 16], sizes = [8, 8], strides = [1, 1]} : vector<8x32xf32> to vector<8x8xf32>
    %186 = arith.truncf %185 : vector<8x8xf32> to vector<8x8xbf16>
    %187 = vector.extract_strided_slice %141 {offsets = [0, 16], sizes = [8, 8], strides = [1, 1]} : vector<8x32xf32> to vector<8x8xf32>
    %188 = arith.truncf %187 : vector<8x8xf32> to vector<8x8xbf16>
    %189 = vector.extract_strided_slice %142 {offsets = [0, 16], sizes = [8, 8], strides = [1, 1]} : vector<8x32xf32> to vector<8x8xf32>
    %190 = arith.truncf %189 : vector<8x8xf32> to vector<8x8xbf16>
    %cst_63 = arith.constant dense<0.000000e+00> : vector<8x8xf32>
    %191 = tpu.matmul %186, %188, %cst_63 {dimension_numbers = #tpu.dot_dimension_numbers<[1], [1], [0], [0], [0, 0, 1, 0], [], []>} : vector<8x8xbf16>, vector<8x8xbf16>, vector<8x8xf32> -> vector<8x8xf32>
    %cst_64 = arith.constant 0.353553385 : f32
    %192 = vector.broadcast %cst_64 : f32 to vector<8x8xf32>
    %193 = arith.mulf %191, %192 : vector<8x8xf32>
    %cst_65 = arith.constant dense<0xFF800000> : vector<8xf32>
    %194 = vector.multi_reduction <maximumf>, %193, %cst_65 [1] : vector<8x8xf32> to vector<8xf32>
    %195 = vector.shape_cast %194 : vector<8xf32> to vector<8x1xf32>
    %196 = vector.broadcast %195 : vector<8x1xf32> to vector<8x8xf32>
    %197 = arith.subf %193, %196 : vector<8x8xf32>
    %198 = math.exp %197 : vector<8x8xf32>
    %cst_66 = arith.constant dense<0.000000e+00> : vector<8xf32>
    %199 = vector.multi_reduction <add>, %198, %cst_66 [1] : vector<8x8xf32> to vector<8xf32>
    %200 = vector.shape_cast %199 : vector<8xf32> to vector<8x1xf32>
    %201 = tpu.reciprocal %200 {approx = true} : vector<8x1xf32> -> vector<8x1xf32>
    %202 = vector.broadcast %201 : vector<8x1xf32> to vector<8x8xf32>
    %203 = arith.mulf %198, %202 : vector<8x8xf32>
    %204 = arith.truncf %203 : vector<8x8xf32> to vector<8x8xbf16>
    %cst_67 = arith.constant dense<0.000000e+00> : vector<8x8xf32>
    %205 = tpu.matmul %204, %190, %cst_67 {dimension_numbers = #tpu.dot_dimension_numbers<[1], [0], [0], [1], [0, 0, 1, 1], [], []>} : vector<8x8xbf16>, vector<8x8xbf16>, vector<8x8xf32> -> vector<8x8xf32>
    %206 = vector.extract_strided_slice %134 {offsets = [0, 24], sizes = [8, 8], strides = [1, 1]} : vector<8x32xf32> to vector<8x8xf32>
    %207 = arith.truncf %206 : vector<8x8xf32> to vector<8x8xbf16>
    %208 = vector.extract_strided_slice %141 {offsets = [0, 24], sizes = [8, 8], strides = [1, 1]} : vector<8x32xf32> to vector<8x8xf32>
    %209 = arith.truncf %208 : vector<8x8xf32> to vector<8x8xbf16>
    %210 = vector.extract_strided_slice %142 {offsets = [0, 24], sizes = [8, 8], strides = [1, 1]} : vector<8x32xf32> to vector<8x8xf32>
    %211 = arith.truncf %210 : vector<8x8xf32> to vector<8x8xbf16>
    %cst_68 = arith.constant dense<0.000000e+00> : vector<8x8xf32>
    %212 = tpu.matmul %207, %209, %cst_68 {dimension_numbers = #tpu.dot_dimension_numbers<[1], [1], [0], [0], [0, 0, 1, 0], [], []>} : vector<8x8xbf16>, vector<8x8xbf16>, vector<8x8xf32> -> vector<8x8xf32>
    %cst_69 = arith.constant 0.353553385 : f32
    %213 = vector.broadcast %cst_69 : f32 to vector<8x8xf32>
    %214 = arith.mulf %212, %213 : vector<8x8xf32>
    %cst_70 = arith.constant dense<0xFF800000> : vector<8xf32>
    %215 = vector.multi_reduction <maximumf>, %214, %cst_70 [1] : vector<8x8xf32> to vector<8xf32>
    %216 = vector.shape_cast %215 : vector<8xf32> to vector<8x1xf32>
    %217 = vector.broadcast %216 : vector<8x1xf32> to vector<8x8xf32>
    %218 = arith.subf %214, %217 : vector<8x8xf32>
    %219 = math.exp %218 : vector<8x8xf32>
    %cst_71 = arith.constant dense<0.000000e+00> : vector<8xf32>
    %220 = vector.multi_reduction <add>, %219, %cst_71 [1] : vector<8x8xf32> to vector<8xf32>
    %221 = vector.shape_cast %220 : vector<8xf32> to vector<8x1xf32>
    %222 = tpu.reciprocal %221 {approx = true} : vector<8x1xf32> -> vector<8x1xf32>
    %223 = vector.broadcast %222 : vector<8x1xf32> to vector<8x8xf32>
    %224 = arith.mulf %219, %223 : vector<8x8xf32>
    %225 = arith.truncf %224 : vector<8x8xf32> to vector<8x8xbf16>
    %cst_72 = arith.constant dense<0.000000e+00> : vector<8x8xf32>
    %226 = tpu.matmul %225, %211, %cst_72 {dimension_numbers = #tpu.dot_dimension_numbers<[1], [0], [0], [1], [0, 0, 1, 1], [], []>} : vector<8x8xbf16>, vector<8x8xbf16>, vector<8x8xf32> -> vector<8x8xf32>
    %227 = tpu.concatenate %163, %184, %205, %226 in 1 : vector<8x8xf32>, vector<8x8xf32>, vector<8x8xf32>, vector<8x8xf32> -> vector<8x32xf32>
    %228 = arith.truncf %227 : vector<8x32xf32> to vector<8x32xbf16>
    %c0_73 = arith.constant 0 : index
    %c0_74 = arith.constant 0 : index
    %229 = vector.load %arg13[%c0_73, %c0_74] : memref<32x32xbf16, #tpu.memory_space<vmem>>, vector<32x32xbf16>
    %cst_75 = arith.constant dense<0.000000e+00> : vector<8x32xf32>
    %230 = tpu.matmul %228, %229, %cst_75 {dimension_numbers = #tpu.dot_dimension_numbers<[1], [0], [0], [1], [0, 0, 1, 1], [], []>} : vector<8x32xbf16>, vector<32x32xbf16>, vector<8x32xf32> -> vector<8x32xf32>
    %c0_76 = arith.constant 0 : index
    %c0_77 = arith.constant 0 : index
    %231 = vector.load %arg14[%c0_76, %c0_77] : memref<1x32xf32, #tpu.memory_space<vmem>>, vector<1x32xf32>
    %232 = vector.broadcast %231 : vector<1x32xf32> to vector<8x32xf32>
    %233 = arith.addf %230, %232 : vector<8x32xf32>
    %234 = arith.addf %128, %233 : vector<8x32xf32>
    %c0_78 = arith.constant 0 : index
    %c0_79 = arith.constant 0 : index
    %235 = vector.load %arg15[%c0_78, %c0_79] : memref<1x32xf32, #tpu.memory_space<vmem>>, vector<1x32xf32>
    %c0_80 = arith.constant 0 : index
    %c0_81 = arith.constant 0 : index
    %236 = vector.load %arg16[%c0_80, %c0_81] : memref<1x32xf32, #tpu.memory_space<vmem>>, vector<1x32xf32>
    %cst_82 = arith.constant dense<0.000000e+00> : vector<8xf32>
    %237 = vector.multi_reduction <add>, %234, %cst_82 [1] : vector<8x32xf32> to vector<8xf32>
    %238 = vector.shape_cast %237 : vector<8xf32> to vector<8x1xf32>
    %cst_83 = arith.constant 3.200000e+01 : f32
    %239 = vector.broadcast %cst_83 : f32 to vector<8x1xf32>
    %240 = arith.divf %238, %239 : vector<8x1xf32>
    %241 = vector.broadcast %240 : vector<8x1xf32> to vector<8x32xf32>
    %242 = arith.subf %234, %241 : vector<8x32xf32>
    %243 = arith.mulf %242, %242 : vector<8x32xf32>
    %cst_84 = arith.constant dense<0.000000e+00> : vector<8xf32>
    %244 = vector.multi_reduction <add>, %243, %cst_84 [1] : vector<8x32xf32> to vector<8xf32>
    %245 = vector.shape_cast %244 : vector<8xf32> to vector<8x1xf32>
    %cst_85 = arith.constant 3.200000e+01 : f32
    %246 = vector.broadcast %cst_85 : f32 to vector<8x1xf32>
    %247 = arith.divf %245, %246 : vector<8x1xf32>
    %248 = vector.broadcast %240 : vector<8x1xf32> to vector<8x32xf32>
    %249 = arith.subf %234, %248 : vector<8x32xf32>
    %cst_86 = arith.constant 9.99999974E-6 : f32
    %250 = vector.broadcast %cst_86 : f32 to vector<8x1xf32>
    %251 = arith.addf %247, %250 : vector<8x1xf32>
    %252 = math.rsqrt %251 : vector<8x1xf32>
    %253 = vector.broadcast %252 : vector<8x1xf32> to vector<8x32xf32>
    %254 = arith.mulf %249, %253 : vector<8x32xf32>
    %255 = vector.broadcast %235 : vector<1x32xf32> to vector<8x32xf32>
    %256 = arith.mulf %254, %255 : vector<8x32xf32>
    %257 = vector.broadcast %236 : vector<1x32xf32> to vector<8x32xf32>
    %258 = arith.addf %256, %257 : vector<8x32xf32>
    %259 = arith.truncf %258 : vector<8x32xf32> to vector<8x32xbf16>
    %c0_87 = arith.constant 0 : index
    %c0_88 = arith.constant 0 : index
    %260 = vector.load %arg17[%c0_87, %c0_88] : memref<32x64xbf16, #tpu.memory_space<vmem>>, vector<32x64xbf16>
    %cst_89 = arith.constant dense<0.000000e+00> : vector<8x64xf32>
    %261 = tpu.matmul %259, %260, %cst_89 {dimension_numbers = #tpu.dot_dimension_numbers<[1], [0], [0], [1], [0, 0, 1, 1], [], []>} : vector<8x32xbf16>, vector<32x64xbf16>, vector<8x64xf32> -> vector<8x64xf32>
    %c0_90 = arith.constant 0 : index
    %c0_91 = arith.constant 0 : index
    %262 = vector.load %arg18[%c0_90, %c0_91] : memref<1x64xf32, #tpu.memory_space<vmem>>, vector<1x64xf32>
    %263 = vector.broadcast %262 : vector<1x64xf32> to vector<8x64xf32>
    %264 = arith.addf %261, %263 : vector<8x64xf32>
    %cst_92 = arith.constant 0.000000e+00 : f32
    %265 = vector.broadcast %cst_92 : f32 to vector<8x64xf32>
    %266 = arith.maximumf %264, %265 : vector<8x64xf32>
    %267 = arith.truncf %266 : vector<8x64xf32> to vector<8x64xbf16>
    %c0_93 = arith.constant 0 : index
    %c0_94 = arith.constant 0 : index
    %268 = vector.load %arg19[%c0_93, %c0_94] : memref<64x32xbf16, #tpu.memory_space<vmem>>, vector<64x32xbf16>
    %cst_95 = arith.constant dense<0.000000e+00> : vector<8x32xf32>
    %269 = tpu.matmul %267, %268, %cst_95 {dimension_numbers = #tpu.dot_dimension_numbers<[1], [0], [0], [1], [0, 0, 1, 1], [], []>} : vector<8x64xbf16>, vector<64x32xbf16>, vector<8x32xf32> -> vector<8x32xf32>
    %c0_96 = arith.constant 0 : index
    %c0_97 = arith.constant 0 : index
    %270 = vector.load %arg20[%c0_96, %c0_97] : memref<1x32xf32, #tpu.memory_space<vmem>>, vector<1x32xf32>
    %271 = vector.broadcast %270 : vector<1x32xf32> to vector<8x32xf32>
    %272 = arith.addf %269, %271 : vector<8x32xf32>
    %273 = arith.addf %258, %272 : vector<8x32xf32>
    %c0_98 = arith.constant 0 : index
    %c0_99 = arith.constant 0 : index
    %274 = vector.load %arg21[%c0_98, %c0_99] : memref<1x32xf32, #tpu.memory_space<vmem>>, vector<1x32xf32>
    %c0_100 = arith.constant 0 : index
    %c0_101 = arith.constant 0 : index
    %275 = vector.load %arg22[%c0_100, %c0_101] : memref<1x32xf32, #tpu.memory_space<vmem>>, vector<1x32xf32>
    %cst_102 = arith.constant dense<0.000000e+00> : vector<8xf32>
    %276 = vector.multi_reduction <add>, %273, %cst_102 [1] : vector<8x32xf32> to vector<8xf32>
    %277 = vector.shape_cast %276 : vector<8xf32> to vector<8x1xf32>
    %cst_103 = arith.constant 3.200000e+01 : f32
    %278 = vector.broadcast %cst_103 : f32 to vector<8x1xf32>
    %279 = arith.divf %277, %278 : vector<8x1xf32>
    %280 = vector.broadcast %279 : vector<8x1xf32> to vector<8x32xf32>
    %281 = arith.subf %273, %280 : vector<8x32xf32>
    %282 = arith.mulf %281, %281 : vector<8x32xf32>
    %cst_104 = arith.constant dense<0.000000e+00> : vector<8xf32>
    %283 = vector.multi_reduction <add>, %282, %cst_104 [1] : vector<8x32xf32> to vector<8xf32>
    %284 = vector.shape_cast %283 : vector<8xf32> to vector<8x1xf32>
    %cst_105 = arith.constant 3.200000e+01 : f32
    %285 = vector.broadcast %cst_105 : f32 to vector<8x1xf32>
    %286 = arith.divf %284, %285 : vector<8x1xf32>
    %287 = vector.broadcast %279 : vector<8x1xf32> to vector<8x32xf32>
    %288 = arith.subf %273, %287 : vector<8x32xf32>
    %cst_106 = arith.constant 9.99999974E-6 : f32
    %289 = vector.broadcast %cst_106 : f32 to vector<8x1xf32>
    %290 = arith.addf %286, %289 : vector<8x1xf32>
    %291 = math.rsqrt %290 : vector<8x1xf32>
    %292 = vector.broadcast %291 : vector<8x1xf32> to vector<8x32xf32>
    %293 = arith.mulf %288, %292 : vector<8x32xf32>
    %294 = vector.broadcast %274 : vector<1x32xf32> to vector<8x32xf32>
    %295 = arith.mulf %293, %294 : vector<8x32xf32>
    %296 = vector.broadcast %275 : vector<1x32xf32> to vector<8x32xf32>
    %297 = arith.addf %295, %296 : vector<8x32xf32>
    %c0_107 = arith.constant 0 : index
    %c0_108 = arith.constant 0 : index
    %c0_109 = arith.constant 0 : index
    %298 = vector.load %arg23[%c0_107, %c0_108, %c0_109] : memref<1x8x32xf32, #tpu.memory_space<vmem>>, vector<1x8x32xf32>
    %299 = vector.shape_cast %298 : vector<1x8x32xf32> to vector<8x32xf32>
    %300 = vector.shape_cast %297 : vector<8x32xf32> to vector<1x8x32xf32>
    tpu.vector_store %arg23[%c0_107, %c0_108, %c0_109], %300 {strides = array<i32>} : memref<1x8x32xf32, #tpu.memory_space<vmem>>, vector<1x8x32xf32>,
    return
  }
  func.func @transform_0(%arg0: i32) -> (i32, i32, i32) {
    %c0_i32 = arith.constant 0 : i32
    %c0_i32_0 = arith.constant 0 : i32
    %c0_i32_1 = arith.constant 0 : i32
    return %arg0, %c0_i32, %c0_i32_0 : i32, i32, i32
  }
  func.func @transform_1(%arg0: i32) -> (i32, i32, i32) {
    %c0_i32 = arith.constant 0 : i32
    %c0_i32_0 = arith.constant 0 : i32
    %c0_i32_1 = arith.constant 0 : i32
    return %arg0, %c0_i32, %c0_i32_0 : i32, i32, i32
  }
  func.func @transform_2(%arg0: i32) -> (i32, i32) {
    %c0_i32 = arith.constant 0 : i32
    %c0_i32_0 = arith.constant 0 : i32
    %c0_i32_1 = arith.constant 0 : i32
    return %c0_i32, %c0_i32_0 : i32, i32
  }
  func.func @transform_3(%arg0: i32) -> (i32, i32) {
    %c0_i32 = arith.constant 0 : i32
    %c0_i32_0 = arith.constant 0 : i32
    %c0_i32_1 = arith.constant 0 : i32
    return %c0_i32, %c0_i32_0 : i32, i32
  }
  func.func @transform_4(%arg0: i32) -> (i32, i32) {
    %c0_i32 = arith.constant 0 : i32
    %c0_i32_0 = arith.constant 0 : i32
    %c0_i32_1 = arith.constant 0 : i32
    return %c0_i32, %c0_i32_0 : i32, i32
  }
  func.func @transform_5(%arg0: i32) -> (i32, i32) {
    %c0_i32 = arith.constant 0 : i32
    %c0_i32_0 = arith.constant 0 : i32
    %c0_i32_1 = arith.constant 0 : i32
    return %c0_i32, %c0_i32_0 : i32, i32
  }
  func.func @transform_6(%arg0: i32) -> (i32, i32) {
    %c0_i32 = arith.constant 0 : i32
    %c0_i32_0 = arith.constant 0 : i32
    %c0_i32_1 = arith.constant 0 : i32
    return %c0_i32, %c0_i32_0 : i32, i32
  }
  func.func @transform_7(%arg0: i32) -> (i32, i32) {
    %c0_i32 = arith.constant 0 : i32
    %c0_i32_0 = arith.constant 0 : i32
    %c0_i32_1 = arith.constant 0 : i32
    return %c0_i32, %c0_i32_0 : i32, i32
  }
  func.func @transform_8(%arg0: i32) -> (i32, i32) {
    %c0_i32 = arith.constant 0 : i32
    %c0_i32_0 = arith.constant 0 : i32
    %c0_i32_1 = arith.constant 0 : i32
    return %c0_i32, %c0_i32_0 : i32, i32
  }
  func.func @transform_9(%arg0: i32) -> (i32, i32) {
    %c0_i32 = arith.constant 0 : i32
    %c0_i32_0 = arith.constant 0 : i32
    %c0_i32_1 = arith.constant 0 : i32
    return %c0_i32, %c0_i32_0 : i32, i32
  }
  func.func @transform_10(%arg0: i32) -> (i32, i32) {
    %c0_i32 = arith.constant 0 : i32
    %c0_i32_0 = arith.constant 0 : i32
    %c0_i32_1 = arith.constant 0 : i32
    return %c0_i32, %c0_i32_0 : i32, i32
  }
  func.func @transform_11(%arg0: i32) -> (i32, i32) {
    %c0_i32 = arith.constant 0 : i32
    %c0_i32_0 = arith.constant 0 : i32
    %c0_i32_1 = arith.constant 0 : i32
    return %c0_i32, %c0_i32_0 : i32, i32
  }
  func.func @transform_12(%arg0: i32) -> (i32, i32) {
    %c0_i32 = arith.constant 0 : i32
    %c0_i32_0 = arith.constant 0 : i32
    %c0_i32_1 = arith.constant 0 : i32
    return %c0_i32, %c0_i32_0 : i32, i32
  }
  func.func @transform_13(%arg0: i32) -> (i32, i32) {
    %c0_i32 = arith.constant 0 : i32
    %c0_i32_0 = arith.constant 0 : i32
    %c0_i32_1 = arith.constant 0 : i32
    return %c0_i32, %c0_i32_0 : i32, i32
  }
  func.func @transform_14(%arg0: i32) -> (i32, i32) {
    %c0_i32 = arith.constant 0 : i32
    %c0_i32_0 = arith.constant 0 : i32
    %c0_i32_1 = arith.constant 0 : i32
    return %c0_i32, %c0_i32_0 : i32, i32
  }
  func.func @transform_15(%arg0: i32) -> (i32, i32) {
    %c0_i32 = arith.constant 0 : i32
    %c0_i32_0 = arith.constant 0 : i32
    %c0_i32_1 = arith.constant 0 : i32
    return %c0_i32, %c0_i32_0 : i32, i32
  }
  func.func @transform_16(%arg0: i32) -> (i32, i32) {
    %c0_i32 = arith.constant 0 : i32
    %c0_i32_0 = arith.constant 0 : i32
    %c0_i32_1 = arith.constant 0 : i32
    return %c0_i32, %c0_i32_0 : i32, i32
  }
  func.func @transform_17(%arg0: i32) -> (i32, i32) {
    %c0_i32 = arith.constant 0 : i32
    %c0_i32_0 = arith.constant 0 : i32
    %c0_i32_1 = arith.constant 0 : i32
    return %c0_i32, %c0_i32_0 : i32, i32
  }
  func.func @transform_18(%arg0: i32) -> (i32, i32) {
    %c0_i32 = arith.constant 0 : i32
    %c0_i32_0 = arith.constant 0 : i32
    %c0_i32_1 = arith.constant 0 : i32
    return %c0_i32, %c0_i32_0 : i32, i32
  }
  func.func @transform_19(%arg0: i32) -> (i32, i32) {
    %c0_i32 = arith.constant 0 : i32
    %c0_i32_0 = arith.constant 0 : i32
    %c0_i32_1 = arith.constant 0 : i32
    return %c0_i32, %c0_i32_0 : i32, i32
  }
  func.func @transform_20(%arg0: i32) -> (i32, i32) {
    %c0_i32 = arith.constant 0 : i32
    %c0_i32_0 = arith.constant 0 : i32
    %c0_i32_1 = arith.constant 0 : i32
    return %c0_i32, %c0_i32_0 : i32, i32
  }
  func.func @transform_21(%arg0: i32) -> (i32, i32) {
    %c0_i32 = arith.constant 0 : i32
    %c0_i32_0 = arith.constant 0 : i32
    %c0_i32_1 = arith.constant 0 : i32
    return %c0_i32, %c0_i32_0 : i32, i32
  }
  func.func @transform_22(%arg0: i32) -> (i32, i32, i32) {
    %c0_i32 = arith.constant 0 : i32
    %c0_i32_0 = arith.constant 0 : i32
    %c0_i32_1 = arith.constant 0 : i32
    return %arg0, %c0_i32, %c0_i32_0 : i32, i32, i32
  }
}

module attributes {stable_mosaic.version = 11 : i64} {
  func.func @_encoder_layer_kernel(%arg0: i32, %arg1: memref<1x8x32xf32, #tpu.memory_space<vmem>>, %arg2: memref<32x96xbf16, #tpu.memory_space<vmem>>, %arg3: memref<1x96xf32, #tpu.memory_space<vmem>>, %arg4: memref<32x32xbf16, #tpu.memory_space<vmem>>, %arg5: memref<1x32xf32, #tpu.memory_space<vmem>>, %arg6: memref<1x32xf32, #tpu.memory_space<vmem>>, %arg7: memref<1x32xf32, #tpu.memory_space<vmem>>, %arg8: memref<32x64xbf16, #tpu.memory_space<vmem>>, %arg9: memref<1x64xf32, #tpu.memory_space<vmem>>, %arg10: memref<64x32xbf16, #tpu.memory_space<vmem>>, %arg11: memref<1x32xf32, #tpu.memory_space<vmem>>, %arg12: memref<1x32xf32, #tpu.memory_space<vmem>>, %arg13: memref<1x32xf32, #tpu.memory_space<vmem>>, %arg14: memref<1x8x32xf32, #tpu.memory_space<vmem>>) attributes {dimension_semantics = [#tpu.dimension_semantics<parallel>], iteration_bounds = array<i64: 2>, scalar_prefetch = 0 : i64, scratch_operands = 0 : i64, tpu.core_type = #tpu.core_type<tc>, window_params = [{transform_indices = @transform_0, window_bounds = array<i64: 1, 8, 32>}, {pipeline_mode = #tpu.pipeline_mode<synchronous>, transform_indices = @transform_1, window_bounds = array<i64: 32, 96>}, {pipeline_mode = #tpu.pipeline_mode<synchronous>, transform_indices = @transform_2, window_bounds = array<i64: 1, 96>}, {pipeline_mode = #tpu.pipeline_mode<synchronous>, transform_indices = @transform_3, window_bounds = array<i64: 32, 32>}, {pipeline_mode = #tpu.pipeline_mode<synchronous>, transform_indices = @transform_4, window_bounds = array<i64: 1, 32>}, {pipeline_mode = #tpu.pipeline_mode<synchronous>, transform_indices = @transform_5, window_bounds = array<i64: 1, 32>}, {pipeline_mode = #tpu.pipeline_mode<synchronous>, transform_indices = @transform_6, window_bounds = array<i64: 1, 32>}, {pipeline_mode = #tpu.pipeline_mode<synchronous>, transform_indices = @transform_7, window_bounds = array<i64: 32, 64>}, {pipeline_mode = #tpu.pipeline_mode<synchronous>, transform_indices = @transform_8, window_bounds = array<i64: 1, 64>}, {pipeline_mode = #tpu.pipeline_mode<synchronous>, transform_indices = @transform_9, window_bounds = array<i64: 64, 32>}, {pipeline_mode = #tpu.pipeline_mode<synchronous>, transform_indices = @transform_10, window_bounds = array<i64: 1, 32>}, {pipeline_mode = #tpu.pipeline_mode<synchronous>, transform_indices = @transform_11, window_bounds = array<i64: 1, 32>}, {pipeline_mode = #tpu.pipeline_mode<synchronous>, transform_indices = @transform_12, window_bounds = array<i64: 1, 32>}, {transform_indices = @transform_13, window_bounds = array<i64: 1, 8, 32>}]} {
    %c0 = arith.constant 0 : index
    %c0_0 = arith.constant 0 : index
    %c0_1 = arith.constant 0 : index
    %0 = vector.load %arg1[%c0, %c0_0, %c0_1] : memref<1x8x32xf32, #tpu.memory_space<vmem>>, vector<1x8x32xf32>
    %1 = vector.shape_cast %0 : vector<1x8x32xf32> to vector<8x32xf32>
    %2 = arith.truncf %1 : vector<8x32xf32> to vector<8x32xbf16>
    %c0_2 = arith.constant 0 : index
    %c0_3 = arith.constant 0 : index
    %3 = vector.load %arg2[%c0_2, %c0_3] : memref<32x96xbf16, #tpu.memory_space<vmem>>, vector<32x96xbf16>
    %cst = arith.constant dense<0.000000e+00> : vector<8x96xf32>
    %4 = tpu.matmul %2, %3, %cst {dimension_numbers = #tpu.dot_dimension_numbers<[1], [0], [0], [1], [0, 0, 1, 1], [], []>} : vector<8x32xbf16>, vector<32x96xbf16>, vector<8x96xf32> -> vector<8x96xf32>
    %c0_4 = arith.constant 0 : index
    %c0_5 = arith.constant 0 : index
    %5 = vector.load %arg3[%c0_4, %c0_5] : memref<1x96xf32, #tpu.memory_space<vmem>>, vector<1x96xf32>
    %6 = vector.broadcast %5 : vector<1x96xf32> to vector<8x96xf32>
    %7 = arith.addf %4, %6 : vector<8x96xf32>
    %8 = vector.extract_strided_slice %7 {offsets = [0, 0], sizes = [8, 32], strides = [1, 1]} : vector<8x96xf32> to vector<8x32xf32>
    %9 = vector.extract_strided_slice %7 {offsets = [0, 32], sizes = [8, 32], strides = [1, 1]} : vector<8x96xf32> to vector<8x32xf32>
    %10 = vector.extract_strided_slice %7 {offsets = [0, 64], sizes = [8, 32], strides = [1, 1]} : vector<8x96xf32> to vector<8x32xf32>
    %11 = vector.extract_strided_slice %8 {offsets = [0, 0], sizes = [8, 8], strides = [1, 1]} : vector<8x32xf32> to vector<8x8xf32>
    %12 = arith.truncf %11 : vector<8x8xf32> to vector<8x8xbf16>
    %13 = vector.extract_strided_slice %9 {offsets = [0, 0], sizes = [8, 8], strides = [1, 1]} : vector<8x32xf32> to vector<8x8xf32>
    %14 = arith.truncf %13 : vector<8x8xf32> to vector<8x8xbf16>
    %15 = vector.extract_strided_slice %10 {offsets = [0, 0], sizes = [8, 8], strides = [1, 1]} : vector<8x32xf32> to vector<8x8xf32>
    %16 = arith.truncf %15 : vector<8x8xf32> to vector<8x8xbf16>
    %cst_6 = arith.constant dense<0.000000e+00> : vector<8x8xf32>
    %17 = tpu.matmul %12, %14, %cst_6 {dimension_numbers = #tpu.dot_dimension_numbers<[1], [1], [0], [0], [0, 0, 1, 0], [], []>} : vector<8x8xbf16>, vector<8x8xbf16>, vector<8x8xf32> -> vector<8x8xf32>
    %cst_7 = arith.constant 0.353553385 : f32
    %18 = vector.broadcast %cst_7 : f32 to vector<8x8xf32>
    %19 = arith.mulf %17, %18 : vector<8x8xf32>
    %cst_8 = arith.constant dense<0xFF800000> : vector<8xf32>
    %20 = vector.multi_reduction <maximumf>, %19, %cst_8 [1] : vector<8x8xf32> to vector<8xf32>
    %21 = vector.shape_cast %20 : vector<8xf32> to vector<8x1xf32>
    %22 = vector.broadcast %21 : vector<8x1xf32> to vector<8x8xf32>
    %23 = arith.subf %19, %22 : vector<8x8xf32>
    %24 = math.exp %23 : vector<8x8xf32>
    %cst_9 = arith.constant dense<0.000000e+00> : vector<8xf32>
    %25 = vector.multi_reduction <add>, %24, %cst_9 [1] : vector<8x8xf32> to vector<8xf32>
    %26 = vector.shape_cast %25 : vector<8xf32> to vector<8x1xf32>
    %27 = tpu.reciprocal %26 {approx = true} : vector<8x1xf32> -> vector<8x1xf32>
    %28 = vector.broadcast %27 : vector<8x1xf32> to vector<8x8xf32>
    %29 = arith.mulf %24, %28 : vector<8x8xf32>
    %30 = arith.truncf %29 : vector<8x8xf32> to vector<8x8xbf16>
    %cst_10 = arith.constant dense<0.000000e+00> : vector<8x8xf32>
    %31 = tpu.matmul %30, %16, %cst_10 {dimension_numbers = #tpu.dot_dimension_numbers<[1], [0], [0], [1], [0, 0, 1, 1], [], []>} : vector<8x8xbf16>, vector<8x8xbf16>, vector<8x8xf32> -> vector<8x8xf32>
    %32 = vector.extract_strided_slice %8 {offsets = [0, 8], sizes = [8, 8], strides = [1, 1]} : vector<8x32xf32> to vector<8x8xf32>
    %33 = arith.truncf %32 : vector<8x8xf32> to vector<8x8xbf16>
    %34 = vector.extract_strided_slice %9 {offsets = [0, 8], sizes = [8, 8], strides = [1, 1]} : vector<8x32xf32> to vector<8x8xf32>
    %35 = arith.truncf %34 : vector<8x8xf32> to vector<8x8xbf16>
    %36 = vector.extract_strided_slice %10 {offsets = [0, 8], sizes = [8, 8], strides = [1, 1]} : vector<8x32xf32> to vector<8x8xf32>
    %37 = arith.truncf %36 : vector<8x8xf32> to vector<8x8xbf16>
    %cst_11 = arith.constant dense<0.000000e+00> : vector<8x8xf32>
    %38 = tpu.matmul %33, %35, %cst_11 {dimension_numbers = #tpu.dot_dimension_numbers<[1], [1], [0], [0], [0, 0, 1, 0], [], []>} : vector<8x8xbf16>, vector<8x8xbf16>, vector<8x8xf32> -> vector<8x8xf32>
    %cst_12 = arith.constant 0.353553385 : f32
    %39 = vector.broadcast %cst_12 : f32 to vector<8x8xf32>
    %40 = arith.mulf %38, %39 : vector<8x8xf32>
    %cst_13 = arith.constant dense<0xFF800000> : vector<8xf32>
    %41 = vector.multi_reduction <maximumf>, %40, %cst_13 [1] : vector<8x8xf32> to vector<8xf32>
    %42 = vector.shape_cast %41 : vector<8xf32> to vector<8x1xf32>
    %43 = vector.broadcast %42 : vector<8x1xf32> to vector<8x8xf32>
    %44 = arith.subf %40, %43 : vector<8x8xf32>
    %45 = math.exp %44 : vector<8x8xf32>
    %cst_14 = arith.constant dense<0.000000e+00> : vector<8xf32>
    %46 = vector.multi_reduction <add>, %45, %cst_14 [1] : vector<8x8xf32> to vector<8xf32>
    %47 = vector.shape_cast %46 : vector<8xf32> to vector<8x1xf32>
    %48 = tpu.reciprocal %47 {approx = true} : vector<8x1xf32> -> vector<8x1xf32>
    %49 = vector.broadcast %48 : vector<8x1xf32> to vector<8x8xf32>
    %50 = arith.mulf %45, %49 : vector<8x8xf32>
    %51 = arith.truncf %50 : vector<8x8xf32> to vector<8x8xbf16>
    %cst_15 = arith.constant dense<0.000000e+00> : vector<8x8xf32>
    %52 = tpu.matmul %51, %37, %cst_15 {dimension_numbers = #tpu.dot_dimension_numbers<[1], [0], [0], [1], [0, 0, 1, 1], [], []>} : vector<8x8xbf16>, vector<8x8xbf16>, vector<8x8xf32> -> vector<8x8xf32>
    %53 = vector.extract_strided_slice %8 {offsets = [0, 16], sizes = [8, 8], strides = [1, 1]} : vector<8x32xf32> to vector<8x8xf32>
    %54 = arith.truncf %53 : vector<8x8xf32> to vector<8x8xbf16>
    %55 = vector.extract_strided_slice %9 {offsets = [0, 16], sizes = [8, 8], strides = [1, 1]} : vector<8x32xf32> to vector<8x8xf32>
    %56 = arith.truncf %55 : vector<8x8xf32> to vector<8x8xbf16>
    %57 = vector.extract_strided_slice %10 {offsets = [0, 16], sizes = [8, 8], strides = [1, 1]} : vector<8x32xf32> to vector<8x8xf32>
    %58 = arith.truncf %57 : vector<8x8xf32> to vector<8x8xbf16>
    %cst_16 = arith.constant dense<0.000000e+00> : vector<8x8xf32>
    %59 = tpu.matmul %54, %56, %cst_16 {dimension_numbers = #tpu.dot_dimension_numbers<[1], [1], [0], [0], [0, 0, 1, 0], [], []>} : vector<8x8xbf16>, vector<8x8xbf16>, vector<8x8xf32> -> vector<8x8xf32>
    %cst_17 = arith.constant 0.353553385 : f32
    %60 = vector.broadcast %cst_17 : f32 to vector<8x8xf32>
    %61 = arith.mulf %59, %60 : vector<8x8xf32>
    %cst_18 = arith.constant dense<0xFF800000> : vector<8xf32>
    %62 = vector.multi_reduction <maximumf>, %61, %cst_18 [1] : vector<8x8xf32> to vector<8xf32>
    %63 = vector.shape_cast %62 : vector<8xf32> to vector<8x1xf32>
    %64 = vector.broadcast %63 : vector<8x1xf32> to vector<8x8xf32>
    %65 = arith.subf %61, %64 : vector<8x8xf32>
    %66 = math.exp %65 : vector<8x8xf32>
    %cst_19 = arith.constant dense<0.000000e+00> : vector<8xf32>
    %67 = vector.multi_reduction <add>, %66, %cst_19 [1] : vector<8x8xf32> to vector<8xf32>
    %68 = vector.shape_cast %67 : vector<8xf32> to vector<8x1xf32>
    %69 = tpu.reciprocal %68 {approx = true} : vector<8x1xf32> -> vector<8x1xf32>
    %70 = vector.broadcast %69 : vector<8x1xf32> to vector<8x8xf32>
    %71 = arith.mulf %66, %70 : vector<8x8xf32>
    %72 = arith.truncf %71 : vector<8x8xf32> to vector<8x8xbf16>
    %cst_20 = arith.constant dense<0.000000e+00> : vector<8x8xf32>
    %73 = tpu.matmul %72, %58, %cst_20 {dimension_numbers = #tpu.dot_dimension_numbers<[1], [0], [0], [1], [0, 0, 1, 1], [], []>} : vector<8x8xbf16>, vector<8x8xbf16>, vector<8x8xf32> -> vector<8x8xf32>
    %74 = vector.extract_strided_slice %8 {offsets = [0, 24], sizes = [8, 8], strides = [1, 1]} : vector<8x32xf32> to vector<8x8xf32>
    %75 = arith.truncf %74 : vector<8x8xf32> to vector<8x8xbf16>
    %76 = vector.extract_strided_slice %9 {offsets = [0, 24], sizes = [8, 8], strides = [1, 1]} : vector<8x32xf32> to vector<8x8xf32>
    %77 = arith.truncf %76 : vector<8x8xf32> to vector<8x8xbf16>
    %78 = vector.extract_strided_slice %10 {offsets = [0, 24], sizes = [8, 8], strides = [1, 1]} : vector<8x32xf32> to vector<8x8xf32>
    %79 = arith.truncf %78 : vector<8x8xf32> to vector<8x8xbf16>
    %cst_21 = arith.constant dense<0.000000e+00> : vector<8x8xf32>
    %80 = tpu.matmul %75, %77, %cst_21 {dimension_numbers = #tpu.dot_dimension_numbers<[1], [1], [0], [0], [0, 0, 1, 0], [], []>} : vector<8x8xbf16>, vector<8x8xbf16>, vector<8x8xf32> -> vector<8x8xf32>
    %cst_22 = arith.constant 0.353553385 : f32
    %81 = vector.broadcast %cst_22 : f32 to vector<8x8xf32>
    %82 = arith.mulf %80, %81 : vector<8x8xf32>
    %cst_23 = arith.constant dense<0xFF800000> : vector<8xf32>
    %83 = vector.multi_reduction <maximumf>, %82, %cst_23 [1] : vector<8x8xf32> to vector<8xf32>
    %84 = vector.shape_cast %83 : vector<8xf32> to vector<8x1xf32>
    %85 = vector.broadcast %84 : vector<8x1xf32> to vector<8x8xf32>
    %86 = arith.subf %82, %85 : vector<8x8xf32>
    %87 = math.exp %86 : vector<8x8xf32>
    %cst_24 = arith.constant dense<0.000000e+00> : vector<8xf32>
    %88 = vector.multi_reduction <add>, %87, %cst_24 [1] : vector<8x8xf32> to vector<8xf32>
    %89 = vector.shape_cast %88 : vector<8xf32> to vector<8x1xf32>
    %90 = tpu.reciprocal %89 {approx = true} : vector<8x1xf32> -> vector<8x1xf32>
    %91 = vector.broadcast %90 : vector<8x1xf32> to vector<8x8xf32>
    %92 = arith.mulf %87, %91 : vector<8x8xf32>
    %93 = arith.truncf %92 : vector<8x8xf32> to vector<8x8xbf16>
    %cst_25 = arith.constant dense<0.000000e+00> : vector<8x8xf32>
    %94 = tpu.matmul %93, %79, %cst_25 {dimension_numbers = #tpu.dot_dimension_numbers<[1], [0], [0], [1], [0, 0, 1, 1], [], []>} : vector<8x8xbf16>, vector<8x8xbf16>, vector<8x8xf32> -> vector<8x8xf32>
    %95 = tpu.concatenate %31, %52, %73, %94 in 1 : vector<8x8xf32>, vector<8x8xf32>, vector<8x8xf32>, vector<8x8xf32> -> vector<8x32xf32>
    %96 = arith.truncf %95 : vector<8x32xf32> to vector<8x32xbf16>
    %c0_26 = arith.constant 0 : index
    %c0_27 = arith.constant 0 : index
    %97 = vector.load %arg4[%c0_26, %c0_27] : memref<32x32xbf16, #tpu.memory_space<vmem>>, vector<32x32xbf16>
    %cst_28 = arith.constant dense<0.000000e+00> : vector<8x32xf32>
    %98 = tpu.matmul %96, %97, %cst_28 {dimension_numbers = #tpu.dot_dimension_numbers<[1], [0], [0], [1], [0, 0, 1, 1], [], []>} : vector<8x32xbf16>, vector<32x32xbf16>, vector<8x32xf32> -> vector<8x32xf32>
    %c0_29 = arith.constant 0 : index
    %c0_30 = arith.constant 0 : index
    %99 = vector.load %arg5[%c0_29, %c0_30] : memref<1x32xf32, #tpu.memory_space<vmem>>, vector<1x32xf32>
    %100 = vector.broadcast %99 : vector<1x32xf32> to vector<8x32xf32>
    %101 = arith.addf %98, %100 : vector<8x32xf32>
    %102 = arith.addf %1, %101 : vector<8x32xf32>
    %c0_31 = arith.constant 0 : index
    %c0_32 = arith.constant 0 : index
    %103 = vector.load %arg6[%c0_31, %c0_32] : memref<1x32xf32, #tpu.memory_space<vmem>>, vector<1x32xf32>
    %c0_33 = arith.constant 0 : index
    %c0_34 = arith.constant 0 : index
    %104 = vector.load %arg7[%c0_33, %c0_34] : memref<1x32xf32, #tpu.memory_space<vmem>>, vector<1x32xf32>
    %cst_35 = arith.constant dense<0.000000e+00> : vector<8xf32>
    %105 = vector.multi_reduction <add>, %102, %cst_35 [1] : vector<8x32xf32> to vector<8xf32>
    %106 = vector.shape_cast %105 : vector<8xf32> to vector<8x1xf32>
    %cst_36 = arith.constant 3.200000e+01 : f32
    %107 = vector.broadcast %cst_36 : f32 to vector<8x1xf32>
    %108 = arith.divf %106, %107 : vector<8x1xf32>
    %109 = vector.broadcast %108 : vector<8x1xf32> to vector<8x32xf32>
    %110 = arith.subf %102, %109 : vector<8x32xf32>
    %111 = arith.mulf %110, %110 : vector<8x32xf32>
    %cst_37 = arith.constant dense<0.000000e+00> : vector<8xf32>
    %112 = vector.multi_reduction <add>, %111, %cst_37 [1] : vector<8x32xf32> to vector<8xf32>
    %113 = vector.shape_cast %112 : vector<8xf32> to vector<8x1xf32>
    %cst_38 = arith.constant 3.200000e+01 : f32
    %114 = vector.broadcast %cst_38 : f32 to vector<8x1xf32>
    %115 = arith.divf %113, %114 : vector<8x1xf32>
    %116 = vector.broadcast %108 : vector<8x1xf32> to vector<8x32xf32>
    %117 = arith.subf %102, %116 : vector<8x32xf32>
    %cst_39 = arith.constant 9.99999974E-6 : f32
    %118 = vector.broadcast %cst_39 : f32 to vector<8x1xf32>
    %119 = arith.addf %115, %118 : vector<8x1xf32>
    %120 = math.rsqrt %119 : vector<8x1xf32>
    %121 = vector.broadcast %120 : vector<8x1xf32> to vector<8x32xf32>
    %122 = arith.mulf %117, %121 : vector<8x32xf32>
    %123 = vector.broadcast %103 : vector<1x32xf32> to vector<8x32xf32>
    %124 = arith.mulf %122, %123 : vector<8x32xf32>
    %125 = vector.broadcast %104 : vector<1x32xf32> to vector<8x32xf32>
    %126 = arith.addf %124, %125 : vector<8x32xf32>
    %127 = arith.truncf %126 : vector<8x32xf32> to vector<8x32xbf16>
    %c0_40 = arith.constant 0 : index
    %c0_41 = arith.constant 0 : index
    %128 = vector.load %arg8[%c0_40, %c0_41] : memref<32x64xbf16, #tpu.memory_space<vmem>>, vector<32x64xbf16>
    %cst_42 = arith.constant dense<0.000000e+00> : vector<8x64xf32>
    %129 = tpu.matmul %127, %128, %cst_42 {dimension_numbers = #tpu.dot_dimension_numbers<[1], [0], [0], [1], [0, 0, 1, 1], [], []>} : vector<8x32xbf16>, vector<32x64xbf16>, vector<8x64xf32> -> vector<8x64xf32>
    %c0_43 = arith.constant 0 : index
    %c0_44 = arith.constant 0 : index
    %130 = vector.load %arg9[%c0_43, %c0_44] : memref<1x64xf32, #tpu.memory_space<vmem>>, vector<1x64xf32>
    %131 = vector.broadcast %130 : vector<1x64xf32> to vector<8x64xf32>
    %132 = arith.addf %129, %131 : vector<8x64xf32>
    %cst_45 = arith.constant 0.000000e+00 : f32
    %133 = vector.broadcast %cst_45 : f32 to vector<8x64xf32>
    %134 = arith.maximumf %132, %133 : vector<8x64xf32>
    %135 = arith.truncf %134 : vector<8x64xf32> to vector<8x64xbf16>
    %c0_46 = arith.constant 0 : index
    %c0_47 = arith.constant 0 : index
    %136 = vector.load %arg10[%c0_46, %c0_47] : memref<64x32xbf16, #tpu.memory_space<vmem>>, vector<64x32xbf16>
    %cst_48 = arith.constant dense<0.000000e+00> : vector<8x32xf32>
    %137 = tpu.matmul %135, %136, %cst_48 {dimension_numbers = #tpu.dot_dimension_numbers<[1], [0], [0], [1], [0, 0, 1, 1], [], []>} : vector<8x64xbf16>, vector<64x32xbf16>, vector<8x32xf32> -> vector<8x32xf32>
    %c0_49 = arith.constant 0 : index
    %c0_50 = arith.constant 0 : index
    %138 = vector.load %arg11[%c0_49, %c0_50] : memref<1x32xf32, #tpu.memory_space<vmem>>, vector<1x32xf32>
    %139 = vector.broadcast %138 : vector<1x32xf32> to vector<8x32xf32>
    %140 = arith.addf %137, %139 : vector<8x32xf32>
    %141 = arith.addf %126, %140 : vector<8x32xf32>
    %c0_51 = arith.constant 0 : index
    %c0_52 = arith.constant 0 : index
    %142 = vector.load %arg12[%c0_51, %c0_52] : memref<1x32xf32, #tpu.memory_space<vmem>>, vector<1x32xf32>
    %c0_53 = arith.constant 0 : index
    %c0_54 = arith.constant 0 : index
    %143 = vector.load %arg13[%c0_53, %c0_54] : memref<1x32xf32, #tpu.memory_space<vmem>>, vector<1x32xf32>
    %cst_55 = arith.constant dense<0.000000e+00> : vector<8xf32>
    %144 = vector.multi_reduction <add>, %141, %cst_55 [1] : vector<8x32xf32> to vector<8xf32>
    %145 = vector.shape_cast %144 : vector<8xf32> to vector<8x1xf32>
    %cst_56 = arith.constant 3.200000e+01 : f32
    %146 = vector.broadcast %cst_56 : f32 to vector<8x1xf32>
    %147 = arith.divf %145, %146 : vector<8x1xf32>
    %148 = vector.broadcast %147 : vector<8x1xf32> to vector<8x32xf32>
    %149 = arith.subf %141, %148 : vector<8x32xf32>
    %150 = arith.mulf %149, %149 : vector<8x32xf32>
    %cst_57 = arith.constant dense<0.000000e+00> : vector<8xf32>
    %151 = vector.multi_reduction <add>, %150, %cst_57 [1] : vector<8x32xf32> to vector<8xf32>
    %152 = vector.shape_cast %151 : vector<8xf32> to vector<8x1xf32>
    %cst_58 = arith.constant 3.200000e+01 : f32
    %153 = vector.broadcast %cst_58 : f32 to vector<8x1xf32>
    %154 = arith.divf %152, %153 : vector<8x1xf32>
    %155 = vector.broadcast %147 : vector<8x1xf32> to vector<8x32xf32>
    %156 = arith.subf %141, %155 : vector<8x32xf32>
    %cst_59 = arith.constant 9.99999974E-6 : f32
    %157 = vector.broadcast %cst_59 : f32 to vector<8x1xf32>
    %158 = arith.addf %154, %157 : vector<8x1xf32>
    %159 = math.rsqrt %158 : vector<8x1xf32>
    %160 = vector.broadcast %159 : vector<8x1xf32> to vector<8x32xf32>
    %161 = arith.mulf %156, %160 : vector<8x32xf32>
    %162 = vector.broadcast %142 : vector<1x32xf32> to vector<8x32xf32>
    %163 = arith.mulf %161, %162 : vector<8x32xf32>
    %164 = vector.broadcast %143 : vector<1x32xf32> to vector<8x32xf32>
    %165 = arith.addf %163, %164 : vector<8x32xf32>
    %c0_60 = arith.constant 0 : index
    %c0_61 = arith.constant 0 : index
    %c0_62 = arith.constant 0 : index
    %166 = vector.load %arg14[%c0_60, %c0_61, %c0_62] : memref<1x8x32xf32, #tpu.memory_space<vmem>>, vector<1x8x32xf32>
    %167 = vector.shape_cast %166 : vector<1x8x32xf32> to vector<8x32xf32>
    %168 = vector.shape_cast %165 : vector<8x32xf32> to vector<1x8x32xf32>
    tpu.vector_store %arg14[%c0_60, %c0_61, %c0_62], %168 {strides = array<i32>} : memref<1x8x32xf32, #tpu.memory_space<vmem>>, vector<1x8x32xf32>,
    return
  }
  func.func @transform_0(%arg0: i32) -> (i32, i32, i32) {
    %c0_i32 = arith.constant 0 : i32
    %c0_i32_0 = arith.constant 0 : i32
    %c0_i32_1 = arith.constant 0 : i32
    return %arg0, %c0_i32, %c0_i32_0 : i32, i32, i32
  }
  func.func @transform_1(%arg0: i32) -> (i32, i32) {
    %c0_i32 = arith.constant 0 : i32
    %c0_i32_0 = arith.constant 0 : i32
    %c0_i32_1 = arith.constant 0 : i32
    return %c0_i32, %c0_i32_0 : i32, i32
  }
  func.func @transform_2(%arg0: i32) -> (i32, i32) {
    %c0_i32 = arith.constant 0 : i32
    %c0_i32_0 = arith.constant 0 : i32
    %c0_i32_1 = arith.constant 0 : i32
    return %c0_i32, %c0_i32_0 : i32, i32
  }
  func.func @transform_3(%arg0: i32) -> (i32, i32) {
    %c0_i32 = arith.constant 0 : i32
    %c0_i32_0 = arith.constant 0 : i32
    %c0_i32_1 = arith.constant 0 : i32
    return %c0_i32, %c0_i32_0 : i32, i32
  }
  func.func @transform_4(%arg0: i32) -> (i32, i32) {
    %c0_i32 = arith.constant 0 : i32
    %c0_i32_0 = arith.constant 0 : i32
    %c0_i32_1 = arith.constant 0 : i32
    return %c0_i32, %c0_i32_0 : i32, i32
  }
  func.func @transform_5(%arg0: i32) -> (i32, i32) {
    %c0_i32 = arith.constant 0 : i32
    %c0_i32_0 = arith.constant 0 : i32
    %c0_i32_1 = arith.constant 0 : i32
    return %c0_i32, %c0_i32_0 : i32, i32
  }
  func.func @transform_6(%arg0: i32) -> (i32, i32) {
    %c0_i32 = arith.constant 0 : i32
    %c0_i32_0 = arith.constant 0 : i32
    %c0_i32_1 = arith.constant 0 : i32
    return %c0_i32, %c0_i32_0 : i32, i32
  }
  func.func @transform_7(%arg0: i32) -> (i32, i32) {
    %c0_i32 = arith.constant 0 : i32
    %c0_i32_0 = arith.constant 0 : i32
    %c0_i32_1 = arith.constant 0 : i32
    return %c0_i32, %c0_i32_0 : i32, i32
  }
  func.func @transform_8(%arg0: i32) -> (i32, i32) {
    %c0_i32 = arith.constant 0 : i32
    %c0_i32_0 = arith.constant 0 : i32
    %c0_i32_1 = arith.constant 0 : i32
    return %c0_i32, %c0_i32_0 : i32, i32
  }
  func.func @transform_9(%arg0: i32) -> (i32, i32) {
    %c0_i32 = arith.constant 0 : i32
    %c0_i32_0 = arith.constant 0 : i32
    %c0_i32_1 = arith.constant 0 : i32
    return %c0_i32, %c0_i32_0 : i32, i32
  }
  func.func @transform_10(%arg0: i32) -> (i32, i32) {
    %c0_i32 = arith.constant 0 : i32
    %c0_i32_0 = arith.constant 0 : i32
    %c0_i32_1 = arith.constant 0 : i32
    return %c0_i32, %c0_i32_0 : i32, i32
  }
  func.func @transform_11(%arg0: i32) -> (i32, i32) {
    %c0_i32 = arith.constant 0 : i32
    %c0_i32_0 = arith.constant 0 : i32
    %c0_i32_1 = arith.constant 0 : i32
    return %c0_i32, %c0_i32_0 : i32, i32
  }
  func.func @transform_12(%arg0: i32) -> (i32, i32) {
    %c0_i32 = arith.constant 0 : i32
    %c0_i32_0 = arith.constant 0 : i32
    %c0_i32_1 = arith.constant 0 : i32
    return %c0_i32, %c0_i32_0 : i32, i32
  }
  func.func @transform_13(%arg0: i32) -> (i32, i32, i32) {
    %c0_i32 = arith.constant 0 : i32
    %c0_i32_0 = arith.constant 0 : i32
    %c0_i32_1 = arith.constant 0 : i32
    return %arg0, %c0_i32, %c0_i32_0 : i32, i32, i32
  }
}

</mosaic_0001>

<bundles_post_ra>
// kernel: transformer_forward.9
= control target key start
LH: loop header
LB: loop body
LE: loop exit
PB: predicated region body
PF: predicated region fallthrough
CT: control target
= control target key end

     0   :  { %s486_s12 = smov 0   ;;  %s488_s13 = smov 0   ;;  %s528_s0 = inlined_call_operand.vmem [shape: bf16[16,32], index: 0, kind: input, shape index: {}]   ;;  %s529_s1 = inlined_call_operand.vmem [shape: bf16[32,128], index: 1, kind: input, shape index: {}]   ;;  %s530_s2 = inlined_call_operand.vmem [shape: f32[1,128], index: 2, kind: input, shape index: {}]   ;;  %s531_s3 = inlined_call_operand.vmem [shape: f32[16,128], index: 3, kind: output, shape index: {}]  }
   0x1   :  { %s490_s14 = smov 0  }
   0x2 LB: > { %s25_s15 = sadd.s32 1, %s458_s13  ;;  %p392_p0 = scmp.ge.s32.totalorder %s462_s14, 1  ;;  %s462_s14 = sphi %s490_s14, %s13_s14   ;;  %s458_s13 = sphi %s488_s13, %s533_s13   ;;  %s454_s12 = sphi %s486_s12, %s532_s12  }
   0x3   : > { %p27_p1 = scmp.ge.s32.totalorder %s25_s15, 2  ;;  %p167_p2 = scmp.lt.s32.totalorder %s462_s14, 3 }
   0x5   : > { %s535_s15 = smov (%p27_p1, %s25_s15), 0  ;;  %p168_p3 = pnand %p392_p0, %p167_p2 }
   0x6   : > { %p199_p4 = scmp.lt.s32.totalorder (!%p168_p3), %s454_s12, 1 }
   0x7   : > { %171 = sbr.rel (%p168_p3) target bundleno = 220 (0xdc), region = 32 }
   0xc   : > { %v438_v0 = vld [vmem:[%s529_s1 + $0x8] sm:$0xff]   ;;  %v464_v1 = vmov 0.0   ;;  %v439_v2 = vld [vmem:[%s529_s1] sm:$0xff]   ;;  %vm465_vm0 = vmmov 0   ;;  %s537_s12 = smov (!%p199_p4, %s454_s12), 1  ;;  %vm242_vm1 = vcmask 261120  }
   0xd   : > { %404 = vmatprep.subr.bf16.mxu0 %v464_v1  ;;  %408 = vmatprep.mubr.msk.bf16.mxu0 %vm465_vm0, %v464_v1  ;;  %s393_s20 = sshll.u32 %s537_s12, 2  ;;  %s394_s24 = sshll.u32 %s537_s12, 3  ;;  %v395_v4 = vld [vmem:[%s530_s2] ss:$0 sm:$0xff] }
   0xe   : > { %405 = vmatpush3.bf16.msra.mxu0 %v438_v0  ;;  %s202_s23 = scalar_lea.vmem %s528_s0, %s393_s20  ;;  %s216_s29 = scalar_lea.vmem %s531_s3, %s394_s24 }
   0xf   : > { %406 = vmatprep.subr.bf16.mxu0 %v464_v1  ;;  %v218_v3 = vld [vmem:[%s202_s23] sm:$0xf] }
  0x12   : > { %407 = vmatpush3.bf16.msra.mxu0 %v439_v2 }
  0x15   : > { %409 = vmatmul.mubr.msk.bf16.vlgmr.msra.gmra.mxu0 %vm242_vm1, %v218_v3 }
  0xd5   : > { %v280_v5 = vpop.f32.mrf.mxu0 }
  0xd6   : > { %v281_v6 = vadd.f32 %v395_v4, %v280_v5 }
  0xd7   : > { %v410_v7 = vpop.f32.mrf.mxu0 }
  0xd8   : > { %286 = vst [vmem:[%s216_s29] sm:$0xff] %v281_v6 }
  0xd9   : > { %v283_v8 = vpop.f32.mrf.mxu0 }
  0xdb   : > { %v411_v9 = vpop.f32.mrf.mxu0 }
  0xdc PF: > { %s13_s14 = sadd.s32 1, %s462_s14   ;;  %s532_s12 = smov %s458_s13 }
  0xdd   : > { %p10_p5 = scmp.ge.s32.totalorder %s13_s14, 4   ;;  %s533_s13 = smov %s535_s15 }
  0xdf   :  { %12 = sbr.rel (!%p10_p5) target bundleno = 2 (0x2), region = 68 }

// kernel: transformer_forward.5
= control target key start
LH: loop header
LB: loop body
LE: loop exit
PB: predicated region body
PF: predicated region fallthrough
CT: control target
= control target key end

     0   :  { %s1604_s25 = smov 0   ;;  %s1776_s0 = inlined_call_operand.vmem [shape: f32[2,8,32], index: 0, kind: input, shape index: {}]   ;;  %s1777_s1 = inlined_call_operand.vmem [shape: bf16[32,96], index: 1, kind: input, shape index: {}]   ;;  %s1778_s2 = inlined_call_operand.vmem [shape: f32[1,96], index: 2, kind: input, shape index: {}]   ;;  %s1779_s3 = inlined_call_operand.vmem [shape: bf16[32,32], index: 3, kind: input, shape index: {}]   ;;  %s1780_s4 = inlined_call_operand.vmem [shape: f32[1,32], index: 4, kind: input, shape index: {}]   ;;  %s1781_s5 = inlined_call_operand.vmem [shape: f32[1,32], index: 5, kind: input, shape index: {}]   ;;  %s1782_s6 = inlined_call_operand.vmem [shape: f32[1,32], index: 6, kind: input, shape index: {}]   ;;  %s1783_s7 = inlined_call_operand.vmem [shape: bf16[32,64], index: 7, kind: input, shape index: {}]   ;;  %s1784_s8 = inlined_call_operand.vmem [shape: f32[1,64], index: 8, kind: input, shape index: {}]   ;;  %s1785_s9 = inlined_call_operand.vmem [shape: bf16[64,32], index: 9, kind: input, shape index: {}]   ;;  %s1786_s10 = inlined_call_operand.vmem [shape: f32[1,32], index: 10, kind: input, shape index: {}]   ;;  %s1787_s11 = inlined_call_operand.vmem [shape: f32[1,32], index: 11, kind: input, shape index: {}]   ;;  %s1788_s12 = inlined_call_operand.vmem [shape: f32[1,32], index: 12, kind: input, shape index: {}]   ;;  %s1789_s13 = inlined_call_operand.vmem [shape: f32[2,8,32], index: 13, kind: output, shape index: {}]  }
   0x1 LB: > { %s1303_s26 = sadd.s32 4294967295, %s1516_s25   ;;  %p1307_p0 = scmp.ge.s32.totalorder %s1516_s25, 1  ;;  %s1516_s25 = sphi %s1604_s25, %s23_s25  }
   0x2   : > { %p386_p1 = scmp.lt.s32.totalorder %s1516_s25, 3 }
   0x4   : > { %p387_p2 = pnand %p1307_p0, %p386_p1 }
   0x5   : > { %p428_p3 = scmp.lt.s32.totalorder (!%p387_p2), %s1303_s26, 1  ;;  %s1520_s20 = smov (!%p387_p2), 120  }
   0x6   : > { %390 = sbr.rel (%p387_p2) target bundleno = 2433 (0x981), region = 72  ;;  %s1521_s21 = smov (!%p387_p2), 96  }
   0x7   : > { %s1522_s22 = smov (!%p387_p2), 80   ;;  %s1523_s23 = smov (!%p387_p2), 88  }
   0x8   : > { %s1524_s24 = smov (!%p387_p2), 72   ;;  %s1525_s27 = smov (!%p387_p2), 112  }
   0x9   : > { %s1526_s28 = smov (!%p387_p2), 104   ;;  %s1527_s29 = smov (!%p387_p2), 56  }
   0xa   : > { %s1528_s30 = smov (!%p387_p2), 64   ;;  %s1529_s15 = smov (!%p387_p2), 40  }
   0xb   : > { %v1480_v0 = vld [vmem:[%s1777_s1 + $0x8] sm:$0xff]   ;;  %v1518_v1 = vmov 0.0   ;;  %v1481_v2 = vld [vmem:[%s1777_s1] sm:$0xff]   ;;  %vm1519_vm0 = vmmov 0   ;;  %s1791_s26 = smov (!%p428_p3, %s1303_s26), 1  ;;  %vm462_vm1 = vcmask 261120  }
   0xc   : > { %1372 = vmatprep.subr.bf16.mxu0 %v1518_v1  ;;  %1380 = vmatprep.subr.bf16.mxu1 %v1518_v1  ;;  %s1308_s14 = sshll.u32 %s1791_s26, 3  ;;  %v1310_v5 = vld [vmem:[%s1778_s2] ss:$0 sm:$0xff]  ;;  %vm510_vm2 = vcmask 64512   ;;  %s1530_s16 = smov 48   ;;  %vm575_vm3 = vcmask 1043456  }
   0xd   : > { %1373 = vmatpush3.bf16.msra.mxu0 %v1480_v0  ;;  %1376 = vmatprep.mubr.msk.bf16.mxu0 %vm1519_vm0, %v1518_v1  ;;  %s431_s17 = scalar_lea.vmem %s1776_s0, %s1308_s14  ;;  %vm965_vm4 = vcmask 130048   ;;  %vm967_vm5 = vcmask 195584   ;;  %vm1175_vm6 = vcmask 523264  }
   0xe   : > { %1374 = vmatprep.subr.bf16.mxu0 %v1518_v1  ;;  %1382 = vmatprep.mubr.msk.bf16.mxu1 %vm1519_vm0, %v1518_v1  ;;  %v1634_v3 = vld [vmem:[%s431_s17] sm:$0xff]  ;;  %s1531_s17 = smov 8  }
   0xf   : > { %v438_v4 = vpack.c.bf16 %v1634_v3, %v1634_v3 }
  0x11   : > { %1375 = vmatpush3.bf16.msra.mxu0 %v1481_v2 }
  0x12   : > { %1386 = vmatprep.subr.bf16.mxu0 %v1518_v1 }
  0x14   : > { %1377 = vmatmul.mubr.msk.bf16.vlgmr.msra.gmra.mxu0 %vm462_vm1, %v438_v4 }
  0x15   : > { %1388 = vmatprep.mubr.msk.bf16.mxu0 %vm1519_vm0, %v1518_v1 }
  0xd4   : > { %v500_v6 = vpop.f32.mrf.mxu0 }
  0xd5   : > { %v501_v7 = vadd.f32 %v1310_v5, %v500_v6 }
  0xd6   : > { %v1378_v8 = vpop.f32.mrf.mxu0 }
  0xd7   : > { %v1644_v9 = vpack.c.bf16 %v501_v7, %v501_v7 }
  0xd8   : > { %v503_v10 = vpop.f32.mrf.mxu0 }
  0xd9   : > { %619 = vrot.lane.b32.xlu1 %v1644_v9, %s1520_s20  ;;  %508 = vrot.lane.b32.xlu0 %v1644_v9, %s1521_s21 }
  0xda   : > { %v1379_v11 = vpop.f32.mrf.mxu0 }
  0xdd   : > { %732 = vrot.lane.b32.xlu1 %v1644_v9, %s1522_s22  ;;  %621 = vrot.lane.b32.xlu0 %v1644_v9, %s1523_s23  ;;  %s1532_s22 = smov 16   ;;  %s1533_s23 = smov 24  }
  0xe1   : > { %843 = vrot.lane.b32.xlu1 %v1644_v9, %s1524_s24  ;;  %730 = vrot.lane.b32.xlu0 %v1644_v9, %s1525_s27  ;;  %s435_s24 = scalar_lea.vmem %s1789_s13, %s1308_s14 }
  0xe5   : > { %841 = vrot.lane.b32.xlu0 %v1644_v9, %s1526_s28 }
 0x14b   : > { %v509_v12 = vpop.permute.xlu0 %508  ;;  %v620_v15 = vpop.permute.xlu1 %619 }
 0x14c   : > { %v515_v13 = vsel %vm510_vm2, %v509_v12, 0 }
 0x14d   : > { %1381 = vmatpush3.bf16.xpose.msra.mxu1 %v515_v13 }
 0x14e   : > { %1392 = vmatprep.subr.bf16.mxu1 %v1518_v1 }
 0x14f   : > { %v622_v14 = vpop.permute.xlu0 %621  ;;  %v733_v17 = vpop.permute.xlu1 %732 }
 0x150   : > { %v627_v16 = vsel %vm510_vm2, %v622_v14, 0  ;;  %v738_v18 = vsel %vm510_vm2, %v733_v17, 0 }
 0x153   : > { %v844_v19 = vpop.permute.xlu1 %843  ;;  %v731_v20 = vpop.permute.xlu0 %730 }
 0x154   : > { %1383 = vmatmul.mubr.msk.bf16.vlgmr.msra.gmra.mxu1 %vm510_vm2, %v1644_v9  ;;  %v849_v21 = vsel %vm510_vm2, %v844_v19, 0 }
 0x155   : > { %1393 = vmatpush3.bf16.xpose.msra.mxu1 %v627_v16  ;;  %1394 = vmatprep.mubr.msk.bf16.mxu1 %vm1519_vm0, %v1518_v1 }
 0x156   : > { %1404 = vmatprep.subr.bf16.mxu1 %v1518_v1 }
 0x157   : > { %v842_v22 = vpop.permute.xlu0 %841 }
 0x15c   : > { %1395 = vmatmul.mubr.msk.bf16.vlgmr.msra.gmra.mxu1 %vm510_vm2, %v620_v15 }
 0x15d   : > { %1405 = vmatpush3.bf16.xpose.msra.mxu1 %v738_v18  ;;  %1406 = vmatprep.mubr.msk.bf16.mxu1 %vm1519_vm0, %v1518_v1 }
 0x15e   : > { %1416 = vmatprep.subr.bf16.mxu1 %v1518_v1 }
 0x164   : > { %1407 = vmatmul.mubr.msk.bf16.vlgmr.msra.gmra.mxu1 %vm510_vm2, %v731_v20 }
 0x165   : > { %1417 = vmatpush3.bf16.xpose.msra.mxu1 %v849_v21  ;;  %1418 = vmatprep.mubr.msk.bf16.mxu1 %vm1519_vm0, %v1518_v1 }
 0x166   : > { %1428 = vmatprep.subr.bf16.mxu1 %v1518_v1 }
 0x16c   : > { %1419 = vmatmul.mubr.msk.bf16.vlgmr.msra.gmra.mxu1 %vm510_vm2, %v842_v22 }
 0x16d   : > { %1432 = vmatprep.mubr.msk.bf16.mxu1 %vm1519_vm0, %v1518_v1 }
 0x214   : > { %v551_v23 = vpop.f32.mrf.mxu1 }
 0x215   : > { %v557_v24 = vmul.f32 0.35355338, %v551_v23 }
 0x216   : > { %v1384_v25 = vpop.f32.mrf.mxu1 }
 0x217   : > { %v558_v26 = vsel %vm510_vm2, %v557_v24, -inf }
 0x218   : > { %559 = vmax.xlane.f32.xlu1 %v558_v26  ;;  %v554_v27 = vpop.f32.mrf.mxu1 }
 0x21a   : > { %v1385_v28 = vpop.f32.mrf.mxu1 }
 0x21c   : > { %v663_v29 = vpop.f32.mrf.mxu1 }
 0x21d   : > { %v669_v30 = vmul.f32 0.35355338, %v663_v29 }
 0x21e   : > { %v1396_v31 = vpop.f32.mrf.mxu1 }
 0x21f   : > { %v670_v32 = vsel %vm510_vm2, %v669_v30, -inf }
 0x220   : > { %671 = vmax.xlane.f32.xlu0 %v670_v32  ;;  %v666_v33 = vpop.f32.mrf.mxu1 }
 0x222   : > { %v1397_v34 = vpop.f32.mrf.mxu1 }
 0x224   : > { %v774_v35 = vpop.f32.mrf.mxu1 }
 0x225   : > { %v780_v36 = vmul.f32 0.35355338, %v774_v35 }
 0x226   : > { %v1408_v37 = vpop.f32.mrf.mxu1 }
 0x227   : > { %v781_v38 = vsel %vm510_vm2, %v780_v36, -inf  ;;  %v1482_v37 = vld [vmem:[%s1779_s3 + $0x8] sm:$0xff]  }
 0x228   : > { %782 = vmax.xlane.f32.xlu0 %v781_v38  ;;  %v777_v39 = vpop.f32.mrf.mxu1  ;;  %1429 = vmatpush3.bf16.msra.mxu1 %v1482_v37  ;;  %v1483_v38 = vld [vmem:[%s1779_s3] sm:$0xff]  }
 0x229   : > { %1430 = vmatprep.subr.bf16.mxu1 %v1518_v1 }
 0x22a   : > { %v1409_v40 = vpop.f32.mrf.mxu1 }
 0x22c   : > { %v885_v41 = vpop.f32.mrf.mxu1  ;;  %1431 = vmatpush3.bf16.msra.mxu1 %v1483_v38 }
 0x22d   : > { %v891_v42 = vmul.f32 0.35355338, %v885_v41  ;;  %1444 = vmatprep.subr.bf16.mxu1 %v1518_v1 }
 0x22e   : > { %v1420_v43 = vpop.f32.mrf.mxu1 }
 0x22f   : > { %v892_v44 = vsel %vm510_vm2, %v891_v42, -inf }
 0x230   : > { %893 = vmax.xlane.f32.xlu1 %v892_v44  ;;  %v888_v45 = vpop.f32.mrf.mxu1 }
 0x232   : > { %v1421_v46 = vpop.f32.mrf.mxu1 }
 0x2a1   : > { %v560_v47 = vpop.xlane.xlu1 %559 }
 0x2a2   : > { %v561_v48 = vsub.f32 %v557_v24, %v560_v47 }
 0x2a4   : > { %v562_v49 = vmul.f32 1.442695, %v561_v48 }
 0x2a6   : > { %1490 = vpow2.f32 %v562_v49 }
 0x2a9   : > { %v672_v50 = vpop.xlane.xlu0 %671 }
 0x2aa   : > { %v673_v51 = vsub.f32 %v669_v30, %v672_v50 }
 0x2ac   : > { %v674_v52 = vmul.f32 1.442695, %v673_v51 }
 0x2ae   : > { %1492 = vpow2.f32 %v674_v52 }
 0x2b1   : > { %v783_v53 = vpop.xlane.xlu0 %782 }
 0x2b2   : > { %v784_v54 = vsub.f32 %v780_v36, %v783_v53 }
 0x2b3   : > { %v1491_v55 = vpop.eup %1490 }
 0x2b4   : > { %v785_v56 = vmul.f32 1.442695, %v784_v54  ;;  %v564_v57 = vsel %vm510_vm2, %v1491_v55, 0.0  ;;  %v1322_v54 = vld [vmem:[%s1780_s4] ss:$0 sm:$0xff] }
 0x2b5   : > { %565 = vadd.xlane.f32.xlu0 %v564_v57 }
 0x2b6   : > { %1494 = vpow2.f32 %v785_v56 }
 0x2b9   : > { %v894_v62 = vpop.xlane.xlu1 %893 }
 0x2ba   : > { %v895_v63 = vsub.f32 %v891_v42, %v894_v62 }
 0x2bb   : > { %v1493_v58 = vpop.eup %1492 }
 0x2bc   : > { %v676_v59 = vsel %vm510_vm2, %v1493_v58, 0.0  ;;  %v896_v0 = vmul.f32 1.442695, %v895_v63 }
 0x2bd   : > { %677 = vadd.xlane.f32.xlu1 %v676_v59 }
 0x2be   : > { %1496 = vpow2.f32 %v896_v0 }
 0x2c3   : > { %v1495_v60 = vpop.eup %1494 }
 0x2c4   : > { %v787_v61 = vsel %vm510_vm2, %v1495_v60, 0.0 }
 0x2c5   : > { %788 = vadd.xlane.f32.xlu0 %v787_v61 }
 0x2cb   : > { %v1497_v2 = vpop.eup %1496 }
 0x2cc   : > { %v898_v4 = vsel %vm510_vm2, %v1497_v2, 0.0 }
 0x2ce   : > { %682 = vrot.lane.b32.xlu1 %v1644_v9, %s1527_s29 }
 0x2db   : > { %570 = vrot.lane.b32.xlu0 %v1644_v9, %s1528_s30 }
 0x2df   : > { %904 = vrot.lane.b32.xlu0 %v1644_v9, %s1529_s15 }
 0x2f2   : > { %899 = vadd.xlane.f32.xlu1 %v898_v4 }
 0x303   : > { %793 = vrot.lane.b32.xlu1 %v1644_v9, %s1530_s16 }
 0x33e   : > { %v566_v5 = vpop.xlane.xlu0 %565 }
 0x33f   : > { %1498 = vrcp.f32 %v566_v5  ;;  %v1484_v5 = vld [vmem:[%s1783_s7 + $0x8] sm:$0xff]  }
 0x346   : > { %v678_v6 = vpop.xlane.xlu1 %677 }
 0x347   : > { %1500 = vrcp.f32 %v678_v6  ;;  %v1486_v6 = vld [vmem:[%s1785_s9 + $0x18] sm:$0xff]  }
 0x34a   : > { %v683_v13 = vpop.permute.xlu1 %682 }
 0x34b   : > { %v688_v16 = vsel %vm575_vm3, %v683_v13, 0  ;;  %v1326_v13 = vld [vmem:[%s1781_s5] ss:$0 sm:$0xff] }
 0x34c   : > { %v1499_v7 = vpop.eup %1498 }
 0x34d   : > { %v568_v10 = vmul.f32 %v1499_v7, %v1491_v55  ;;  %v1487_v7 = vld [vmem:[%s1785_s9 + $0x10] sm:$0xff]  }
 0x34e   : > { %v789_v8 = vpop.xlane.xlu0 %788 }
 0x34f   : > { %v569_v14 = vpack.c.bf16 %v568_v10, %v568_v10  ;;  %1502 = vrcp.f32 %v789_v8 }
 0x352   : > { %v571_v11 = vpop.permute.xlu0 %570 }
 0x353   : > { %v577_v12 = vsel %vm575_vm3, %v571_v11, 0 }
 0x354   : > { %1387 = vmatpush3.bf16.msra.mxu0 %v577_v12  ;;  %v1501_v15 = vpop.eup %1500 }
 0x355   : > { %1398 = vmatprep.subr.bf16.mxu0 %v1518_v1  ;;  %v680_v9 = vmul.f32 %v1501_v15, %v1493_v58  ;;  %v1327_v15 = vld [vmem:[%s1782_s6] ss:$0 sm:$0xff] }
 0x356   : > { %v905_v23 = vpop.permute.xlu0 %904 }
 0x357   : > { %1389 = vmatmul.mubr.msk.bf16.vlgmr.msra.gmra.mxu0 %vm510_vm2, %v569_v14  ;;  %v681_v17 = vpack.c.bf16 %v680_v9, %v680_v9  ;;  %v910_v25 = vsel %vm575_vm3, %v905_v23, 0 }
 0x358   : > { %1399 = vmatpush3.bf16.msra.mxu0 %v688_v16  ;;  %1400 = vmatprep.mubr.msk.bf16.mxu0 %vm1519_vm0, %v1518_v1 }
 0x359   : > { %1410 = vmatprep.subr.bf16.mxu0 %v1518_v1 }
 0x35c   : > { %v1503_v18 = vpop.eup %1502 }
 0x35d   : > { %v791_v20 = vmul.f32 %v1503_v18, %v1495_v60  ;;  %v1488_v18 = vld [vmem:[%s1785_s9 + $0x8] sm:$0xff]  }
 0x35f   : > { %1401 = vmatmul.mubr.msk.bf16.vlgmr.msra.gmra.mxu0 %vm510_vm2, %v681_v17  ;;  %v792_v24 = vpack.c.bf16 %v791_v20, %v791_v20  ;;  %v1328_v20 = vld [vmem:[%s1784_s8] ss:$0 sm:$0xff] }
 0x360   : > { %1412 = vmatprep.mubr.msk.bf16.mxu0 %vm1519_vm0, %v1518_v1 }
 0x37b   : > { %v900_v19 = vpop.xlane.xlu1 %899 }
 0x37c   : > { %1504 = vrcp.f32 %v900_v19  ;;  %v1489_v19 = vld [vmem:[%s1785_s9] sm:$0xff]  }
 0x37f   : > { %v794_v21 = vpop.permute.xlu1 %793 }
 0x380   : > { %v799_v22 = vsel %vm575_vm3, %v794_v21, 0 }
 0x381   : > { %1411 = vmatpush3.bf16.msra.mxu0 %v799_v22 }
 0x382   : > { %1422 = vmatprep.subr.bf16.mxu0 %v1518_v1 }
 0x384   : > { %1413 = vmatmul.mubr.msk.bf16.vlgmr.msra.gmra.mxu0 %vm510_vm2, %v792_v24 }
 0x385   : > { %1423 = vmatpush3.bf16.msra.mxu0 %v910_v25  ;;  %1424 = vmatprep.mubr.msk.bf16.mxu0 %vm1519_vm0, %v1518_v1 }
 0x386   : > { %1436 = vmatprep.subr.bf16.mxu0 %v1518_v1 }
 0x389   : > { %v1505_v26 = vpop.eup %1504 }
 0x38a   : > { %v902_v27 = vmul.f32 %v1505_v26, %v1497_v2 }
 0x38c   : > { %v903_v28 = vpack.c.bf16 %v902_v27, %v902_v27 }
 0x38e   : > { %1425 = vmatmul.mubr.msk.bf16.vlgmr.msra.gmra.mxu0 %vm510_vm2, %v903_v28 }
 0x38f   : > { %1440 = vmatprep.mubr.msk.bf16.mxu0 %vm1519_vm0, %v1518_v1  ;;  %1437 = vmatpush3.bf16.msra.mxu0 %v1484_v5 }
 0x390   : > { %1438 = vmatprep.subr.bf16.mxu0 %v1518_v1 }
 0x417   : > { %v613_v29 = vpop.f32.mrf.mxu0 }
 0x419   : > { %v1390_v30 = vpop.f32.mrf.mxu0 }
 0x41b   : > { %v616_v31 = vpop.f32.mrf.mxu0 }
 0x41d   : > { %v1391_v32 = vpop.f32.mrf.mxu0 }
 0x41f   : > { %v724_v33 = vpop.f32.mrf.mxu0 }
 0x420   : > { %953 = vrot.lane.b32.xlu1 %v724_v33, %s1531_s17 }
 0x421   : > { %v1402_v34 = vpop.f32.mrf.mxu0 }
 0x423   : > { %v727_v35 = vpop.f32.mrf.mxu0 }
 0x425   : > { %v1403_v36 = vpop.f32.mrf.mxu0 }
 0x444   : > { %v835_v39 = vpop.f32.mrf.mxu0 }
 0x445   : > { %957 = vrot.lane.b32.xlu0 %v835_v39, %s1532_s22 }
 0x446   : > { %v1414_v40 = vpop.f32.mrf.mxu0 }
 0x448   : > { %v838_v41 = vpop.f32.mrf.mxu0 }
 0x44a   : > { %v1415_v42 = vpop.f32.mrf.mxu0 }
 0x44e   : > { %v946_v43 = vpop.f32.mrf.mxu0 }
 0x44f   : > { %961 = vrot.lane.b32.xlu1 %v946_v43, %s1533_s23 }
 0x450   : > { %v1426_v44 = vpop.f32.mrf.mxu0 }
 0x451   : > { %v1338_v44 = vld [vmem:[%s1787_s11] ss:$0 sm:$0xff] }
 0x452   : > { %v949_v45 = vpop.f32.mrf.mxu0 }
 0x454   : > { %v1427_v46 = vpop.f32.mrf.mxu0 }
 0x455   : > { %v1339_v46 = vld [vmem:[%s1788_s12] ss:$0 sm:$0xff] }
 0x492   : > { %v954_v47 = vpop.permute.xlu1 %953 }
 0x493   : > { %v964_v49 = vsel %vm510_vm2, %v613_v29, %v954_v47 }
 0x4b7   : > { %v958_v48 = vpop.permute.xlu0 %957 }
 0x4b8   : > { %v966_v50 = vsel %vm965_vm4, %v964_v49, %v958_v48 }
 0x4c1   : > { %v962_v51 = vpop.permute.xlu1 %961 }
 0x4c2   : > { %v968_v52 = vsel %vm967_vm5, %v966_v50, %v962_v51 }
 0x4c3   : > { %v969_v53 = vpack.c.bf16 %v968_v52, %v968_v52 }
 0x4c5   : > { %1433 = vmatmul.mubr.msk.bf16.vlgmr.msra.gmra.mxu1 %vm462_vm1, %v969_v53 }
 0x4c6   : > { %1452 = vmatprep.mubr.msk.bf16.mxu1 %vm1519_vm0, %v1518_v1  ;;  %1445 = vmatpush3.bf16.msra.mxu1 %v1486_v6 }
 0x4c7   : > { %1446 = vmatprep.subr.bf16.mxu1 %v1518_v1 }
 0x4ca   : > { %1447 = vmatpush3.bf16.msra.mxu1 %v1487_v7 }
 0x4cb   : > { %1448 = vmatprep.subr.bf16.mxu1 %v1518_v1 }
 0x4ce   : > { %1449 = vmatpush3.bf16.msra.mxu1 %v1488_v18 }
 0x4cf   : > { %1450 = vmatprep.subr.bf16.mxu1 %v1518_v1  ;;  %v1332_v1 = vld [vmem:[%s1786_s10] ss:$0 sm:$0xff] }
 0x4d2   : > { %1451 = vmatpush3.bf16.msra.mxu1 %v1489_v19 }
 0x585   : > { %v1030_v55 = vpop.f32.mrf.mxu1 }
 0x586   : > { %v1031_v56 = vadd.f32 %v1322_v54, %v1030_v55 }
 0x587   : > { %v1434_v57 = vpop.f32.mrf.mxu1 }
 0x588   : > { %v1036_v58 = vadd.f32 %v1031_v56, %v1634_v3  ;;  %v1485_v3 = vld [vmem:[%s1783_s7] sm:$0xff]  }
 0x589   : > { %v1033_v59 = vpop.f32.mrf.mxu1  ;;  %1439 = vmatpush3.bf16.msra.mxu0 %v1485_v3 }
 0x58a   : > { %v1039_v60 = vsel %vm462_vm1, %v1036_v58, 0.0 }
 0x58b   : > { %1040 = vadd.xlane.f32.xlu0 %v1039_v60  ;;  %v1435_v61 = vpop.f32.mrf.mxu1 }
 0x614   : > { %v1041_v62 = vpop.xlane.xlu0 %1040 }
 0x615   : > { %v1043_v63 = vmul.f32 0.03125, %v1041_v62 }
 0x617   : > { %v1044_v0 = vsub.f32 %v1036_v58, %v1043_v63 }
 0x619   : > { %v1045_v2 = vmul.f32 %v1044_v0, %v1044_v0 }
 0x61b   : > { %v1046_v4 = vsel %vm462_vm1, %v1045_v2, 0.0 }
 0x61c   : > { %1047 = vadd.xlane.f32.xlu1 %v1046_v4 }
 0x6a5   : > { %v1048_v8 = vpop.xlane.xlu1 %1047 }
 0x6a6   : > { %v1049_v10 = vmul.f32 0.03125, %v1048_v8 }
 0x6a8   : > { %v1050_v11 = vadd.f32 1e-05, %v1049_v10 }
 0x6aa   : > { %1506 = vrsqrt.f32 %v1050_v11 }
 0x6b7   : > { %v1507_v12 = vpop.eup %1506 }
 0x6b8   : > { %v1052_v14 = vmul.f32 %v1507_v12, %v1044_v0 }
 0x6ba   : > { %v1059_v16 = vmul.f32 %v1326_v13, %v1052_v14 }
 0x6bc   : > { %v1066_v9 = vadd.f32 %v1327_v15, %v1059_v16 }
 0x6be   : > { %v1067_v17 = vpack.c.bf16 %v1066_v9, %v1066_v9 }
 0x6c0   : > { %1441 = vmatmul.mubr.msk.bf16.vlgmr.msra.gmra.mxu0 %vm462_vm1, %v1067_v17 }
 0x780   : > { %v1128_v21 = vpop.f32.mrf.mxu0 }
 0x781   : > { %v1129_v22 = vadd.f32 %v1328_v20, %v1128_v21 }
 0x782   : > { %v1442_v23 = vpop.f32.mrf.mxu0 }
 0x783   : > { %v1134_v24 = vmax.f32 %v1129_v22, 0.0 }
 0x784   : > { %v1131_v25 = vpop.f32.mrf.mxu0 }
 0x785   : > { %v1135_v26 = vpack.c.bf16 %v1134_v24, %v1134_v24 }
 0x786   : > { %v1443_v27 = vpop.f32.mrf.mxu0 }
 0x787   : > { %1453 = vmatmul.mubr.msk.bf16.vlgmr.msra.gmra.mxu1 %vm1175_vm6, %v1135_v26 }
 0x847   : > { %v1213_v28 = vpop.f32.mrf.mxu1 }
 0x848   : > { %v1214_v29 = vadd.f32 %v1332_v1, %v1213_v28 }
 0x849   : > { %v1454_v30 = vpop.f32.mrf.mxu1 }
 0x84a   : > { %v1219_v31 = vadd.f32 %v1214_v29, %v1066_v9 }
 0x84b   : > { %v1216_v32 = vpop.f32.mrf.mxu1 }
 0x84c   : > { %v1222_v33 = vsel %vm462_vm1, %v1219_v31, 0.0 }
 0x84d   : > { %1223 = vadd.xlane.f32.xlu0 %v1222_v33  ;;  %v1455_v34 = vpop.f32.mrf.mxu1 }
 0x8d6   : > { %v1224_v35 = vpop.xlane.xlu0 %1223 }
 0x8d7   : > { %v1225_v36 = vmul.f32 0.03125, %v1224_v35 }
 0x8d9   : > { %v1226_v37 = vsub.f32 %v1219_v31, %v1225_v36 }
 0x8db   : > { %v1227_v38 = vmul.f32 %v1226_v37, %v1226_v37 }
 0x8dd   : > { %v1228_v39 = vsel %vm462_vm1, %v1227_v38, 0.0 }
 0x8de   : > { %1229 = vadd.xlane.f32.xlu0 %v1228_v39 }
 0x967   : > { %v1230_v40 = vpop.xlane.xlu0 %1229 }
 0x968   : > { %v1231_v41 = vmul.f32 0.03125, %v1230_v40 }
 0x96a   : > { %v1232_v42 = vadd.f32 1e-05, %v1231_v41 }
 0x96c   : > { %1508 = vrsqrt.f32 %v1232_v42 }
 0x979   : > { %v1509_v43 = vpop.eup %1508 }
 0x97a   : > { %v1234_v45 = vmul.f32 %v1509_v43, %v1226_v37 }
 0x97c   : > { %v1241_v47 = vmul.f32 %v1338_v44, %v1234_v45 }
 0x97e   : > { %v1248_v48 = vadd.f32 %v1339_v46, %v1241_v47 }
 0x980   : > { %1249 = vst.msk [vmem:[%s435_s24] sm:$0xff] %vm462_vm1, %v1248_v48 }
 0x981 PF: > { %s23_s25 = sadd.s32 1, %s1516_s25  }
 0x982   : > { %p20_p4 = scmp.ge.s32.totalorder %s23_s25, 4  }
 0x984   :  { %22 = sbr.rel (!%p20_p4) target bundleno = 1 (0x1), region = 102 }

// kernel: transformer_forward.6
= control target key start
LH: loop header
LB: loop body
LE: loop exit
PB: predicated region body
PF: predicated region fallthrough
CT: control target
= control target key end

     0   :  { %18 = vsyncpa [#allocation3], 0  ;;  %s1673_s25 = smov 0   ;;  %s1864_s0 = inlined_call_operand.vmem [shape: f32[2,8,32], index: 0, kind: input, shape index: {}]   ;;  %s1865_s1 = inlined_call_operand.vmem [shape: bf16[32,96], index: 1, kind: input, shape index: {}]   ;;  %s1866_s2 = inlined_call_operand.vmem [shape: f32[1,96], index: 2, kind: input, shape index: {}]   ;;  %s1867_s3 = inlined_call_operand.vmem [shape: bf16[32,32], index: 3, kind: input, shape index: {}]   ;;  %s1868_s4 = inlined_call_operand.vmem [shape: f32[1,32], index: 4, kind: input, shape index: {}]   ;;  %s1869_s5 = inlined_call_operand.vmem [shape: f32[1,32], index: 5, kind: input, shape index: {}]   ;;  %s1870_s6 = inlined_call_operand.vmem [shape: f32[1,32], index: 6, kind: input, shape index: {}]   ;;  %s1871_s7 = inlined_call_operand.vmem [shape: bf16[32,64], index: 7, kind: input, shape index: {}]   ;;  %s1872_s8 = inlined_call_operand.vmem [shape: f32[1,64], index: 8, kind: input, shape index: {}]   ;;  %s1873_s9 = inlined_call_operand.vmem [shape: bf16[64,32], index: 9, kind: input, shape index: {}]   ;;  %s1874_s10 = inlined_call_operand.vmem [shape: f32[1,32], index: 10, kind: input, shape index: {}]   ;;  %s1875_s11 = inlined_call_operand.vmem [shape: f32[1,32], index: 11, kind: input, shape index: {}]   ;;  %s1876_s12 = inlined_call_operand.hbm [shape: f32[1,32], index: 12, kind: input, shape index: {}]   ;;  %s1877_s13 = inlined_call_operand.vmem [shape: f32[2,8,32], index: 13, kind: output, shape index: {}]  }
   0x1 LB: > { %s1679_s26 = sadd.s32 4294967295, %s1584_s25   ;;  %p1330_p0 = scmp.ge.s32.totalorder %s1584_s25, 1  ;;  %s1584_s25 = sphi %s1673_s25, %s24_s25  }
   0x2   : > { %p333_p1 = scmp.lt.s32.totalorder %s1584_s25, 3  ;;  %p1491_p3 = scmp.eq.s32.totalorder %s1679_s26, 0 }
   0x3   : > { %s1586_s28 = smov [#allocation2]  }
   0x4   : > { %p1683_p2 = pnand %p1330_p0, %p333_p1  ;;  %s379_s29 = sshll.u32 %s1586_s28, 4  ;;  %s380_s29 = int_to_ptr.vmem [resolvable:$true] %s379_s29 }
   0x5   : > { %s1559_s30 = scalar_lea.vmem %s380_s29, 16  ;;  %s1566_s14 = scalar_lea.vmem %s380_s29, 32 }
   0x6   : > { %p1487_p4 = pneg %p1683_p2  ;;  %p1560_p7 = scmp.ne.s32.totalorder %s380_s29, %s1559_s30 }
   0x7   : > { %p1567_p10 = scmp.lt.s32.totalorder %s380_s29, %s380_s29  ;;  %p1568_p11 = scmp.lt.s32.totalorder %s1566_s14, %s1559_s30 }
   0x8   : > { %p1488_p5 = pnand %p1491_p3, %p1487_p4 }
   0x9   : > { %p1569_p12 = por %p1568_p11, %p1567_p10 }
   0xa   : > { %p1550_p6 = pneg %p1488_p5 }
   0xc   : > { %p1562_p8 = pnand %p1560_p7, %p1550_p6 }
   0xe   : > { %p1563_p9 = pneg %p1562_p8 }
  0x10   : > { %p1570_p13 = pnand %p1569_p12, %p1563_p9 }
  0x12   : > { %1573 = shalt.err (!%p1570_p13)
}
  0x13   : > { %1490 = dma.hbm_to_vmem [thread:$0]  (!%p1488_p5), %s1876_s12, 16, %s380_s29, [#allocation3]  }
  0x14   : > { %399 = sbr.rel (%p1683_p2) target bundleno = 2449 (0x991), region = 72 }
  0x19   : > { %1579 = dma.done.wait (%p1491_p3), [#allocation3], 16  }
  0x1a   : > { %1581 = vsyncadd (%p1491_p3), [#allocation3], 4294967280  ;;  %p441_p0 = scmp.lt.s32.totalorder %s1679_s26, 1  ;;  %v1587_v0 = vmov 0.0   ;;  %vm1588_vm0 = vmmov 0   ;;  %v1518_v1 = vld [vmem:[%s1865_s1 + $0x8] sm:$0xff]  }
  0x1b   : > { %1399 = vmatprep.subr.bf16.mxu0 %v1587_v0  ;;  %1403 = vmatprep.mubr.msk.bf16.mxu0 %vm1588_vm0, %v1587_v0  ;;  %v1519_v2 = vld [vmem:[%s1865_s1] sm:$0xff]   ;;  %vm475_vm1 = vcmask 261120   ;;  %s1589_s29 = smov 120   ;;  %s1590_s30 = smov 96   ;;  %vm523_vm2 = vcmask 64512   ;;  %vm588_vm3 = vcmask 1043456  }
  0x1c   : > { %s1880_s26 = smov (!%p441_p0, %s1679_s26), 1  ;;  %1407 = vmatprep.subr.bf16.mxu1 %v1587_v0  ;;  %1409 = vmatprep.mubr.msk.bf16.mxu1 %vm1588_vm0, %v1587_v0  ;;  %v1337_v5 = vld [vmem:[%s1866_s2] ss:$0 sm:$0xff]  ;;  %s1591_s14 = smov 80   ;;  %vm978_vm4 = vcmask 130048   ;;  %vm980_vm5 = vcmask 195584  }
  0x1d   : > { %s1335_s17 = sshll.u32 %s1880_s26, 3  ;;  %1400 = vmatpush3.bf16.msra.mxu0 %v1518_v1  ;;  %s1592_s15 = smov 88   ;;  %vm1188_vm6 = vcmask 523264  }
  0x1e   : > { %s444_s20 = scalar_lea.vmem %s1864_s0, %s1335_s17  ;;  %1401 = vmatprep.subr.bf16.mxu0 %v1587_v0  ;;  %s1593_s16 = smov 72  }
  0x1f   : > { %v1723_v3 = vld [vmem:[%s444_s20] sm:$0xff]  ;;  %s1594_s18 = smov 112   ;;  %s1595_s19 = smov 104  }
  0x20   : > { %v451_v4 = vpack.c.bf16 %v1723_v3, %v1723_v3  ;;  %s1596_s20 = smov 56   ;;  %s1597_s21 = smov 64  }
  0x21   : > { %1402 = vmatpush3.bf16.msra.mxu0 %v1519_v2  ;;  %s1598_s22 = smov 40   ;;  %s1599_s23 = smov 48  }
  0x22   : > { %1413 = vmatprep.subr.bf16.mxu0 %v1587_v0  ;;  %s1600_s24 = smov 8  }
  0x24   : > { %1404 = vmatmul.mubr.msk.bf16.vlgmr.msra.gmra.mxu0 %vm475_vm1, %v451_v4 }
  0x25   : > { %1415 = vmatprep.mubr.msk.bf16.mxu0 %vm1588_vm0, %v1587_v0 }
  0xe4   : > { %v513_v6 = vpop.f32.mrf.mxu0 }
  0xe5   : > { %v514_v7 = vadd.f32 %v1337_v5, %v513_v6 }
  0xe6   : > { %v1405_v8 = vpop.f32.mrf.mxu0 }
  0xe7   : > { %v1735_v9 = vpack.c.bf16 %v514_v7, %v514_v7 }
  0xe8   : > { %v516_v10 = vpop.f32.mrf.mxu0 }
  0xe9   : > { %632 = vrot.lane.b32.xlu1 %v1735_v9, %s1589_s29  ;;  %521 = vrot.lane.b32.xlu0 %v1735_v9, %s1590_s30 }
  0xea   : > { %v1406_v11 = vpop.f32.mrf.mxu0 }
  0xed   : > { %745 = vrot.lane.b32.xlu1 %v1735_v9, %s1591_s14  ;;  %634 = vrot.lane.b32.xlu0 %v1735_v9, %s1592_s15  ;;  %s1601_s14 = smov 16   ;;  %s1602_s15 = smov 24  }
  0xf1   : > { %856 = vrot.lane.b32.xlu1 %v1735_v9, %s1593_s16  ;;  %743 = vrot.lane.b32.xlu0 %v1735_v9, %s1594_s18 }
  0xf5   : > { %854 = vrot.lane.b32.xlu0 %v1735_v9, %s1595_s19 }
 0x15b   : > { %v522_v12 = vpop.permute.xlu0 %521  ;;  %v633_v15 = vpop.permute.xlu1 %632 }
 0x15c   : > { %v528_v13 = vsel %vm523_vm2, %v522_v12, 0 }
 0x15d   : > { %1408 = vmatpush3.bf16.xpose.msra.mxu1 %v528_v13 }
 0x15e   : > { %1419 = vmatprep.subr.bf16.mxu1 %v1587_v0 }
 0x15f   : > { %v635_v14 = vpop.permute.xlu0 %634  ;;  %v746_v17 = vpop.permute.xlu1 %745 }
 0x160   : > { %v640_v16 = vsel %vm523_vm2, %v635_v14, 0  ;;  %v751_v18 = vsel %vm523_vm2, %v746_v17, 0 }
 0x163   : > { %v857_v19 = vpop.permute.xlu1 %856  ;;  %v744_v20 = vpop.permute.xlu0 %743 }
 0x164   : > { %1410 = vmatmul.mubr.msk.bf16.vlgmr.msra.gmra.mxu1 %vm523_vm2, %v1735_v9  ;;  %v862_v21 = vsel %vm523_vm2, %v857_v19, 0 }
 0x165   : > { %1420 = vmatpush3.bf16.xpose.msra.mxu1 %v640_v16  ;;  %1421 = vmatprep.mubr.msk.bf16.mxu1 %vm1588_vm0, %v1587_v0 }
 0x166   : > { %1431 = vmatprep.subr.bf16.mxu1 %v1587_v0 }
 0x167   : > { %v855_v22 = vpop.permute.xlu0 %854 }
 0x16c   : > { %1422 = vmatmul.mubr.msk.bf16.vlgmr.msra.gmra.mxu1 %vm523_vm2, %v633_v15 }
 0x16d   : > { %1432 = vmatpush3.bf16.xpose.msra.mxu1 %v751_v18  ;;  %1433 = vmatprep.mubr.msk.bf16.mxu1 %vm1588_vm0, %v1587_v0 }
 0x16e   : > { %1443 = vmatprep.subr.bf16.mxu1 %v1587_v0 }
 0x174   : > { %1434 = vmatmul.mubr.msk.bf16.vlgmr.msra.gmra.mxu1 %vm523_vm2, %v744_v20 }
 0x175   : > { %1444 = vmatpush3.bf16.xpose.msra.mxu1 %v862_v21  ;;  %1445 = vmatprep.mubr.msk.bf16.mxu1 %vm1588_vm0, %v1587_v0 }
 0x176   : > { %1455 = vmatprep.subr.bf16.mxu1 %v1587_v0 }
 0x17c   : > { %1446 = vmatmul.mubr.msk.bf16.vlgmr.msra.gmra.mxu1 %vm523_vm2, %v855_v22 }
 0x17d   : > { %1459 = vmatprep.mubr.msk.bf16.mxu1 %vm1588_vm0, %v1587_v0 }
 0x224   : > { %v564_v23 = vpop.f32.mrf.mxu1 }
 0x225   : > { %v570_v24 = vmul.f32 0.35355338, %v564_v23 }
 0x226   : > { %v1411_v25 = vpop.f32.mrf.mxu1 }
 0x227   : > { %v571_v26 = vsel %vm523_vm2, %v570_v24, -inf }
 0x228   : > { %572 = vmax.xlane.f32.xlu1 %v571_v26  ;;  %v567_v27 = vpop.f32.mrf.mxu1 }
 0x22a   : > { %v1412_v28 = vpop.f32.mrf.mxu1 }
 0x22c   : > { %v676_v29 = vpop.f32.mrf.mxu1 }
 0x22d   : > { %v682_v30 = vmul.f32 0.35355338, %v676_v29 }
 0x22e   : > { %v1423_v31 = vpop.f32.mrf.mxu1 }
 0x22f   : > { %v683_v32 = vsel %vm523_vm2, %v682_v30, -inf }
 0x230   : > { %684 = vmax.xlane.f32.xlu0 %v683_v32  ;;  %v679_v33 = vpop.f32.mrf.mxu1 }
 0x232   : > { %v1424_v34 = vpop.f32.mrf.mxu1 }
 0x234   : > { %v787_v35 = vpop.f32.mrf.mxu1 }
 0x235   : > { %v793_v36 = vmul.f32 0.35355338, %v787_v35 }
 0x236   : > { %v1435_v37 = vpop.f32.mrf.mxu1 }
 0x237   : > { %v794_v38 = vsel %vm523_vm2, %v793_v36, -inf  ;;  %v1520_v37 = vld [vmem:[%s1867_s3 + $0x8] sm:$0xff]  }
 0x238   : > { %795 = vmax.xlane.f32.xlu0 %v794_v38  ;;  %v790_v39 = vpop.f32.mrf.mxu1  ;;  %1456 = vmatpush3.bf16.msra.mxu1 %v1520_v37  ;;  %v1521_v38 = vld [vmem:[%s1867_s3] sm:$0xff]  }
 0x239   : > { %1457 = vmatprep.subr.bf16.mxu1 %v1587_v0 }
 0x23a   : > { %v1436_v40 = vpop.f32.mrf.mxu1 }
 0x23c   : > { %v898_v41 = vpop.f32.mrf.mxu1  ;;  %1458 = vmatpush3.bf16.msra.mxu1 %v1521_v38 }
 0x23d   : > { %v904_v42 = vmul.f32 0.35355338, %v898_v41  ;;  %1471 = vmatprep.subr.bf16.mxu1 %v1587_v0 }
 0x23e   : > { %v1447_v43 = vpop.f32.mrf.mxu1 }
 0x23f   : > { %v905_v44 = vsel %vm523_vm2, %v904_v42, -inf }
 0x240   : > { %906 = vmax.xlane.f32.xlu1 %v905_v44  ;;  %v901_v45 = vpop.f32.mrf.mxu1 }
 0x242   : > { %v1448_v46 = vpop.f32.mrf.mxu1 }
 0x2b1   : > { %v573_v47 = vpop.xlane.xlu1 %572 }
 0x2b2   : > { %v574_v48 = vsub.f32 %v570_v24, %v573_v47 }
 0x2b4   : > { %v575_v49 = vmul.f32 1.442695, %v574_v48 }
 0x2b6   : > { %1528 = vpow2.f32 %v575_v49 }
 0x2b9   : > { %v685_v50 = vpop.xlane.xlu0 %684 }
 0x2ba   : > { %v686_v51 = vsub.f32 %v682_v30, %v685_v50 }
 0x2bc   : > { %v687_v52 = vmul.f32 1.442695, %v686_v51 }
 0x2be   : > { %1530 = vpow2.f32 %v687_v52 }
 0x2c1   : > { %v796_v53 = vpop.xlane.xlu0 %795 }
 0x2c2   : > { %v797_v54 = vsub.f32 %v793_v36, %v796_v53 }
 0x2c3   : > { %v1529_v55 = vpop.eup %1528 }
 0x2c4   : > { %v798_v56 = vmul.f32 1.442695, %v797_v54  ;;  %v577_v57 = vsel %vm523_vm2, %v1529_v55, 0.0  ;;  %v1349_v54 = vld [vmem:[%s1868_s4] ss:$0 sm:$0xff] }
 0x2c5   : > { %578 = vadd.xlane.f32.xlu0 %v577_v57 }
 0x2c6   : > { %1532 = vpow2.f32 %v798_v56 }
 0x2c9   : > { %v907_v62 = vpop.xlane.xlu1 %906 }
 0x2ca   : > { %v908_v63 = vsub.f32 %v904_v42, %v907_v62 }
 0x2cb   : > { %v1531_v58 = vpop.eup %1530 }
 0x2cc   : > { %v689_v59 = vsel %vm523_vm2, %v1531_v58, 0.0  ;;  %v909_v1 = vmul.f32 1.442695, %v908_v63 }
 0x2cd   : > { %690 = vadd.xlane.f32.xlu1 %v689_v59 }
 0x2ce   : > { %1534 = vpow2.f32 %v909_v1 }
 0x2d3   : > { %v1533_v60 = vpop.eup %1532 }
 0x2d4   : > { %v800_v61 = vsel %vm523_vm2, %v1533_v60, 0.0 }
 0x2d5   : > { %801 = vadd.xlane.f32.xlu0 %v800_v61 }
 0x2db   : > { %v1535_v2 = vpop.eup %1534 }
 0x2dc   : > { %v911_v4 = vsel %vm523_vm2, %v1535_v2, 0.0 }
 0x2de   : > { %695 = vrot.lane.b32.xlu1 %v1735_v9, %s1596_s20 }
 0x2eb   : > { %583 = vrot.lane.b32.xlu0 %v1735_v9, %s1597_s21 }
 0x2ef   : > { %917 = vrot.lane.b32.xlu0 %v1735_v9, %s1598_s22 }
 0x302   : > { %912 = vadd.xlane.f32.xlu1 %v911_v4 }
 0x313   : > { %806 = vrot.lane.b32.xlu1 %v1735_v9, %s1599_s23 }
 0x34e   : > { %v579_v5 = vpop.xlane.xlu0 %578 }
 0x34f   : > { %1536 = vrcp.f32 %v579_v5  ;;  %v1522_v5 = vld [vmem:[%s1871_s7 + $0x8] sm:$0xff]  }
 0x356   : > { %v691_v6 = vpop.xlane.xlu1 %690 }
 0x357   : > { %1538 = vrcp.f32 %v691_v6  ;;  %v1524_v6 = vld [vmem:[%s1873_s9 + $0x18] sm:$0xff]  }
 0x35a   : > { %v696_v13 = vpop.permute.xlu1 %695 }
 0x35b   : > { %v701_v16 = vsel %vm588_vm3, %v696_v13, 0  ;;  %v1353_v13 = vld [vmem:[%s1869_s5] ss:$0 sm:$0xff] }
 0x35c   : > { %v1537_v7 = vpop.eup %1536 }
 0x35d   : > { %v581_v10 = vmul.f32 %v1537_v7, %v1529_v55  ;;  %v1525_v7 = vld [vmem:[%s1873_s9 + $0x10] sm:$0xff]  }
 0x35e   : > { %v802_v8 = vpop.xlane.xlu0 %801 }
 0x35f   : > { %v582_v14 = vpack.c.bf16 %v581_v10, %v581_v10  ;;  %1540 = vrcp.f32 %v802_v8 }
 0x362   : > { %v584_v11 = vpop.permute.xlu0 %583 }
 0x363   : > { %v590_v12 = vsel %vm588_vm3, %v584_v11, 0 }
 0x364   : > { %1414 = vmatpush3.bf16.msra.mxu0 %v590_v12  ;;  %v1539_v15 = vpop.eup %1538 }
 0x365   : > { %1425 = vmatprep.subr.bf16.mxu0 %v1587_v0  ;;  %v693_v9 = vmul.f32 %v1539_v15, %v1531_v58  ;;  %v1354_v15 = vld [vmem:[%s1870_s6] ss:$0 sm:$0xff] }
 0x366   : > { %v918_v23 = vpop.permute.xlu0 %917 }
 0x367   : > { %1416 = vmatmul.mubr.msk.bf16.vlgmr.msra.gmra.mxu0 %vm523_vm2, %v582_v14  ;;  %v694_v17 = vpack.c.bf16 %v693_v9, %v693_v9  ;;  %v923_v25 = vsel %vm588_vm3, %v918_v23, 0 }
 0x368   : > { %1426 = vmatpush3.bf16.msra.mxu0 %v701_v16  ;;  %1427 = vmatprep.mubr.msk.bf16.mxu0 %vm1588_vm0, %v1587_v0 }
 0x369   : > { %1437 = vmatprep.subr.bf16.mxu0 %v1587_v0 }
 0x36c   : > { %v1541_v18 = vpop.eup %1540 }
 0x36d   : > { %v804_v20 = vmul.f32 %v1541_v18, %v1533_v60  ;;  %v1526_v18 = vld [vmem:[%s1873_s9 + $0x8] sm:$0xff]  }
 0x36f   : > { %1428 = vmatmul.mubr.msk.bf16.vlgmr.msra.gmra.mxu0 %vm523_vm2, %v694_v17  ;;  %v805_v24 = vpack.c.bf16 %v804_v20, %v804_v20  ;;  %v1355_v20 = vld [vmem:[%s1872_s8] ss:$0 sm:$0xff] }
 0x370   : > { %1439 = vmatprep.mubr.msk.bf16.mxu0 %vm1588_vm0, %v1587_v0 }
 0x38b   : > { %v913_v19 = vpop.xlane.xlu1 %912 }
 0x38c   : > { %1542 = vrcp.f32 %v913_v19  ;;  %v1527_v19 = vld [vmem:[%s1873_s9] sm:$0xff]  }
 0x38f   : > { %v807_v21 = vpop.permute.xlu1 %806 }
 0x390   : > { %v812_v22 = vsel %vm588_vm3, %v807_v21, 0 }
 0x391   : > { %1438 = vmatpush3.bf16.msra.mxu0 %v812_v22 }
 0x392   : > { %1449 = vmatprep.subr.bf16.mxu0 %v1587_v0 }
 0x394   : > { %1440 = vmatmul.mubr.msk.bf16.vlgmr.msra.gmra.mxu0 %vm523_vm2, %v805_v24 }
 0x395   : > { %1450 = vmatpush3.bf16.msra.mxu0 %v923_v25  ;;  %1451 = vmatprep.mubr.msk.bf16.mxu0 %vm1588_vm0, %v1587_v0 }
 0x396   : > { %1463 = vmatprep.subr.bf16.mxu0 %v1587_v0 }
 0x399   : > { %v1543_v26 = vpop.eup %1542 }
 0x39a   : > { %v915_v27 = vmul.f32 %v1543_v26, %v1535_v2 }
 0x39c   : > { %v916_v28 = vpack.c.bf16 %v915_v27, %v915_v27 }
 0x39e   : > { %1452 = vmatmul.mubr.msk.bf16.vlgmr.msra.gmra.mxu0 %vm523_vm2, %v916_v28 }
 0x39f   : > { %1467 = vmatprep.mubr.msk.bf16.mxu0 %vm1588_vm0, %v1587_v0  ;;  %1464 = vmatpush3.bf16.msra.mxu0 %v1522_v5 }
 0x3a0   : > { %1465 = vmatprep.subr.bf16.mxu0 %v1587_v0 }
 0x427   : > { %v626_v29 = vpop.f32.mrf.mxu0 }
 0x429   : > { %v1417_v30 = vpop.f32.mrf.mxu0 }
 0x42b   : > { %v629_v31 = vpop.f32.mrf.mxu0 }
 0x42d   : > { %v1418_v32 = vpop.f32.mrf.mxu0 }
 0x42f   : > { %v737_v33 = vpop.f32.mrf.mxu0 }
 0x430   : > { %966 = vrot.lane.b32.xlu1 %v737_v33, %s1600_s24 }
 0x431   : > { %v1429_v34 = vpop.f32.mrf.mxu0 }
 0x433   : > { %v740_v35 = vpop.f32.mrf.mxu0 }
 0x435   : > { %v1430_v36 = vpop.f32.mrf.mxu0 }
 0x454   : > { %v848_v39 = vpop.f32.mrf.mxu0 }
 0x455   : > { %970 = vrot.lane.b32.xlu0 %v848_v39, %s1601_s14  ;;  %s448_s14 = scalar_lea.vmem %s1877_s13, %s1335_s17 }
 0x456   : > { %v1441_v40 = vpop.f32.mrf.mxu0 }
 0x458   : > { %v851_v41 = vpop.f32.mrf.mxu0 }
 0x45a   : > { %v1442_v42 = vpop.f32.mrf.mxu0 }
 0x45e   : > { %v959_v43 = vpop.f32.mrf.mxu0 }
 0x45f   : > { %974 = vrot.lane.b32.xlu1 %v959_v43, %s1602_s15 }
 0x460   : > { %v1453_v44 = vpop.f32.mrf.mxu0 }
 0x461   : > { %v1365_v44 = vld [vmem:[%s1875_s11] ss:$0 sm:$0xff] }
 0x462   : > { %v962_v45 = vpop.f32.mrf.mxu0 }
 0x464   : > { %v1454_v46 = vpop.f32.mrf.mxu0 }
 0x465   : > { %v1366_v46 = vld [vmem:[#allocation2] ss:$0 sm:$0xff] }
 0x4a2   : > { %v967_v47 = vpop.permute.xlu1 %966 }
 0x4a3   : > { %v977_v49 = vsel %vm523_vm2, %v626_v29, %v967_v47 }
 0x4c7   : > { %v971_v48 = vpop.permute.xlu0 %970 }
 0x4c8   : > { %v979_v50 = vsel %vm978_vm4, %v977_v49, %v971_v48 }
 0x4d1   : > { %v975_v51 = vpop.permute.xlu1 %974 }
 0x4d2   : > { %v981_v52 = vsel %vm980_vm5, %v979_v50, %v975_v51 }
 0x4d3   : > { %v982_v53 = vpack.c.bf16 %v981_v52, %v981_v52 }
 0x4d5   : > { %1460 = vmatmul.mubr.msk.bf16.vlgmr.msra.gmra.mxu1 %vm475_vm1, %v982_v53 }
 0x4d6   : > { %1479 = vmatprep.mubr.msk.bf16.mxu1 %vm1588_vm0, %v1587_v0  ;;  %1472 = vmatpush3.bf16.msra.mxu1 %v1524_v6 }
 0x4d7   : > { %1473 = vmatprep.subr.bf16.mxu1 %v1587_v0 }
 0x4da   : > { %1474 = vmatpush3.bf16.msra.mxu1 %v1525_v7 }
 0x4db   : > { %1475 = vmatprep.subr.bf16.mxu1 %v1587_v0 }
 0x4de   : > { %1476 = vmatpush3.bf16.msra.mxu1 %v1526_v18 }
 0x4df   : > { %1477 = vmatprep.subr.bf16.mxu1 %v1587_v0  ;;  %v1359_v0 = vld [vmem:[%s1874_s10] ss:$0 sm:$0xff] }
 0x4e2   : > { %1478 = vmatpush3.bf16.msra.mxu1 %v1527_v19 }
 0x595   : > { %v1043_v55 = vpop.f32.mrf.mxu1 }
 0x596   : > { %v1044_v56 = vadd.f32 %v1349_v54, %v1043_v55 }
 0x597   : > { %v1461_v57 = vpop.f32.mrf.mxu1 }
 0x598   : > { %v1049_v58 = vadd.f32 %v1044_v56, %v1723_v3  ;;  %v1523_v3 = vld [vmem:[%s1871_s7] sm:$0xff]  }
 0x599   : > { %v1046_v59 = vpop.f32.mrf.mxu1  ;;  %1466 = vmatpush3.bf16.msra.mxu0 %v1523_v3 }
 0x59a   : > { %v1052_v60 = vsel %vm475_vm1, %v1049_v58, 0.0 }
 0x59b   : > { %1053 = vadd.xlane.f32.xlu0 %v1052_v60  ;;  %v1462_v61 = vpop.f32.mrf.mxu1 }
 0x624   : > { %v1054_v62 = vpop.xlane.xlu0 %1053 }
 0x625   : > { %v1056_v63 = vmul.f32 0.03125, %v1054_v62 }
 0x627   : > { %v1057_v1 = vsub.f32 %v1049_v58, %v1056_v63 }
 0x629   : > { %v1058_v2 = vmul.f32 %v1057_v1, %v1057_v1 }
 0x62b   : > { %v1059_v4 = vsel %vm475_vm1, %v1058_v2, 0.0 }
 0x62c   : > { %1060 = vadd.xlane.f32.xlu1 %v1059_v4 }
 0x6b5   : > { %v1061_v8 = vpop.xlane.xlu1 %1060 }
 0x6b6   : > { %v1062_v10 = vmul.f32 0.03125, %v1061_v8 }
 0x6b8   : > { %v1063_v11 = vadd.f32 1e-05, %v1062_v10 }
 0x6ba   : > { %1544 = vrsqrt.f32 %v1063_v11 }
 0x6c7   : > { %v1545_v12 = vpop.eup %1544 }
 0x6c8   : > { %v1065_v14 = vmul.f32 %v1545_v12, %v1057_v1 }
 0x6ca   : > { %v1072_v16 = vmul.f32 %v1353_v13, %v1065_v14 }
 0x6cc   : > { %v1079_v9 = vadd.f32 %v1354_v15, %v1072_v16 }
 0x6ce   : > { %v1080_v17 = vpack.c.bf16 %v1079_v9, %v1079_v9 }
 0x6d0   : > { %1468 = vmatmul.mubr.msk.bf16.vlgmr.msra.gmra.mxu0 %vm475_vm1, %v1080_v17 }
 0x790   : > { %v1141_v21 = vpop.f32.mrf.mxu0 }
 0x791   : > { %v1142_v22 = vadd.f32 %v1355_v20, %v1141_v21 }
 0x792   : > { %v1469_v23 = vpop.f32.mrf.mxu0 }
 0x793   : > { %v1147_v24 = vmax.f32 %v1142_v22, 0.0 }
 0x794   : > { %v1144_v25 = vpop.f32.mrf.mxu0 }
 0x795   : > { %v1148_v26 = vpack.c.bf16 %v1147_v24, %v1147_v24 }
 0x796   : > { %v1470_v27 = vpop.f32.mrf.mxu0 }
 0x797   : > { %1480 = vmatmul.mubr.msk.bf16.vlgmr.msra.gmra.mxu1 %vm1188_vm6, %v1148_v26 }
 0x857   : > { %v1226_v28 = vpop.f32.mrf.mxu1 }
 0x858   : > { %v1227_v29 = vadd.f32 %v1359_v0, %v1226_v28 }
 0x859   : > { %v1481_v30 = vpop.f32.mrf.mxu1 }
 0x85a   : > { %v1232_v31 = vadd.f32 %v1227_v29, %v1079_v9 }
 0x85b   : > { %v1229_v32 = vpop.f32.mrf.mxu1 }
 0x85c   : > { %v1235_v33 = vsel %vm475_vm1, %v1232_v31, 0.0 }
 0x85d   : > { %1236 = vadd.xlane.f32.xlu0 %v1235_v33  ;;  %v1482_v34 = vpop.f32.mrf.mxu1 }
 0x8e6   : > { %v1237_v35 = vpop.xlane.xlu0 %1236 }
 0x8e7   : > { %v1238_v36 = vmul.f32 0.03125, %v1237_v35 }
 0x8e9   : > { %v1239_v37 = vsub.f32 %v1232_v31, %v1238_v36 }
 0x8eb   : > { %v1240_v38 = vmul.f32 %v1239_v37, %v1239_v37 }
 0x8ed   : > { %v1241_v39 = vsel %vm475_vm1, %v1240_v38, 0.0 }
 0x8ee   : > { %1242 = vadd.xlane.f32.xlu0 %v1241_v39 }
 0x977   : > { %v1243_v40 = vpop.xlane.xlu0 %1242 }
 0x978   : > { %v1244_v41 = vmul.f32 0.03125, %v1243_v40 }
 0x97a   : > { %v1245_v42 = vadd.f32 1e-05, %v1244_v41 }
 0x97c   : > { %1546 = vrsqrt.f32 %v1245_v42 }
 0x989   : > { %v1547_v43 = vpop.eup %1546 }
 0x98a   : > { %v1247_v45 = vmul.f32 %v1547_v43, %v1239_v37 }
 0x98c   : > { %v1254_v47 = vmul.f32 %v1365_v44, %v1247_v45 }
 0x98e   : > { %v1261_v48 = vadd.f32 %v1366_v46, %v1254_v47 }
 0x990   : > { %1262 = vst.msk [vmem:[%s448_s14] sm:$0xff] %vm475_vm1, %v1261_v48 }
 0x991 PF: > { %s24_s25 = sadd.s32 1, %s1584_s25  }
 0x992   : > { %p21_p1 = scmp.ge.s32.totalorder %s24_s25, 4  }
 0x994   :  { %23 = sbr.rel (!%p21_p1) target bundleno = 1 (0x1), region = 107 }
 0x999   :  { %1282 = vsyncpa [#allocation3], 1 }
 0x99a   :  { %1284 = vsyncpa [#allocation3 + $0x1], 1 }

// kernel: transformer_forward.7
= control target key start
LH: loop header
LB: loop body
LE: loop exit
PB: predicated region body
PF: predicated region fallthrough
CT: control target
= control target key end

     0   :  { %s3070_s0 = inlined_call_operand.vmem [shape: f32[2,8,32], index: 0, kind: input, shape index: {}]   ;;  %s3071_s1 = inlined_call_operand.vmem [shape: f32[2,8,32], index: 1, kind: input, shape index: {}]   ;;  %s3072_s2 = inlined_call_operand.vmem [shape: bf16[32,96], index: 2, kind: input, shape index: {}]   ;;  %s3073_s3 = inlined_call_operand.vmem [shape: f32[1,96], index: 3, kind: input, shape index: {}]   ;;  %s3074_s4 = inlined_call_operand.vmem [shape: bf16[32,32], index: 4, kind: input, shape index: {}]   ;;  %s3075_s5 = inlined_call_operand.vmem [shape: f32[1,32], index: 5, kind: input, shape index: {}]   ;;  %s3076_s6 = inlined_call_operand.vmem [shape: f32[1,32], index: 6, kind: input, shape index: {}]   ;;  %s3077_s7 = inlined_call_operand.vmem [shape: f32[1,32], index: 7, kind: input, shape index: {}]   ;;  %s3078_s8 = inlined_call_operand.vmem [shape: bf16[32,32], index: 8, kind: input, shape index: {}]   ;;  %s3079_s9 = inlined_call_operand.vmem [shape: f32[1,32], index: 9, kind: input, shape index: {}]   ;;  %s3080_s10 = inlined_call_operand.vmem [shape: bf16[32,64], index: 10, kind: input, shape index: {}]   ;;  %s3081_s11 = inlined_call_operand.vmem [shape: f32[1,64], index: 11, kind: input, shape index: {}]   ;;  %s3082_s12 = inlined_call_operand.vmem [shape: bf16[32,32], index: 12, kind: input, shape index: {}]   ;;  %s3083_s13 = inlined_call_operand.vmem [shape: f32[1,32], index: 13, kind: input, shape index: {}]   ;;  %s3084_s14 = inlined_call_operand.vmem [shape: f32[1,32], index: 14, kind: input, shape index: {}]   ;;  %s3085_s15 = inlined_call_operand.vmem [shape: f32[1,32], index: 15, kind: input, shape index: {}]   ;;  %s3086_s16 = inlined_call_operand.vmem [shape: bf16[32,64], index: 16, kind: input, shape index: {}]   ;;  %s3087_s17 = inlined_call_operand.vmem [shape: f32[1,64], index: 17, kind: input, shape index: {}]   ;;  %s3088_s18 = inlined_call_operand.vmem [shape: bf16[64,32], index: 18, kind: input, shape index: {}]   ;;  %s3089_s19 = inlined_call_operand.vmem [shape: f32[1,32], index: 19, kind: input, shape index: {}]   ;;  %s3090_s20 = inlined_call_operand.vmem [shape: f32[1,32], index: 20, kind: input, shape index: {}]   ;;  %s3091_s21 = inlined_call_operand.vmem [shape: f32[1,32], index: 21, kind: input, shape index: {}]   ;;  %s3092_s22 = inlined_call_operand.vmem [shape: f32[2,8,32], index: 22, kind: output, shape index: {}]  }
   0x1   :  { %3102 = sst [smem:[#allocation2_spill]] %s3070_s0 }
   0x2   :  { %3103 = sst [smem:[#allocation3_spill]] %s3071_s1 }
   0x3   :  { %3104 = sst [smem:[#allocation4_spill]] %s3072_s2 }
   0x4   :  { %3105 = sst [smem:[#allocation5_spill]] %s3073_s3  ;;  %s2756_s3 = smov 0  }
   0x5   :  { %3106 = sst [smem:[#allocation6_spill]] %s3074_s4 }
   0x6   :  { %3107 = sst [smem:[#allocation7_spill]] %s3075_s5 }
   0x7   :  { %3108 = sst [smem:[#allocation8_spill]] %s3076_s6 }
   0x8 LB: > { %s2266_s28 = sadd.s32 4294967295, %s2623_s3   ;;  %p2270_p0 = scmp.ge.s32.totalorder %s2623_s3, 1  ;;  %s2623_s3 = sphi %s2756_s3, %s32_s3  }
   0x9   : > { %p620_p1 = scmp.lt.s32.totalorder %s2623_s3, 3 }
   0xb   : > { %p621_p2 = pnand %p2270_p0, %p620_p1 }
   0xc   : > { %s3109_s4 = sld [smem:[#allocation4_spill]] (!%p621_p2)  ;;  %p684_p3 = scmp.lt.s32.totalorder (!%p621_p2), %s2266_s28, 1 }
   0xd   : > { %624 = sbr.rel (%p621_p2) target bundleno = 4101 (0x1005), region = 108  ;;  %s3110_s6 = sld [smem:[#allocation2_spill]] (!%p621_p2) }
   0xe   : > { %s3111_s27 = sld [smem:[#allocation5_spill]] (!%p621_p2)  ;;  %s3101_s29 = smov (!%p621_p2), 96  }
   0xf   : > { %s3100_s30 = smov (!%p621_p2), 80   ;;  %s3095_s0 = smov (!%p621_p2), 88  }
  0x10   : > { %s3096_s23 = smov (!%p621_p2), 72   ;;  %s2632_s5 = smov (!%p621_p2), 112  }
  0x11   : > { %s2633_s24 = smov (!%p621_p2), 104   ;;  %s2636_s26 = smov (!%p621_p2), 40  }
  0x12   : > { %v2563_v0 = vld [vmem:[%s3109_s4 + $0x8] sm:$0xff]   ;;  %v2625_v1 = vmov 0.0   ;;  %v2564_v2 = vld [vmem:[%s3109_s4] sm:$0xff]   ;;  %vm2626_vm0 = vmmov 0   ;;  %s3124_s28 = smov (!%p684_p3, %s2266_s28), 1  ;;  %vm723_vm1 = vcmask 261120  }
  0x13   : > { %2383 = vmatprep.subr.bf16.mxu1 %v2625_v1  ;;  %2397 = vmatprep.subr.bf16.mxu0 %v2625_v1  ;;  %s2777_s1 = sshll.u32 %s3124_s28, 3  ;;  %s2627_s28 = smov 120   ;;  %vm771_vm2 = vcmask 64512   ;;  %vm836_vm3 = vcmask 1043456   ;;  %vm1226_vm4 = vcmask 130048   ;;  %vm1228_vm5 = vcmask 195584  }
  0x14   : > { %2384 = vmatpush3.bf16.msra.mxu1 %v2563_v0  ;;  %2387 = vmatprep.mubr.msk.bf16.mxu1 %vm2626_vm0, %v2625_v1  ;;  %s687_s25 = scalar_lea.vmem %s3110_s6, %s2777_s1  ;;  %v2274_v5 = vld [vmem:[%s3111_s27] ss:$0 sm:$0xff]  ;;  %s2634_s6 = smov 56   ;;  %vm2126_vm6 = vcmask 523264  }
  0x15   : > { %2385 = vmatprep.subr.bf16.mxu1 %v2625_v1  ;;  %2399 = vmatprep.mubr.msk.bf16.mxu0 %vm2626_vm0, %v2625_v1  ;;  %v2784_v3 = vld [vmem:[%s687_s25] sm:$0xff]  ;;  %s2635_s25 = smov 64   ;;  %s2637_s2 = smov 48  }
  0x16   : > { %v699_v4 = vpack.c.bf16 %v2784_v3, %v2784_v3  ;;  %s3099_s27 = smov 8  }
  0x18   : > { %2386 = vmatpush3.bf16.msra.mxu1 %v2564_v2 }
  0x19   : > { %2391 = vmatprep.subr.bf16.mxu1 %v2625_v1 }
  0x1b   : > { %2388 = vmatmul.mubr.msk.bf16.vlgmr.msra.gmra.mxu1 %vm723_vm1, %v699_v4 }
  0x1c   : > { %2393 = vmatprep.mubr.msk.bf16.mxu1 %vm2626_vm0, %v2625_v1 }
  0xdb   : > { %v761_v6 = vpop.f32.mrf.mxu1 }
  0xdc   : > { %v762_v7 = vadd.f32 %v2274_v5, %v761_v6 }
  0xdd   : > { %v2389_v8 = vpop.f32.mrf.mxu1 }
  0xde   : > { %v2794_v9 = vpack.c.bf16 %v762_v7, %v762_v7 }
  0xdf   : > { %v764_v10 = vpop.f32.mrf.mxu1 }
  0xe0   : > { %880 = vrot.lane.b32.xlu1 %v2794_v9, %s2627_s28  ;;  %769 = vrot.lane.b32.xlu0 %v2794_v9, %s3101_s29 }
  0xe1   : > { %v2390_v11 = vpop.f32.mrf.mxu1 }
  0xe4   : > { %993 = vrot.lane.b32.xlu1 %v2794_v9, %s3100_s30  ;;  %882 = vrot.lane.b32.xlu0 %v2794_v9, %s3095_s0  ;;  %s3114_s30 = sld [smem:[#allocation3_spill]]  ;;  %s3120_s0 = smov 8  }
  0xe8   : > { %1104 = vrot.lane.b32.xlu1 %v2794_v9, %s3096_s23  ;;  %991 = vrot.lane.b32.xlu0 %v2794_v9, %s2632_s5  ;;  %s3098_s23 = smov 16  }
  0xea   : > { %s691_s29 = scalar_lea.vmem %s3114_s30, %s2777_s1  ;;  %s3119_s30 = smov 88  }
  0xec   : > { %1102 = vrot.lane.b32.xlu0 %v2794_v9, %s2633_s24 }
 0x152   : > { %v770_v12 = vpop.permute.xlu0 %769  ;;  %v881_v15 = vpop.permute.xlu1 %880 }
 0x153   : > { %v776_v13 = vsel %vm771_vm2, %v770_v12, 0 }
 0x154   : > { %2392 = vmatpush3.bf16.xpose.msra.mxu1 %v776_v13 }
 0x155   : > { %2403 = vmatprep.subr.bf16.mxu1 %v2625_v1 }
 0x156   : > { %v883_v14 = vpop.permute.xlu0 %882  ;;  %v994_v17 = vpop.permute.xlu1 %993 }
 0x157   : > { %v888_v16 = vsel %vm771_vm2, %v883_v14, 0  ;;  %v999_v18 = vsel %vm771_vm2, %v994_v17, 0 }
 0x15a   : > { %v1105_v19 = vpop.permute.xlu1 %1104  ;;  %v992_v20 = vpop.permute.xlu0 %991 }
 0x15b   : > { %2394 = vmatmul.mubr.msk.bf16.vlgmr.msra.gmra.mxu1 %vm771_vm2, %v2794_v9  ;;  %v1110_v21 = vsel %vm771_vm2, %v1105_v19, 0 }
 0x15c   : > { %2404 = vmatpush3.bf16.xpose.msra.mxu1 %v888_v16  ;;  %2405 = vmatprep.mubr.msk.bf16.mxu1 %vm2626_vm0, %v2625_v1 }
 0x15d   : > { %2415 = vmatprep.subr.bf16.mxu1 %v2625_v1 }
 0x15e   : > { %v1103_v22 = vpop.permute.xlu0 %1102 }
 0x163   : > { %2406 = vmatmul.mubr.msk.bf16.vlgmr.msra.gmra.mxu1 %vm771_vm2, %v881_v15 }
 0x164   : > { %2416 = vmatpush3.bf16.xpose.msra.mxu1 %v999_v18  ;;  %2417 = vmatprep.mubr.msk.bf16.mxu1 %vm2626_vm0, %v2625_v1 }
 0x165   : > { %2427 = vmatprep.subr.bf16.mxu1 %v2625_v1 }
 0x16b   : > { %2418 = vmatmul.mubr.msk.bf16.vlgmr.msra.gmra.mxu1 %vm771_vm2, %v992_v20 }
 0x16c   : > { %2428 = vmatpush3.bf16.xpose.msra.mxu1 %v1110_v21  ;;  %2429 = vmatprep.mubr.msk.bf16.mxu1 %vm2626_vm0, %v2625_v1 }
 0x16d   : > { %2439 = vmatprep.subr.bf16.mxu1 %v2625_v1 }
 0x173   : > { %2430 = vmatmul.mubr.msk.bf16.vlgmr.msra.gmra.mxu1 %vm771_vm2, %v1103_v22 }
 0x174   : > { %2443 = vmatprep.mubr.msk.bf16.mxu1 %vm2626_vm0, %v2625_v1 }
 0x21b   : > { %v812_v23 = vpop.f32.mrf.mxu1 }
 0x21c   : > { %v818_v24 = vmul.f32 0.35355338, %v812_v23 }
 0x21d   : > { %v2395_v25 = vpop.f32.mrf.mxu1 }
 0x21e   : > { %v819_v26 = vsel %vm771_vm2, %v818_v24, -inf }
 0x21f   : > { %820 = vmax.xlane.f32.xlu1 %v819_v26  ;;  %v815_v27 = vpop.f32.mrf.mxu1 }
 0x221   : > { %v2396_v28 = vpop.f32.mrf.mxu1 }
 0x223   : > { %v924_v29 = vpop.f32.mrf.mxu1 }
 0x224   : > { %v930_v30 = vmul.f32 0.35355338, %v924_v29 }
 0x225   : > { %v2407_v31 = vpop.f32.mrf.mxu1 }
 0x226   : > { %v931_v32 = vsel %vm771_vm2, %v930_v30, -inf }
 0x227   : > { %932 = vmax.xlane.f32.xlu0 %v931_v32  ;;  %v927_v33 = vpop.f32.mrf.mxu1 }
 0x229   : > { %v2408_v34 = vpop.f32.mrf.mxu1 }
 0x22b   : > { %v1035_v35 = vpop.f32.mrf.mxu1 }
 0x22c   : > { %v1041_v36 = vmul.f32 0.35355338, %v1035_v35 }
 0x22d   : > { %v2419_v37 = vpop.f32.mrf.mxu1 }
 0x22e   : > { %v1042_v38 = vsel %vm771_vm2, %v1041_v36, -inf }
 0x22f   : > { %1043 = vmax.xlane.f32.xlu0 %v1042_v38  ;;  %v1038_v39 = vpop.f32.mrf.mxu1 }
 0x231   : > { %v2420_v40 = vpop.f32.mrf.mxu1 }
 0x233   : > { %v1146_v41 = vpop.f32.mrf.mxu1 }
 0x234   : > { %v1152_v42 = vmul.f32 0.35355338, %v1146_v41 }
 0x235   : > { %v2431_v43 = vpop.f32.mrf.mxu1 }
 0x236   : > { %v1153_v44 = vsel %vm771_vm2, %v1152_v42, -inf }
 0x237   : > { %1154 = vmax.xlane.f32.xlu1 %v1153_v44  ;;  %v1149_v45 = vpop.f32.mrf.mxu1 }
 0x239   : > { %v2432_v46 = vpop.f32.mrf.mxu1 }
 0x2a8   : > { %v821_v47 = vpop.xlane.xlu1 %820 }
 0x2a9   : > { %v822_v48 = vsub.f32 %v818_v24, %v821_v47 }
 0x2ab   : > { %v823_v49 = vmul.f32 1.442695, %v822_v48 }
 0x2ad   : > { %2579 = vpow2.f32 %v823_v49 }
 0x2b0   : > { %v933_v50 = vpop.xlane.xlu0 %932 }
 0x2b1   : > { %v934_v51 = vsub.f32 %v930_v30, %v933_v50 }
 0x2b3   : > { %v935_v52 = vmul.f32 1.442695, %v934_v51 }
 0x2b5   : > { %2581 = vpow2.f32 %v935_v52 }
 0x2b8   : > { %v1044_v53 = vpop.xlane.xlu0 %1043 }
 0x2b9   : > { %v1045_v54 = vsub.f32 %v1041_v36, %v1044_v53 }
 0x2ba   : > { %v2580_v55 = vpop.eup %2579 }
 0x2bb   : > { %v1046_v56 = vmul.f32 1.442695, %v1045_v54  ;;  %v825_v57 = vsel %vm771_vm2, %v2580_v55, 0.0 }
 0x2bc   : > { %826 = vadd.xlane.f32.xlu0 %v825_v57 }
 0x2bd   : > { %2583 = vpow2.f32 %v1046_v56 }
 0x2c0   : > { %v1155_v62 = vpop.xlane.xlu1 %1154 }
 0x2c1   : > { %v1156_v63 = vsub.f32 %v1152_v42, %v1155_v62 }
 0x2c2   : > { %v2582_v58 = vpop.eup %2581 }
 0x2c3   : > { %v937_v59 = vsel %vm771_vm2, %v2582_v58, 0.0  ;;  %v1157_v0 = vmul.f32 1.442695, %v1156_v63 }
 0x2c4   : > { %938 = vadd.xlane.f32.xlu1 %v937_v59 }
 0x2c5   : > { %2585 = vpow2.f32 %v1157_v0 }
 0x2ca   : > { %v2584_v60 = vpop.eup %2583 }
 0x2cb   : > { %v1048_v61 = vsel %vm771_vm2, %v2584_v60, 0.0 }
 0x2cc   : > { %1049 = vadd.xlane.f32.xlu0 %v1048_v61 }
 0x2d2   : > { %v2586_v2 = vpop.eup %2585 }
 0x2d3   : > { %v1159_v4 = vsel %vm771_vm2, %v2586_v2, 0.0 }
 0x2d5   : > { %943 = vrot.lane.b32.xlu1 %v2794_v9, %s2634_s6  ;;  %s3097_s6 = smov 24  }
 0x2e2   : > { %831 = vrot.lane.b32.xlu0 %v2794_v9, %s2635_s25 }
 0x2e6   : > { %1165 = vrot.lane.b32.xlu0 %v2794_v9, %s2636_s26  ;;  %s3112_s26 = sld [smem:[#allocation6_spill]] }
 0x2ec   : > { %v2565_v37 = vld [vmem:[%s3112_s26 + $0x8] sm:$0xff]   ;;  %v2566_v38 = vld [vmem:[%s3112_s26] sm:$0xff]  }
 0x2ed   : > { %2440 = vmatpush3.bf16.msra.mxu1 %v2565_v37 }
 0x2ee   : > { %2441 = vmatprep.subr.bf16.mxu1 %v2625_v1 }
 0x2f1   : > { %2442 = vmatpush3.bf16.msra.mxu1 %v2566_v38 }
 0x2f2   : > { %2455 = vmatprep.subr.bf16.mxu1 %v2625_v1 }
 0x2f9   : > { %1160 = vadd.xlane.f32.xlu1 %v1159_v4 }
 0x30a   : > { %1054 = vrot.lane.b32.xlu1 %v2794_v9, %s2637_s2  ;;  %s3113_s2 = sld [smem:[#allocation7_spill]] }
 0x310   : > { %v2286_v54 = vld [vmem:[%s3113_s2] ss:$0 sm:$0xff]  ;;  %s3121_s2 = smov 16  }
 0x345   : > { %v827_v5 = vpop.xlane.xlu0 %826 }
 0x346   : > { %2587 = vrcp.f32 %v827_v5  ;;  %v2567_v5 = vld [vmem:[%s3080_s10 + $0x8] sm:$0xff]  }
 0x34d   : > { %v939_v6 = vpop.xlane.xlu1 %938 }
 0x34e   : > { %2589 = vrcp.f32 %v939_v6  ;;  %v698_v6 = vld [vmem:[%s691_s29] sm:$0xff]  ;;  %s3122_s29 = smov 24  }
 0x351   : > { %v944_v13 = vpop.permute.xlu1 %943 }
 0x352   : > { %v949_v16 = vsel %vm836_vm3, %v944_v13, 0 }
 0x353   : > { %v2588_v7 = vpop.eup %2587 }
 0x354   : > { %v829_v10 = vmul.f32 %v2588_v7, %v2580_v55  ;;  %v1395_v7 = vpack.c.bf16 %v698_v6, %v698_v6 }
 0x355   : > { %v1050_v8 = vpop.xlane.xlu0 %1049 }
 0x356   : > { %v830_v14 = vpack.c.bf16 %v829_v10, %v829_v10  ;;  %2591 = vrcp.f32 %v1050_v8  ;;  %v2569_v8 = vld [vmem:[%s3078_s8 + $0x8] sm:$0xff]   ;;  %v2570_v10 = vld [vmem:[%s3078_s8] sm:$0xff]  }
 0x359   : > { %v832_v11 = vpop.permute.xlu0 %831 }
 0x35a   : > { %v838_v12 = vsel %vm836_vm3, %v832_v11, 0 }
 0x35b   : > { %2398 = vmatpush3.bf16.msra.mxu0 %v838_v12  ;;  %v2590_v15 = vpop.eup %2589 }
 0x35c   : > { %2409 = vmatprep.subr.bf16.mxu0 %v2625_v1  ;;  %v941_v9 = vmul.f32 %v2590_v15, %v2582_v58 }
 0x35d   : > { %v1166_v23 = vpop.permute.xlu0 %1165 }
 0x35e   : > { %2400 = vmatmul.mubr.msk.bf16.vlgmr.msra.gmra.mxu0 %vm771_vm2, %v830_v14  ;;  %v942_v17 = vpack.c.bf16 %v941_v9, %v941_v9  ;;  %v1171_v25 = vsel %vm836_vm3, %v1166_v23, 0  ;;  %v2291_v9 = vld [vmem:[%s3077_s7] ss:$0 sm:$0xff] }
 0x35f   : > { %2410 = vmatpush3.bf16.msra.mxu0 %v949_v16  ;;  %2411 = vmatprep.mubr.msk.bf16.mxu0 %vm2626_vm0, %v2625_v1 }
 0x360   : > { %2421 = vmatprep.subr.bf16.mxu0 %v2625_v1 }
 0x363   : > { %v2592_v18 = vpop.eup %2591 }
 0x364   : > { %v1052_v20 = vmul.f32 %v2592_v18, %v2584_v60 }
 0x366   : > { %2412 = vmatmul.mubr.msk.bf16.vlgmr.msra.gmra.mxu0 %vm771_vm2, %v942_v17  ;;  %v1053_v24 = vpack.c.bf16 %v1052_v20, %v1052_v20  ;;  %v2296_v20 = vld [vmem:[%s3081_s11] ss:$0 sm:$0xff] }
 0x367   : > { %2423 = vmatprep.mubr.msk.bf16.mxu0 %vm2626_vm0, %v2625_v1 }
 0x382   : > { %v1161_v19 = vpop.xlane.xlu1 %1160 }
 0x383   : > { %2593 = vrcp.f32 %v1161_v19 }
 0x386   : > { %v1055_v21 = vpop.permute.xlu1 %1054 }
 0x387   : > { %v1060_v22 = vsel %vm836_vm3, %v1055_v21, 0 }
 0x388   : > { %2422 = vmatpush3.bf16.msra.mxu0 %v1060_v22 }
 0x389   : > { %2433 = vmatprep.subr.bf16.mxu0 %v2625_v1 }
 0x38b   : > { %2424 = vmatmul.mubr.msk.bf16.vlgmr.msra.gmra.mxu0 %vm771_vm2, %v1053_v24 }
 0x38c   : > { %2434 = vmatpush3.bf16.msra.mxu0 %v1171_v25  ;;  %2435 = vmatprep.mubr.msk.bf16.mxu0 %vm2626_vm0, %v2625_v1 }
 0x38d   : > { %2447 = vmatprep.subr.bf16.mxu0 %v2625_v1 }
 0x390   : > { %v2594_v26 = vpop.eup %2593 }
 0x391   : > { %v1163_v27 = vmul.f32 %v2594_v26, %v2586_v2 }
 0x393   : > { %v1164_v28 = vpack.c.bf16 %v1163_v27, %v1163_v27 }
 0x395   : > { %2436 = vmatmul.mubr.msk.bf16.vlgmr.msra.gmra.mxu0 %vm771_vm2, %v1164_v28  ;;  %v2292_v28 = vld [vmem:[%s3079_s9] ss:$0 sm:$0xff] }
 0x396   : > { %2451 = vmatprep.mubr.msk.bf16.mxu0 %vm2626_vm0, %v2625_v1  ;;  %2448 = vmatpush3.bf16.msra.mxu0 %v2569_v8 }
 0x397   : > { %2449 = vmatprep.subr.bf16.mxu0 %v2625_v1 }
 0x39a   : > { %2450 = vmatpush3.bf16.msra.mxu0 %v2570_v10 }
 0x39b   : > { %2463 = vmatprep.subr.bf16.mxu0 %v2625_v1 }
 0x41e   : > { %v874_v29 = vpop.f32.mrf.mxu0 }
 0x420   : > { %v2401_v30 = vpop.f32.mrf.mxu0 }
 0x422   : > { %v877_v31 = vpop.f32.mrf.mxu0 }
 0x424   : > { %v2402_v32 = vpop.f32.mrf.mxu0 }
 0x426   : > { %v985_v33 = vpop.f32.mrf.mxu0 }
 0x427   : > { %1214 = vrot.lane.b32.xlu1 %v985_v33, %s3099_s27 }
 0x428   : > { %v2413_v34 = vpop.f32.mrf.mxu0 }
 0x42a   : > { %v988_v35 = vpop.f32.mrf.mxu0 }
 0x42c   : > { %v2414_v36 = vpop.f32.mrf.mxu0 }
 0x44b   : > { %v1096_v39 = vpop.f32.mrf.mxu0 }
 0x44c   : > { %1218 = vrot.lane.b32.xlu0 %v1096_v39, %s3098_s23  ;;  %s3115_s23 = sld [smem:[#allocation8_spill]] }
 0x44d   : > { %v2425_v40 = vpop.f32.mrf.mxu0 }
 0x44f   : > { %v1099_v41 = vpop.f32.mrf.mxu0 }
 0x451   : > { %v2426_v42 = vpop.f32.mrf.mxu0 }
 0x452   : > { %v2290_v15 = vld [vmem:[%s3115_s23] ss:$0 sm:$0xff] }
 0x455   : > { %v1207_v43 = vpop.f32.mrf.mxu0 }
 0x456   : > { %1222 = vrot.lane.b32.xlu1 %v1207_v43, %s3097_s6 }
 0x457   : > { %v2437_v44 = vpop.f32.mrf.mxu0 }
 0x459   : > { %v1210_v45 = vpop.f32.mrf.mxu0 }
 0x45b   : > { %v2438_v46 = vpop.f32.mrf.mxu0 }
 0x499   : > { %v1215_v47 = vpop.permute.xlu1 %1214 }
 0x49a   : > { %v1225_v49 = vsel %vm771_vm2, %v874_v29, %v1215_v47 }
 0x4be   : > { %v1219_v48 = vpop.permute.xlu0 %1218 }
 0x4bf   : > { %v1227_v50 = vsel %vm1226_vm4, %v1225_v49, %v1219_v48 }
 0x4c8   : > { %v1223_v51 = vpop.permute.xlu1 %1222 }
 0x4c9   : > { %v1229_v52 = vsel %vm1228_vm5, %v1227_v50, %v1223_v51 }
 0x4ca   : > { %v1230_v53 = vpack.c.bf16 %v1229_v52, %v1229_v52 }
 0x4cc   : > { %2444 = vmatmul.mubr.msk.bf16.vlgmr.msra.gmra.mxu1 %vm723_vm1, %v1230_v53 }
 0x4cd   : > { %2459 = vmatprep.mubr.msk.bf16.mxu1 %vm2626_vm0, %v2625_v1  ;;  %2456 = vmatpush3.bf16.msra.mxu1 %v2567_v5 }
 0x4ce   : > { %2457 = vmatprep.subr.bf16.mxu1 %v2625_v1 }
 0x58c   : > { %v1291_v55 = vpop.f32.mrf.mxu1 }
 0x58d   : > { %v1292_v56 = vadd.f32 %v2286_v54, %v1291_v55 }
 0x58e   : > { %v2445_v57 = vpop.f32.mrf.mxu1 }
 0x58f   : > { %v1297_v58 = vadd.f32 %v1292_v56, %v2784_v3  ;;  %v2568_v3 = vld [vmem:[%s3080_s10] sm:$0xff]  }
 0x590   : > { %v1294_v59 = vpop.f32.mrf.mxu1  ;;  %2458 = vmatpush3.bf16.msra.mxu1 %v2568_v3 }
 0x591   : > { %v1300_v60 = vsel %vm723_vm1, %v1297_v58, 0.0  ;;  %2469 = vmatprep.subr.bf16.mxu1 %v2625_v1 }
 0x592   : > { %1301 = vadd.xlane.f32.xlu0 %v1300_v60  ;;  %v2446_v61 = vpop.f32.mrf.mxu1 }
 0x593   : > { %2460 = vmatmul.mubr.msk.bf16.vlgmr.msra.gmra.mxu1 %vm723_vm1, %v1395_v7 }
 0x594   : > { %2471 = vmatprep.mubr.msk.bf16.mxu1 %vm2626_vm0, %v2625_v1 }
 0x61b   : > { %v1302_v62 = vpop.xlane.xlu0 %1301 }
 0x61c   : > { %v1304_v63 = vmul.f32 0.03125, %v1302_v62 }
 0x61e   : > { %v1305_v0 = vsub.f32 %v1297_v58, %v1304_v63 }
 0x620   : > { %v1306_v2 = vmul.f32 %v1305_v0, %v1305_v0 }
 0x622   : > { %v1307_v4 = vsel %vm723_vm1, %v1306_v2, 0.0 }
 0x623   : > { %1308 = vadd.xlane.f32.xlu1 %v1307_v4 }
 0x653   : > { %v1456_v21 = vpop.f32.mrf.mxu1 }
 0x654   : > { %v1457_v22 = vadd.f32 %v2296_v20, %v1456_v21 }
 0x655   : > { %v2461_v23 = vpop.f32.mrf.mxu1 }
 0x656   : > { %v2925_v24 = vpack.c.bf16 %v1457_v22, %v1457_v22 }
 0x657   : > { %v1459_v25 = vpop.f32.mrf.mxu1 }
 0x658   : > { %1575 = vrot.lane.b32.xlu0 %v2925_v24, %s2627_s28  ;;  %v1468_v26 = vsel %vm771_vm2, %v2925_v24, 0 }
 0x659   : > { %v2462_v27 = vpop.f32.mrf.mxu1 }
 0x65c   : > { %1686 = vrot.lane.b32.xlu0 %v2925_v24, %s2632_s5 }
 0x660   : > { %1797 = vrot.lane.b32.xlu0 %v2925_v24, %s2633_s24 }
 0x6ac   : > { %v1309_v11 = vpop.xlane.xlu1 %1308 }
 0x6ad   : > { %v1310_v12 = vmul.f32 0.03125, %v1309_v11 }
 0x6af   : > { %v1311_v13 = vadd.f32 1e-05, %v1310_v12 }
 0x6b1   : > { %2595 = vrsqrt.f32 %v1311_v13 }
 0x6be   : > { %v2596_v14 = vpop.eup %2595 }
 0x6bf   : > { %v1313_v16 = vmul.f32 %v2596_v14, %v1305_v0 }
 0x6c1   : > { %v1320_v17 = vmul.f32 %v2290_v15, %v1313_v16 }
 0x6c3   : > { %v2915_v18 = vadd.f32 %v2291_v9, %v1320_v17 }
 0x6c5   : > { %v1328_v19 = vpack.c.bf16 %v2915_v18, %v2915_v18 }
 0x6c7   : > { %2452 = vmatmul.mubr.msk.bf16.vlgmr.msra.gmra.mxu0 %vm723_vm1, %v1328_v19 }
 0x6c8   : > { %2465 = vmatprep.mubr.msk.bf16.mxu0 %vm2626_vm0, %v2625_v1  ;;  %2464 = vmatpush3.bf16.xpose.msra.mxu0 %v1468_v26 }
 0x6c9   : > { %2475 = vmatprep.subr.bf16.mxu0 %v2625_v1 }
 0x6ca   : > { %v1576_v32 = vpop.permute.xlu0 %1575 }
 0x6cb   : > { %v1581_v34 = vsel %vm771_vm2, %v1576_v32, 0 }
 0x6ce   : > { %v1687_v37 = vpop.permute.xlu0 %1686 }
 0x6cf   : > { %v1692_v39 = vsel %vm771_vm2, %v1687_v37, 0 }
 0x6d2   : > { %v1798_v40 = vpop.permute.xlu0 %1797 }
 0x6d3   : > { %v1803_v42 = vsel %vm771_vm2, %v1798_v40, 0 }
 0x787   : > { %v1389_v29 = vpop.f32.mrf.mxu0 }
 0x788   : > { %v1390_v30 = vadd.f32 %v2292_v28, %v1389_v29 }
 0x789   : > { %v2453_v31 = vpop.f32.mrf.mxu0 }
 0x78a   : > { %v1462_v33 = vpack.c.bf16 %v1390_v30, %v1390_v30 }
 0x78b   : > { %v1392_v35 = vpop.f32.mrf.mxu0 }
 0x78c   : > { %1573 = vrot.lane.b32.xlu1 %v1462_v33, %s2627_s28  ;;  %2466 = vmatmul.mubr.msk.bf16.vlgmr.msra.gmra.mxu0 %vm771_vm2, %v1462_v33  ;;  %s3116_s28 = smov 96  }
 0x78d   : > { %v2454_v36 = vpop.f32.mrf.mxu0  ;;  %2476 = vmatpush3.bf16.xpose.msra.mxu0 %v1581_v34  ;;  %2477 = vmatprep.mubr.msk.bf16.mxu0 %vm2626_vm0, %v2625_v1 }
 0x78e   : > { %2487 = vmatprep.subr.bf16.mxu0 %v2625_v1 }
 0x790   : > { %1684 = vrot.lane.b32.xlu1 %v1462_v33, %s2632_s5  ;;  %s3117_s5 = smov 80  }
 0x794   : > { %1795 = vrot.lane.b32.xlu1 %v1462_v33, %s2633_s24  ;;  %s3118_s24 = smov 72  }
 0x7fe   : > { %v1574_v38 = vpop.permute.xlu1 %1573 }
 0x7ff   : > { %2478 = vmatmul.mubr.msk.bf16.vlgmr.msra.gmra.mxu0 %vm771_vm2, %v1574_v38 }
 0x800   : > { %2488 = vmatpush3.bf16.xpose.msra.mxu0 %v1692_v39  ;;  %2489 = vmatprep.mubr.msk.bf16.mxu0 %vm2626_vm0, %v2625_v1 }
 0x801   : > { %2499 = vmatprep.subr.bf16.mxu0 %v2625_v1 }
 0x802   : > { %v1685_v41 = vpop.permute.xlu1 %1684 }
 0x806   : > { %v1796_v43 = vpop.permute.xlu1 %1795 }
 0x807   : > { %2490 = vmatmul.mubr.msk.bf16.vlgmr.msra.gmra.mxu0 %vm771_vm2, %v1685_v41 }
 0x808   : > { %2500 = vmatpush3.bf16.xpose.msra.mxu0 %v1803_v42  ;;  %2501 = vmatprep.mubr.msk.bf16.mxu0 %vm2626_vm0, %v2625_v1 }
 0x809   : > { %2511 = vmatprep.subr.bf16.mxu0 %v2625_v1 }
 0x80f   : > { %2502 = vmatmul.mubr.msk.bf16.vlgmr.msra.gmra.mxu0 %vm771_vm2, %v1796_v43 }
 0x810   : > { %2515 = vmatprep.mubr.msk.bf16.mxu0 %vm2626_vm0, %v2625_v1 }
 0x84c   : > { %v1504_v44 = vpop.f32.mrf.mxu0 }
 0x84d   : > { %v1510_v45 = vmul.f32 0.35355338, %v1504_v44 }
 0x84e   : > { %v2467_v46 = vpop.f32.mrf.mxu0 }
 0x84f   : > { %v1511_v47 = vsel %vm771_vm2, %v1510_v45, -inf }
 0x850   : > { %1512 = vmax.xlane.f32.xlu0 %v1511_v47  ;;  %v1507_v48 = vpop.f32.mrf.mxu0 }
 0x852   : > { %v2468_v49 = vpop.f32.mrf.mxu0 }
 0x8bf   : > { %v1617_v50 = vpop.f32.mrf.mxu0 }
 0x8c0   : > { %v1623_v51 = vmul.f32 0.35355338, %v1617_v50 }
 0x8c1   : > { %v2479_v52 = vpop.f32.mrf.mxu0 }
 0x8c2   : > { %v1624_v53 = vsel %vm771_vm2, %v1623_v51, -inf }
 0x8c3   : > { %1625 = vmax.xlane.f32.xlu1 %v1624_v53  ;;  %v1620_v54 = vpop.f32.mrf.mxu0 }
 0x8c4   : > { %v2571_v54 = vld [vmem:[%s3082_s12 + $0x8] sm:$0xff]  }
 0x8c5   : > { %v2480_v55 = vpop.f32.mrf.mxu0  ;;  %2512 = vmatpush3.bf16.msra.mxu0 %v2571_v54 }
 0x8c6   : > { %2513 = vmatprep.subr.bf16.mxu0 %v2625_v1 }
 0x8c7   : > { %v1728_v56 = vpop.f32.mrf.mxu0 }
 0x8c8   : > { %v1734_v57 = vmul.f32 0.35355338, %v1728_v56 }
 0x8c9   : > { %v2491_v58 = vpop.f32.mrf.mxu0 }
 0x8ca   : > { %v1735_v59 = vsel %vm771_vm2, %v1734_v57, -inf }
 0x8cb   : > { %1736 = vmax.xlane.f32.xlu0 %v1735_v59  ;;  %v1731_v60 = vpop.f32.mrf.mxu0 }
 0x8cd   : > { %v2492_v61 = vpop.f32.mrf.mxu0 }
 0x8cf   : > { %v1839_v62 = vpop.f32.mrf.mxu0 }
 0x8d0   : > { %v1845_v63 = vmul.f32 0.35355338, %v1839_v62 }
 0x8d1   : > { %v2503_v0 = vpop.f32.mrf.mxu0 }
 0x8d2   : > { %v1846_v2 = vsel %vm771_vm2, %v1845_v63, -inf }
 0x8d3   : > { %1847 = vmax.xlane.f32.xlu0 %v1846_v2  ;;  %v1842_v4 = vpop.f32.mrf.mxu0 }
 0x8d5   : > { %v2504_v5 = vpop.f32.mrf.mxu0 }
 0x8d9   : > { %v1513_v3 = vpop.xlane.xlu0 %1512 }
 0x8da   : > { %v1514_v6 = vsub.f32 %v1510_v45, %v1513_v3 }
 0x8dc   : > { %v1515_v7 = vmul.f32 1.442695, %v1514_v6 }
 0x8de   : > { %2597 = vpow2.f32 %v1515_v7 }
 0x8eb   : > { %v2598_v8 = vpop.eup %2597 }
 0x8ec   : > { %v1517_v10 = vsel %vm771_vm2, %v2598_v8, 0.0 }
 0x8ed   : > { %1518 = vadd.xlane.f32.xlu1 %v1517_v10 }
 0x8fe   : > { %1524 = vrot.lane.b32.xlu1 %v2925_v24, %s3116_s28 }
 0x94c   : > { %v1626_v11 = vpop.xlane.xlu1 %1625 }
 0x94d   : > { %v1627_v12 = vsub.f32 %v1623_v51, %v1626_v11 }
 0x94f   : > { %v1628_v13 = vmul.f32 1.442695, %v1627_v12 }
 0x951   : > { %2599 = vpow2.f32 %v1628_v13  ;;  %v2308_v13 = vld [vmem:[%s3083_s13] ss:$0 sm:$0xff] }
 0x954   : > { %v1737_v14 = vpop.xlane.xlu0 %1736 }
 0x955   : > { %v1738_v15 = vsub.f32 %v1734_v57, %v1737_v14  ;;  %v2572_v57 = vld [vmem:[%s3082_s12] sm:$0xff]  }
 0x956   : > { %2514 = vmatpush3.bf16.msra.mxu0 %v2572_v57 }
 0x957   : > { %v1739_v16 = vmul.f32 1.442695, %v1738_v15  ;;  %2527 = vmatprep.subr.bf16.mxu0 %v2625_v1 }
 0x959   : > { %2601 = vpow2.f32 %v1739_v16 }
 0x95c   : > { %v1848_v9 = vpop.xlane.xlu0 %1847 }
 0x95d   : > { %v1849_v17 = vsub.f32 %v1845_v63, %v1848_v9 }
 0x95e   : > { %v2600_v19 = vpop.eup %2599 }
 0x95f   : > { %v1850_v20 = vmul.f32 1.442695, %v1849_v17  ;;  %v1630_v21 = vsel %vm771_vm2, %v2600_v19, 0.0 }
 0x960   : > { %1631 = vadd.xlane.f32.xlu0 %v1630_v21 }
 0x961   : > { %2603 = vpow2.f32 %v1850_v20 }
 0x966   : > { %v2602_v22 = vpop.eup %2601 }
 0x967   : > { %v1741_v23 = vsel %vm771_vm2, %v2602_v22, 0.0 }
 0x968   : > { %1742 = vadd.xlane.f32.xlu1 %v1741_v23 }
 0x96e   : > { %v2604_v25 = vpop.eup %2603 }
 0x96f   : > { %v1852_v26 = vsel %vm771_vm2, %v2604_v25, 0.0 }
 0x970   : > { %1853 = vadd.xlane.f32.xlu0 %v1852_v26 }
 0x976   : > { %v1519_v27 = vpop.xlane.xlu1 %1518 }
 0x977   : > { %2605 = vrcp.f32 %v1519_v27  ;;  %v2573_v27 = vld [vmem:[%s3086_s16 + $0x8] sm:$0xff]  }
 0x979   : > { %1747 = vrot.lane.b32.xlu1 %v2925_v24, %s3117_s5 }
 0x97a   : > { %v1525_v28 = vpop.permute.xlu1 %1524 }
 0x97b   : > { %v1530_v29 = vsel %vm836_vm3, %v1525_v28, 0  ;;  %v2575_v28 = vld [vmem:[%s3088_s18 + $0x18] sm:$0xff]  }
 0x97c   : > { %2470 = vmatpush3.bf16.msra.mxu1 %v1530_v29  ;;  %v2576_v29 = vld [vmem:[%s3088_s18 + $0x10] sm:$0xff]  }
 0x97d   : > { %1858 = vrot.lane.b32.xlu1 %v2925_v24, %s3118_s24  ;;  %2481 = vmatprep.subr.bf16.mxu1 %v2625_v1 }
 0x984   : > { %v2606_v30 = vpop.eup %2605 }
 0x985   : > { %v1521_v31 = vmul.f32 %v2606_v30, %v2598_v8 }
 0x986   : > { %1636 = vrot.lane.b32.xlu0 %v2925_v24, %s3119_s30 }
 0x987   : > { %v1522_v32 = vpack.c.bf16 %v1521_v31, %v1521_v31 }
 0x989   : > { %2472 = vmatmul.mubr.msk.bf16.vlgmr.msra.gmra.mxu1 %vm771_vm2, %v1522_v32 }
 0x98a   : > { %2483 = vmatprep.mubr.msk.bf16.mxu1 %vm2626_vm0, %v2625_v1 }
 0x9e9   : > { %v1632_v33 = vpop.xlane.xlu0 %1631 }
 0x9ea   : > { %2607 = vrcp.f32 %v1632_v33 }
 0x9f1   : > { %v1743_v34 = vpop.xlane.xlu1 %1742 }
 0x9f2   : > { %2609 = vrcp.f32 %v1743_v34  ;;  %v2312_v34 = vld [vmem:[%s3084_s14] ss:$0 sm:$0xff] }
 0x9f5   : > { %v1748_v40 = vpop.permute.xlu1 %1747 }
 0x9f6   : > { %v1753_v42 = vsel %vm836_vm3, %v1748_v40, 0  ;;  %v2577_v40 = vld [vmem:[%s3088_s18 + $0x8] sm:$0xff]  }
 0x9f7   : > { %v2608_v35 = vpop.eup %2607 }
 0x9f8   : > { %v1634_v37 = vmul.f32 %v2608_v35, %v2600_v19 }
 0x9f9   : > { %v1854_v36 = vpop.xlane.xlu0 %1853  ;;  %v1859_v44 = vpop.permute.xlu1 %1858 }
 0x9fa   : > { %2611 = vrcp.f32 %v1854_v36  ;;  %v1635_v24 = vpack.c.bf16 %v1634_v37, %v1634_v37  ;;  %v1864_v47 = vsel %vm836_vm3, %v1859_v44, 0  ;;  %v2313_v36 = vld [vmem:[%s3085_s15] ss:$0 sm:$0xff] }
 0x9fd   : > { %v1637_v38 = vpop.permute.xlu0 %1636 }
 0x9fe   : > { %v1642_v39 = vsel %vm836_vm3, %v1637_v38, 0 }
 0x9ff   : > { %2482 = vmatpush3.bf16.msra.mxu1 %v1642_v39  ;;  %v2610_v41 = vpop.eup %2609 }
 0xa00   : > { %2493 = vmatprep.subr.bf16.mxu1 %v2625_v1  ;;  %v1745_v43 = vmul.f32 %v2610_v41, %v2602_v22  ;;  %v2314_v41 = vld [vmem:[%s3087_s17] ss:$0 sm:$0xff] }
 0xa02   : > { %2484 = vmatmul.mubr.msk.bf16.vlgmr.msra.gmra.mxu1 %vm771_vm2, %v1635_v24  ;;  %v1746_v45 = vpack.c.bf16 %v1745_v43, %v1745_v43  ;;  %v2578_v24 = vld [vmem:[%s3088_s18] sm:$0xff]  }
 0xa03   : > { %2494 = vmatpush3.bf16.msra.mxu1 %v1753_v42  ;;  %2495 = vmatprep.mubr.msk.bf16.mxu1 %vm2626_vm0, %v2625_v1 }
 0xa04   : > { %2505 = vmatprep.subr.bf16.mxu1 %v2625_v1 }
 0xa07   : > { %v2612_v46 = vpop.eup %2611 }
 0xa08   : > { %v1856_v48 = vmul.f32 %v2612_v46, %v2604_v25 }
 0xa0a   : > { %2496 = vmatmul.mubr.msk.bf16.vlgmr.msra.gmra.mxu1 %vm771_vm2, %v1746_v45  ;;  %v1857_v49 = vpack.c.bf16 %v1856_v48, %v1856_v48 }
 0xa0b   : > { %2506 = vmatpush3.bf16.msra.mxu1 %v1864_v47  ;;  %2507 = vmatprep.mubr.msk.bf16.mxu1 %vm2626_vm0, %v2625_v1 }
 0xa0c   : > { %2519 = vmatprep.subr.bf16.mxu1 %v2625_v1 }
 0xa12   : > { %2508 = vmatmul.mubr.msk.bf16.vlgmr.msra.gmra.mxu1 %vm771_vm2, %v1857_v49 }
 0xa13   : > { %2523 = vmatprep.mubr.msk.bf16.mxu1 %vm2626_vm0, %v2625_v1  ;;  %2520 = vmatpush3.bf16.msra.mxu1 %v2573_v27 }
 0xa14   : > { %2521 = vmatprep.subr.bf16.mxu1 %v2625_v1 }
 0xa49   : > { %v1566_v50 = vpop.f32.mrf.mxu1 }
 0xa4b   : > { %v2473_v51 = vpop.f32.mrf.mxu1 }
 0xa4d   : > { %v1569_v52 = vpop.f32.mrf.mxu1 }
 0xa4f   : > { %v2474_v53 = vpop.f32.mrf.mxu1 }
 0xac2   : > { %v1678_v55 = vpop.f32.mrf.mxu1 }
 0xac3   : > { %1907 = vrot.lane.b32.xlu0 %v1678_v55, %s3120_s0  ;;  %s695_s0 = scalar_lea.vmem %s3092_s22, %s2777_s1 }
 0xac4   : > { %v2485_v56 = vpop.f32.mrf.mxu1 }
 0xac6   : > { %v1681_v58 = vpop.f32.mrf.mxu1 }
 0xac8   : > { %v2486_v59 = vpop.f32.mrf.mxu1 }
 0xaca   : > { %v1789_v60 = vpop.f32.mrf.mxu1 }
 0xacb   : > { %1911 = vrot.lane.b32.xlu1 %v1789_v60, %s3121_s2 }
 0xacc   : > { %v2497_v61 = vpop.f32.mrf.mxu1 }
 0xace   : > { %v1792_v62 = vpop.f32.mrf.mxu1 }
 0xad0   : > { %v2498_v63 = vpop.f32.mrf.mxu1 }
 0xad2   : > { %v1900_v0 = vpop.f32.mrf.mxu1 }
 0xad3   : > { %1915 = vrot.lane.b32.xlu0 %v1900_v0, %s3122_s29 }
 0xad4   : > { %v2509_v2 = vpop.f32.mrf.mxu1 }
 0xad5   : > { %v2324_v2 = vld [vmem:[%s3090_s20] ss:$0 sm:$0xff] }
 0xad6   : > { %v1903_v4 = vpop.f32.mrf.mxu1 }
 0xad8   : > { %v2510_v5 = vpop.f32.mrf.mxu1 }
 0xad9   : > { %v2325_v5 = vld [vmem:[%s3091_s21] ss:$0 sm:$0xff] }
 0xb35   : > { %v1908_v3 = vpop.permute.xlu0 %1907 }
 0xb36   : > { %v1918_v7 = vsel %vm771_vm2, %v1566_v50, %v1908_v3 }
 0xb3d   : > { %v1912_v6 = vpop.permute.xlu1 %1911 }
 0xb3e   : > { %v1919_v8 = vsel %vm1226_vm4, %v1918_v7, %v1912_v6 }
 0xb45   : > { %v1916_v10 = vpop.permute.xlu0 %1915 }
 0xb46   : > { %v1920_v11 = vsel %vm1228_vm5, %v1919_v8, %v1916_v10 }
 0xb47   : > { %v1921_v12 = vpack.c.bf16 %v1920_v11, %v1920_v11 }
 0xb49   : > { %2516 = vmatmul.mubr.msk.bf16.vlgmr.msra.gmra.mxu0 %vm723_vm1, %v1921_v12 }
 0xb4a   : > { %2535 = vmatprep.mubr.msk.bf16.mxu0 %vm2626_vm0, %v2625_v1  ;;  %2528 = vmatpush3.bf16.msra.mxu0 %v2575_v28 }
 0xb4b   : > { %2529 = vmatprep.subr.bf16.mxu0 %v2625_v1 }
 0xb4e   : > { %2530 = vmatpush3.bf16.msra.mxu0 %v2576_v29 }
 0xb4f   : > { %2531 = vmatprep.subr.bf16.mxu0 %v2625_v1 }
 0xb52   : > { %2532 = vmatpush3.bf16.msra.mxu0 %v2577_v40 }
 0xb53   : > { %2533 = vmatprep.subr.bf16.mxu0 %v2625_v1  ;;  %v2318_v1 = vld [vmem:[%s3089_s19] ss:$0 sm:$0xff] }
 0xb56   : > { %2534 = vmatpush3.bf16.msra.mxu0 %v2578_v24 }
 0xc09   : > { %v1982_v14 = vpop.f32.mrf.mxu0 }
 0xc0a   : > { %v1983_v15 = vadd.f32 %v2308_v13, %v1982_v14 }
 0xc0b   : > { %v2517_v16 = vpop.f32.mrf.mxu0 }
 0xc0c   : > { %v1988_v9 = vadd.f32 %v1983_v15, %v2915_v18  ;;  %v2574_v18 = vld [vmem:[%s3086_s16] sm:$0xff]  }
 0xc0d   : > { %v1985_v17 = vpop.f32.mrf.mxu0  ;;  %2522 = vmatpush3.bf16.msra.mxu1 %v2574_v18 }
 0xc0e   : > { %v1991_v19 = vsel %vm723_vm1, %v1988_v9, 0.0 }
 0xc0f   : > { %1992 = vadd.xlane.f32.xlu1 %v1991_v19  ;;  %v2518_v20 = vpop.f32.mrf.mxu0 }
 0xc98   : > { %v1993_v21 = vpop.xlane.xlu1 %1992 }
 0xc99   : > { %v1994_v22 = vmul.f32 0.03125, %v1993_v21 }
 0xc9b   : > { %v1995_v23 = vsub.f32 %v1988_v9, %v1994_v22 }
 0xc9d   : > { %v1996_v25 = vmul.f32 %v1995_v23, %v1995_v23 }
 0xc9f   : > { %v1997_v26 = vsel %vm723_vm1, %v1996_v25, 0.0 }
 0xca0   : > { %1998 = vadd.xlane.f32.xlu0 %v1997_v26 }
 0xd29   : > { %v1999_v30 = vpop.xlane.xlu0 %1998 }
 0xd2a   : > { %v2000_v31 = vmul.f32 0.03125, %v1999_v30 }
 0xd2c   : > { %v2001_v32 = vadd.f32 1e-05, %v2000_v31 }
 0xd2e   : > { %2613 = vrsqrt.f32 %v2001_v32 }
 0xd3b   : > { %v2614_v33 = vpop.eup %2613 }
 0xd3c   : > { %v2003_v35 = vmul.f32 %v2614_v33, %v1995_v23 }
 0xd3e   : > { %v2010_v37 = vmul.f32 %v2312_v34, %v2003_v35 }
 0xd40   : > { %v2017_v38 = vadd.f32 %v2313_v36, %v2010_v37 }
 0xd42   : > { %v2018_v39 = vpack.c.bf16 %v2017_v38, %v2017_v38 }
 0xd44   : > { %2524 = vmatmul.mubr.msk.bf16.vlgmr.msra.gmra.mxu1 %vm723_vm1, %v2018_v39 }
 0xe04   : > { %v2079_v42 = vpop.f32.mrf.mxu1 }
 0xe05   : > { %v2080_v43 = vadd.f32 %v2314_v41, %v2079_v42 }
 0xe06   : > { %v2525_v44 = vpop.f32.mrf.mxu1 }
 0xe07   : > { %v2085_v45 = vmax.f32 %v2080_v43, 0.0 }
 0xe08   : > { %v2082_v46 = vpop.f32.mrf.mxu1 }
 0xe09   : > { %v2086_v47 = vpack.c.bf16 %v2085_v45, %v2085_v45 }
 0xe0a   : > { %v2526_v48 = vpop.f32.mrf.mxu1 }
 0xe0b   : > { %2536 = vmatmul.mubr.msk.bf16.vlgmr.msra.gmra.mxu0 %vm2126_vm6, %v2086_v47 }
 0xecb   : > { %v2164_v49 = vpop.f32.mrf.mxu0 }
 0xecc   : > { %v2165_v50 = vadd.f32 %v2318_v1, %v2164_v49 }
 0xecd   : > { %v2537_v51 = vpop.f32.mrf.mxu0 }
 0xece   : > { %v2170_v52 = vadd.f32 %v2165_v50, %v2017_v38 }
 0xecf   : > { %v2167_v53 = vpop.f32.mrf.mxu0 }
 0xed0   : > { %v2173_v54 = vsel %vm723_vm1, %v2170_v52, 0.0 }
 0xed1   : > { %2174 = vadd.xlane.f32.xlu0 %v2173_v54  ;;  %v2538_v55 = vpop.f32.mrf.mxu0 }
 0xf5a   : > { %v2175_v56 = vpop.xlane.xlu0 %2174 }
 0xf5b   : > { %v2176_v57 = vmul.f32 0.03125, %v2175_v56 }
 0xf5d   : > { %v2177_v58 = vsub.f32 %v2170_v52, %v2176_v57 }
 0xf5f   : > { %v2178_v59 = vmul.f32 %v2177_v58, %v2177_v58 }
 0xf61   : > { %v2179_v60 = vsel %vm723_vm1, %v2178_v59, 0.0 }
 0xf62   : > { %2180 = vadd.xlane.f32.xlu1 %v2179_v60 }
 0xfeb   : > { %v2181_v61 = vpop.xlane.xlu1 %2180 }
 0xfec   : > { %v2182_v62 = vmul.f32 0.03125, %v2181_v61 }
 0xfee   : > { %v2183_v63 = vadd.f32 1e-05, %v2182_v62 }
 0xff0   : > { %2615 = vrsqrt.f32 %v2183_v63 }
 0xffd   : > { %v2616_v0 = vpop.eup %2615 }
 0xffe   : > { %v2185_v4 = vmul.f32 %v2616_v0, %v2177_v58 }
0x1000   : > { %v2192_v3 = vmul.f32 %v2324_v2, %v2185_v4 }
0x1002   : > { %v2199_v6 = vadd.f32 %v2325_v5, %v2192_v3 }
0x1004   : > { %2200 = vst.msk [vmem:[%s695_s0] sm:$0xff] %vm723_vm1, %v2199_v6 }
0x1005 PF: > { %s32_s3 = sadd.s32 1, %s2623_s3  }
0x1006   : > { %p29_p4 = scmp.ge.s32.totalorder %s32_s3, 4  }
0x1008   :  { %31 = sbr.rel (!%p29_p4) target bundleno = 8 (0x8), region = 141 }

</bundles_post_ra>
